<compile_context>
chip_gen: v6e
topology: v6e:2x2x1
jax: 0.10.0
libtpu: 0.0.40
codegen_flags: <defaults>
</compile_context>

<pallas_src>
import jax
import jax.numpy as jnp
from jax import lax
from jax.experimental import pallas as pl
from jax.experimental.pallas import tpu as pltpu


PADL = 8  # sublane-aligned left offset of the interior inside the conv2 halo scratch


# ----------------------------- fused kernel --------------------------------- #

def fused_feat_kernel(x_ref, w1_ref, b1_ref, w2_ref, b2_ref, pe_ref, r_ref,
                      o_ref, ppad_ref):
    # x_ref  : (1, H*W, Kp)    bf16  conv1 im2col; rows ordered (hp, wp, h2, w2),
    #                                columns ordered (dy, dx, cin), zero-padded to Kp.
    # w1_ref : (Kp, C1)        bf16  conv1 weights (row order / padding matches x columns)
    # b1_ref : (1, C1)         f32
    # w2_ref : (9*C1, C2)      bf16  conv2 weights, row = (dy*3 + dx)*C1 + ci
    # b2_ref : (1, C2)         f32
    # pe_ref : (H2*W2, C2)     f32   precomputed SoftPositionEmbed map (grid @ Wd + bd)
    # r_ref  : (1, O, H2, W2)  f32   nearest-resized ROI masks (0/1)
    # o_ref  : (1, O, C2)      f32   output per-object features
    # ppad_ref: VMEM (H2+2, W2+16, C1) f32 scratch: pooled map + 1px zero halo for conv2
    C1 = w1_ref.shape[1]
    C2 = o_ref.shape[2]
    O = o_ref.shape[1]
    H2, W2 = r_ref.shape[2], r_ref.shape[3]
    hw = H2 * W2

    # ---- Stage 1: conv1 as ONE dense MXU dot over the wrapper-built im2col rows ----
    acc1 = jnp.dot(x_ref[0], w1_ref[...],
                   preferred_element_type=jnp.float32)            # (4*hw, C1)
    # Rows are (h_parity, w_parity, h2, w2): the 2x2/stride-2 maxpool is a pure
    # leading-slab elementwise max -> zero relayout work.
    pooled = jnp.maximum(jnp.maximum(acc1[0 * hw:1 * hw], acc1[1 * hw:2 * hw]),
                         jnp.maximum(acc1[2 * hw:3 * hw], acc1[3 * hw:4 * hw]))
    # conv1 bias + ReLU AFTER the pool (monotonic ops commute with max).
    pooled = jnp.maximum(pooled + b1_ref[...], 0.0)                # (hw, C1)

    # ---- refresh only the halo ring of the conv2 scratch (interior overwritten below) ----
    Wp = ppad_ref.shape[1]
    zrow = jnp.zeros((1, Wp, C1), jnp.float32)
    ppad_ref[0:1, :, :] = zrow
    ppad_ref[H2 + 1:H2 + 2, :, :] = zrow
    zcol = jnp.zeros((H2, 1, C1), jnp.float32)
    ppad_ref[1:H2 + 1, PADL - 1:PADL, :] = zcol
    ppad_ref[1:H2 + 1, PADL + W2:PADL + W2 + 1, :] = zcol
    # interior write is sublane-aligned (offset PADL = 8)
    ppad_ref[1:H2 + 1, PADL:PADL + W2, :] = pooled.reshape(H2, W2, C1)

    # ---- Stage 2: conv2 (3x3, pad 1) as a single K = 9*C1 MXU dot ----
    taps = []
    for dy in range(3):
        for dx in range(3):
            taps.append(
                ppad_ref[dy:dy + H2, PADL - 1 + dx:PADL - 1 + dx + W2, :]
                .astype(jnp.bfloat16))
    lhs = jnp.concatenate(taps, axis=-1).reshape(hw, 9 * C1)       # bf16 (hw, 576)
    acc2 = jnp.dot(lhs, w2_ref[...],
                   preferred_element_type=jnp.float32)             # (hw, C2)
    feats = (jnp.maximum(acc2 + b2_ref[...], 0.0) + pe_ref[...]).reshape(H2, W2, C2)

    # ---- Stage 3: ROI max pooling, streamed per object (fori_loop bounds live ranges) ----
    def roi_body(o, carry):
        r_o = r_ref[0, o]                              # (H2, W2) 0/1 mask
        m = feats * r_o[:, :, None]                    # (H2, W2, C2)
        mh = jnp.max(m, axis=0)                        # leading-dim VPU max -> (W2, C2)
        v = jnp.max(mh, axis=0, keepdims=True)         # single sublane reduce -> (1, C2)
        o_ref[0, pl.ds(o, 1), :] = v.astype(o_ref.dtype)
        return carry

    lax.fori_loop(0, O, roi_body, 0)


# ------------------------------ pallas wrapper ------------------------------- #

def feature_extractor_fused(x_cols, w1p, b1, w2, b2, pe, rois_f):
    B, HW4, Kp = x_cols.shape
    C1 = w1p.shape[1]
    C2 = w2.shape[1]
    O, H2, W2 = rois_f.shape[1], rois_f.shape[2], rois_f.shape[3]
    return pl.pallas_call(
        fused_feat_kernel,
        out_shape=jax.ShapeDtypeStruct((B, O, C2), jnp.float32),
        grid_spec=pltpu.PrefetchScalarGridSpec(
            num_scalar_prefetch=0,
            grid=(B,),
            in_specs=[
                pl.BlockSpec((1, HW4, Kp), lambda b: (b, 0, 0)),
                pl.BlockSpec((Kp, C1), lambda b: (0, 0)),
                pl.BlockSpec((1, C1), lambda b: (0, 0)),
                pl.BlockSpec((9 * C1, C2), lambda b: (0, 0)),
                pl.BlockSpec((1, C2), lambda b: (0, 0)),
                pl.BlockSpec((H2 * W2, C2), lambda b: (0, 0)),
                pl.BlockSpec((1, O, H2, W2), lambda b: (b, 0, 0, 0)),
            ],
            out_specs=pl.BlockSpec((1, O, C2), lambda b: (b, 0, 0)),
            scratch_shapes=[pltpu.VMEM((H2 + 2, W2 + 16, C1), jnp.float32)],
        ),
        compiler_params=pltpu.CompilerParams(
            dimension_semantics=("parallel",),   # batch elements are independent
            vmem_limit_bytes=48 * 1024 * 1024,   # headroom inside v7x's 64 MiB/TC
        ),
    )(x_cols, w1p, b1, w2, b2, pe, rois_f)


# ------------------------------ glue / module -------------------------------- #

def build_grid(res_h, res_w):
    """Equivalent of the PyTorch build_grid: returns (H, W, 4) in [0, 1]."""
    gy = jnp.linspace(0.0, 1.0, res_h)
    gx = jnp.linspace(0.0, 1.0, res_w)
    yy, xx = jnp.meshgrid(gy, gx, indexing="ij")
    g = jnp.stack([yy, xx], axis=-1)                 # (H, W, 2)
    return jnp.concatenate([g, 1.0 - g], axis=-1)    # (H, W, 4)


def interpolate_nearest(r, out_h, out_w):
    """F.interpolate(mode='nearest') semantics: src = floor(dst * in / out)."""
    in_h, in_w = r.shape[-2], r.shape[-1]
    hs = jnp.floor(jnp.arange(out_h) * (in_h / out_h)).astype(jnp.int32)
    ws = jnp.floor(jnp.arange(out_w) * (in_w / out_w)).astype(jnp.int32)
    return r[..., hs[:, None], ws[None, :]]


def _round_up(x, m):
    return ((x + m - 1) // m) * m


@jax.jit
def _forward(w1p, b1, w2, b2, pe, images_nchw, rois):
    B, Cin, H, W = images_nchw.shape
    H2, W2 = H // 2, W // 2
    Kp = w1p.shape[0]
    # NCHW -> NHWC + 1px zero pad (XLA boundary glue).
    x = jnp.transpose(images_nchw, (0, 2, 3, 1))
    xpad = jnp.pad(x, ((0, 0), (1, 1), (1, 1), (0, 0)))
    # im2col for conv1: columns ordered (dy, dx, cin), zero-padded to Kp.
    cols = [xpad[:, dy:dy + H, dx:dx + W, :] for dy in range(3) for dx in range(3)]
    patches = jnp.concatenate(cols, axis=-1)                       # (B, H, W, 9*Cin)
    patches = jnp.pad(patches, ((0, 0), (0, 0), (0, 0), (0, Kp - 9 * Cin)))
    # Reorder rows to (h_parity, w_parity, h2, w2) so the kernel's 2x2 maxpool is a
    # pure leading-dim slab max.
    patches = patches.reshape(B, H2, 2, W2, 2, Kp).transpose(0, 2, 4, 1, 3, 5)
    x_cols = patches.reshape(B, 4 * H2 * W2, Kp).astype(jnp.bfloat16)
    # TODO(synk): nearest-neighbor ROI mask resize stays as an XLA gather (boundary glue).
    rois_f = interpolate_nearest(rois.astype(jnp.float32), H2, W2)
    return feature_extractor_fused(x_cols, w1p, b1, w2, b2, pe, rois_f)


class FeatureExtractorPallas:
    def __init__(self, input_size=128, num_frames=4, num_objects=32, seed=0):
        self.input_size = input_size
        self.num_frames = num_frames
        self.num_objects = num_objects
        cin = 3 * num_frames
        h2 = input_size // 2
        kp = _round_up(9 * cin, 64)
        k = jax.random.PRNGKey(seed)
        k1, k2, k3, k4, k5, k6 = jax.random.split(k, 6)
        # Deterministic synthetic parameters (shapes follow the nn.Module).
        w1 = jax.random.normal(k1, (3, 3, cin, 64), jnp.float32) / (9 * cin) ** 0.5
        w1 = w1.reshape(9 * cin, 64)
        w1 = jnp.pad(w1, ((0, kp - 9 * cin), (0, 0)))
        self.w1p = w1.astype(jnp.bfloat16)                          # (Kp, 64) bf16
        w2 = jax.random.normal(k3, (3, 3, 64, 128), jnp.float32) / (9 * 64) ** 0.5
        self.w2 = w2.reshape(9 * 64, 128).astype(jnp.bfloat16)      # (576, 128) bf16
        self.b1 = (jax.random.normal(k2, (64,), jnp.float32) * 0.01).reshape(1, 64)
        self.b2 = (jax.random.normal(k4, (128,), jnp.float32) * 0.01).reshape(1, 128)
        wd = jax.random.normal(k5, (4, 128), jnp.float32) * 0.5     # Linear(4, 128)
        bd = jax.random.normal(k6, (128,), jnp.float32) * 0.01
        # Precompute SoftPositionEmbed once: (H2*W2, 128).
        grid_flat = build_grid(h2, h2).reshape(h2 * h2, 4).astype(jnp.float32)
        self.pe = (grid_flat @ wd + bd).astype(jnp.float32)

    def __call__(self, images_nchw, rois):
        """images: (B, 3*num_frames, S, S) NCHW; rois: (B, num_objects, h, w) bool.
        Returns (B, num_objects, 128)."""
        return _forward(self.w1p, self.b1, self.w2, self.b2, self.pe,
                        images_nchw.astype(jnp.float32), rois)


if __name__ == "__main__":
    B, input_size, num_frames, num_objects = 2, 32, 2, 8
    model = FeatureExtractorPallas(input_size=input_size,
                                   num_frames=num_frames,
                                   num_objects=num_objects,
                                   seed=0)
    key = jax.random.PRNGKey(0)
    k_img, k_roi = jax.random.split(key)
    images = jax.random.normal(
        k_img, (B, 3 * num_frames, input_size, input_size), jnp.float32)
    rois = jax.random.bernoulli(
        k_roi, 0.3, (B, num_objects, input_size, input_size))
    out = model(images, rois)
    out = jax.block_until_ready(out)
    assert out.shape == (B, num_objects, 128), out.shape
    print("KERNEL_OK")
</pallas_src>

<mosaic_0001>
module attributes {stable_mosaic.version = 11 : i64} {
  func.func @fused_feat_kernel(%arg0: i32, %arg1: memref<1x1024x64xbf16, #tpu.memory_space<vmem>>, %arg2: memref<64x64xbf16, #tpu.memory_space<vmem>>, %arg3: memref<1x64xf32, #tpu.memory_space<vmem>>, %arg4: memref<576x128xbf16, #tpu.memory_space<vmem>>, %arg5: memref<1x128xf32, #tpu.memory_space<vmem>>, %arg6: memref<256x128xf32, #tpu.memory_space<vmem>>, %arg7: memref<1x8x16x16xf32, #tpu.memory_space<vmem>>, %arg8: memref<1x8x128xf32, #tpu.memory_space<vmem>>, %arg9: memref<18x32x64xf32, #tpu.memory_space<vmem>>) attributes {dimension_semantics = [#tpu.dimension_semantics<parallel>], iteration_bounds = array<i64: 2>, scalar_prefetch = 0 : i64, scratch_operands = 1 : i64, tpu.core_type = #tpu.core_type<tc>, window_params = [{transform_indices = @transform_0, window_bounds = array<i64: 1, 1024, 64>}, {pipeline_mode = #tpu.pipeline_mode<synchronous>, transform_indices = @transform_1, window_bounds = array<i64: 64, 64>}, {pipeline_mode = #tpu.pipeline_mode<synchronous>, transform_indices = @transform_2, window_bounds = array<i64: 1, 64>}, {pipeline_mode = #tpu.pipeline_mode<synchronous>, transform_indices = @transform_3, window_bounds = array<i64: 576, 128>}, {pipeline_mode = #tpu.pipeline_mode<synchronous>, transform_indices = @transform_4, window_bounds = array<i64: 1, 128>}, {pipeline_mode = #tpu.pipeline_mode<synchronous>, transform_indices = @transform_5, window_bounds = array<i64: 256, 128>}, {transform_indices = @transform_6, window_bounds = array<i64: 1, 8, 16, 16>}, {transform_indices = @transform_7, window_bounds = array<i64: 1, 8, 128>}]} {
    %c0 = arith.constant 0 : index
    %c0_0 = arith.constant 0 : index
    %c0_1 = arith.constant 0 : index
    %0 = vector.load %arg1[%c0, %c0_0, %c0_1] : memref<1x1024x64xbf16, #tpu.memory_space<vmem>>, vector<1x1024x64xbf16>
    %1 = vector.shape_cast %0 : vector<1x1024x64xbf16> to vector<1024x64xbf16>
    %c0_2 = arith.constant 0 : index
    %c0_3 = arith.constant 0 : index
    %2 = vector.load %arg2[%c0_2, %c0_3] : memref<64x64xbf16, #tpu.memory_space<vmem>>, vector<64x64xbf16>
    %cst = arith.constant dense<0.000000e+00> : vector<1024x64xf32>
    %3 = tpu.matmul %1, %2, %cst {dimension_numbers = #tpu.dot_dimension_numbers<[1], [0], [0], [1], [0, 0, 1, 1], [], []>} : vector<1024x64xbf16>, vector<64x64xbf16>, vector<1024x64xf32> -> vector<1024x64xf32>
    %4 = vector.extract_strided_slice %3 {offsets = [0, 0], sizes = [256, 64], strides = [1, 1]} : vector<1024x64xf32> to vector<256x64xf32>
    %5 = vector.extract_strided_slice %3 {offsets = [256, 0], sizes = [256, 64], strides = [1, 1]} : vector<1024x64xf32> to vector<256x64xf32>
    %6 = arith.maximumf %4, %5 : vector<256x64xf32>
    %7 = vector.extract_strided_slice %3 {offsets = [512, 0], sizes = [256, 64], strides = [1, 1]} : vector<1024x64xf32> to vector<256x64xf32>
    %8 = vector.extract_strided_slice %3 {offsets = [768, 0], sizes = [256, 64], strides = [1, 1]} : vector<1024x64xf32> to vector<256x64xf32>
    %9 = arith.maximumf %7, %8 : vector<256x64xf32>
    %10 = arith.maximumf %6, %9 : vector<256x64xf32>
    %c0_4 = arith.constant 0 : index
    %c0_5 = arith.constant 0 : index
    %11 = vector.load %arg3[%c0_4, %c0_5] : memref<1x64xf32, #tpu.memory_space<vmem>>, vector<1x64xf32>
    %12 = vector.broadcast %11 : vector<1x64xf32> to vector<256x64xf32>
    %13 = arith.addf %10, %12 : vector<256x64xf32>
    %cst_6 = arith.constant 0.000000e+00 : f32
    %14 = vector.broadcast %cst_6 : f32 to vector<256x64xf32>
    %15 = arith.maximumf %13, %14 : vector<256x64xf32>
    %cst_7 = arith.constant 0.000000e+00 : f32
    %16 = vector.broadcast %cst_7 : f32 to vector<1x32x64xf32>
    %c0_8 = arith.constant 0 : index
    %c0_9 = arith.constant 0 : index
    %c0_10 = arith.constant 0 : index
    %17 = vector.load %arg9[%c0_8, %c0_9, %c0_10] : memref<18x32x64xf32, #tpu.memory_space<vmem>>, vector<1x32x64xf32>
    tpu.vector_store %arg9[%c0_8, %c0_9, %c0_10], %16 {strides = array<i32>} : memref<18x32x64xf32, #tpu.memory_space<vmem>>, vector<1x32x64xf32>,
    %c17 = arith.constant 17 : index
    %c0_11 = arith.constant 0 : index
    %c0_12 = arith.constant 0 : index
    %18 = vector.load %arg9[%c17, %c0_11, %c0_12] : memref<18x32x64xf32, #tpu.memory_space<vmem>>, vector<1x32x64xf32>
    tpu.vector_store %arg9[%c17, %c0_11, %c0_12], %16 {strides = array<i32>} : memref<18x32x64xf32, #tpu.memory_space<vmem>>, vector<1x32x64xf32>,
    %cst_13 = arith.constant 0.000000e+00 : f32
    %19 = vector.broadcast %cst_13 : f32 to vector<16x1x64xf32>
    %c1 = arith.constant 1 : index
    %c7 = arith.constant 7 : index
    %c0_14 = arith.constant 0 : index
    %20 = vector.load %arg9[%c1, %c7, %c0_14] : memref<18x32x64xf32, #tpu.memory_space<vmem>>, vector<16x1x64xf32>
    tpu.vector_store %arg9[%c1, %c7, %c0_14], %19 {strides = array<i32>} : memref<18x32x64xf32, #tpu.memory_space<vmem>>, vector<16x1x64xf32>,
    %c1_15 = arith.constant 1 : index
    %c24 = arith.constant 24 : index
    %c0_16 = arith.constant 0 : index
    %21 = vector.load %arg9[%c1_15, %c24, %c0_16] : memref<18x32x64xf32, #tpu.memory_space<vmem>>, vector<16x1x64xf32>
    tpu.vector_store %arg9[%c1_15, %c24, %c0_16], %19 {strides = array<i32>} : memref<18x32x64xf32, #tpu.memory_space<vmem>>, vector<16x1x64xf32>,
    %22 = vector.shape_cast %15 : vector<256x64xf32> to vector<16x16x64xf32>
    %c1_17 = arith.constant 1 : index
    %c8 = arith.constant 8 : index
    %c0_18 = arith.constant 0 : index
    %23 = vector.load %arg9[%c1_17, %c8, %c0_18] : memref<18x32x64xf32, #tpu.memory_space<vmem>>, vector<16x16x64xf32>
    tpu.vector_store %arg9[%c1_17, %c8, %c0_18], %22 {strides = array<i32>} : memref<18x32x64xf32, #tpu.memory_space<vmem>>, vector<16x16x64xf32>,
    %c0_19 = arith.constant 0 : index
    %c7_20 = arith.constant 7 : index
    %c0_21 = arith.constant 0 : index
    %24 = vector.load %arg9[%c0_19, %c7_20, %c0_21] : memref<18x32x64xf32, #tpu.memory_space<vmem>>, vector<16x16x64xf32>
    %25 = arith.truncf %24 : vector<16x16x64xf32> to vector<16x16x64xbf16>
    %c0_22 = arith.constant 0 : index
    %c8_23 = arith.constant 8 : index
    %c0_24 = arith.constant 0 : index
    %26 = vector.load %arg9[%c0_22, %c8_23, %c0_24] : memref<18x32x64xf32, #tpu.memory_space<vmem>>, vector<16x16x64xf32>
    %27 = arith.truncf %26 : vector<16x16x64xf32> to vector<16x16x64xbf16>
    %c0_25 = arith.constant 0 : index
    %c9 = arith.constant 9 : index
    %c0_26 = arith.constant 0 : index
    %28 = vector.load %arg9[%c0_25, %c9, %c0_26] : memref<18x32x64xf32, #tpu.memory_space<vmem>>, vector<16x16x64xf32>
    %29 = arith.truncf %28 : vector<16x16x64xf32> to vector<16x16x64xbf16>
    %c1_27 = arith.constant 1 : index
    %c7_28 = arith.constant 7 : index
    %c0_29 = arith.constant 0 : index
    %30 = vector.load %arg9[%c1_27, %c7_28, %c0_29] : memref<18x32x64xf32, #tpu.memory_space<vmem>>, vector<16x16x64xf32>
    %31 = arith.truncf %30 : vector<16x16x64xf32> to vector<16x16x64xbf16>
    %c1_30 = arith.constant 1 : index
    %c8_31 = arith.constant 8 : index
    %c0_32 = arith.constant 0 : index
    %32 = vector.load %arg9[%c1_30, %c8_31, %c0_32] : memref<18x32x64xf32, #tpu.memory_space<vmem>>, vector<16x16x64xf32>
    %33 = arith.truncf %32 : vector<16x16x64xf32> to vector<16x16x64xbf16>
    %c1_33 = arith.constant 1 : index
    %c9_34 = arith.constant 9 : index
    %c0_35 = arith.constant 0 : index
    %34 = vector.load %arg9[%c1_33, %c9_34, %c0_35] : memref<18x32x64xf32, #tpu.memory_space<vmem>>, vector<16x16x64xf32>
    %35 = arith.truncf %34 : vector<16x16x64xf32> to vector<16x16x64xbf16>
    %c2 = arith.constant 2 : index
    %c7_36 = arith.constant 7 : index
    %c0_37 = arith.constant 0 : index
    %36 = vector.load %arg9[%c2, %c7_36, %c0_37] : memref<18x32x64xf32, #tpu.memory_space<vmem>>, vector<16x16x64xf32>
    %37 = arith.truncf %36 : vector<16x16x64xf32> to vector<16x16x64xbf16>
    %c2_38 = arith.constant 2 : index
    %c8_39 = arith.constant 8 : index
    %c0_40 = arith.constant 0 : index
    %38 = vector.load %arg9[%c2_38, %c8_39, %c0_40] : memref<18x32x64xf32, #tpu.memory_space<vmem>>, vector<16x16x64xf32>
    %39 = arith.truncf %38 : vector<16x16x64xf32> to vector<16x16x64xbf16>
    %c2_41 = arith.constant 2 : index
    %c9_42 = arith.constant 9 : index
    %c0_43 = arith.constant 0 : index
    %40 = vector.load %arg9[%c2_41, %c9_42, %c0_43] : memref<18x32x64xf32, #tpu.memory_space<vmem>>, vector<16x16x64xf32>
    %41 = arith.truncf %40 : vector<16x16x64xf32> to vector<16x16x64xbf16>
    %42 = tpu.concatenate %25, %27, %29, %31, %33, %35, %37, %39, %41 in 2 : vector<16x16x64xbf16>, vector<16x16x64xbf16>, vector<16x16x64xbf16>, vector<16x16x64xbf16>, vector<16x16x64xbf16>, vector<16x16x64xbf16>, vector<16x16x64xbf16>, vector<16x16x64xbf16>, vector<16x16x64xbf16> -> vector<16x16x576xbf16>
    %43 = vector.shape_cast %42 : vector<16x16x576xbf16> to vector<256x576xbf16>
    %c0_44 = arith.constant 0 : index
    %c0_45 = arith.constant 0 : index
    %44 = vector.load %arg4[%c0_44, %c0_45] : memref<576x128xbf16, #tpu.memory_space<vmem>>, vector<576x128xbf16>
    %cst_46 = arith.constant dense<0.000000e+00> : vector<256x128xf32>
    %45 = tpu.matmul %43, %44, %cst_46 {dimension_numbers = #tpu.dot_dimension_numbers<[1], [0], [0], [1], [0, 0, 1, 1], [], []>} : vector<256x576xbf16>, vector<576x128xbf16>, vector<256x128xf32> -> vector<256x128xf32>
    %c0_47 = arith.constant 0 : index
    %c0_48 = arith.constant 0 : index
    %46 = vector.load %arg5[%c0_47, %c0_48] : memref<1x128xf32, #tpu.memory_space<vmem>>, vector<1x128xf32>
    %47 = vector.broadcast %46 : vector<1x128xf32> to vector<256x128xf32>
    %48 = arith.addf %45, %47 : vector<256x128xf32>
    %cst_49 = arith.constant 0.000000e+00 : f32
    %49 = vector.broadcast %cst_49 : f32 to vector<256x128xf32>
    %50 = arith.maximumf %48, %49 : vector<256x128xf32>
    %c0_50 = arith.constant 0 : index
    %c0_51 = arith.constant 0 : index
    %51 = vector.load %arg6[%c0_50, %c0_51] : memref<256x128xf32, #tpu.memory_space<vmem>>, vector<256x128xf32>
    %52 = arith.addf %50, %51 : vector<256x128xf32>
    %53 = vector.shape_cast %52 : vector<256x128xf32> to vector<16x16x128xf32>
    %c0_i32 = arith.constant 0 : i32
    %c8_i32 = arith.constant 8 : i32
    %54 = arith.addi %c0_i32, %c8_i32 : i32
    %c1_i32 = arith.constant 1 : i32
    scf.for %arg10 = %c0_i32 to %54 step %c1_i32  : i32 {
      %c0_53 = arith.constant 0 : index
      %55 = arith.index_cast %arg10 : i32 to index
      %c0_54 = arith.constant 0 : index
      %c0_55 = arith.constant 0 : index
      %56 = vector.load %arg7[%c0_53, %55, %c0_54, %c0_55] : memref<1x8x16x16xf32, #tpu.memory_space<vmem>>, vector<1x1x16x16xf32>
      %57 = vector.shape_cast %56 : vector<1x1x16x16xf32> to vector<16x16xf32>
      %58 = vector.shape_cast %57 : vector<16x16xf32> to vector<16x16x1xf32>
      %59 = vector.broadcast %58 : vector<16x16x1xf32> to vector<16x16x128xf32>
      %60 = arith.mulf %53, %59 : vector<16x16x128xf32>
      %cst_56 = arith.constant dense<0xFF800000> : vector<16x128xf32>
      %61 = vector.multi_reduction <maximumf>, %60, %cst_56 [0] : vector<16x16x128xf32> to vector<16x128xf32>
      %cst_57 = arith.constant dense<0xFF800000> : vector<128xf32>
      %62 = vector.multi_reduction <maximumf>, %61, %cst_57 [0] : vector<16x128xf32> to vector<128xf32>
      %63 = vector.shape_cast %62 : vector<128xf32> to vector<1x128xf32>
      %c0_58 = arith.constant 0 : index
      %64 = arith.index_cast %arg10 : i32 to index
      %c0_59 = arith.constant 0 : index
      %65 = vector.load %arg8[%c0_58, %64, %c0_59] : memref<1x8x128xf32, #tpu.memory_space<vmem>>, vector<1x1x128xf32>
      %66 = vector.shape_cast %65 : vector<1x1x128xf32> to vector<1x128xf32>
      %67 = vector.shape_cast %63 : vector<1x128xf32> to vector<1x1x128xf32>
      tpu.vector_store %arg8[%c0_58, %64, %c0_59], %67 {strides = array<i32>} : memref<1x8x128xf32, #tpu.memory_space<vmem>>, vector<1x1x128xf32>,
    }
    %c8_i32_52 = arith.constant 8 : i32
    return
  }
  func.func @transform_0(%arg0: i32) -> (i32, i32, i32) {
    %c0_i32 = arith.constant 0 : i32
    %c0_i32_0 = arith.constant 0 : i32
    %c0_i32_1 = arith.constant 0 : i32
    return %arg0, %c0_i32, %c0_i32_0 : i32, i32, i32
  }
  func.func @transform_1(%arg0: i32) -> (i32, i32) {
    %c0_i32 = arith.constant 0 : i32
    %c0_i32_0 = arith.constant 0 : i32
    %c0_i32_1 = arith.constant 0 : i32
    return %c0_i32, %c0_i32_0 : i32, i32
  }
  func.func @transform_2(%arg0: i32) -> (i32, i32) {
    %c0_i32 = arith.constant 0 : i32
    %c0_i32_0 = arith.constant 0 : i32
    %c0_i32_1 = arith.constant 0 : i32
    return %c0_i32, %c0_i32_0 : i32, i32
  }
  func.func @transform_3(%arg0: i32) -> (i32, i32) {
    %c0_i32 = arith.constant 0 : i32
    %c0_i32_0 = arith.constant 0 : i32
    %c0_i32_1 = arith.constant 0 : i32
    return %c0_i32, %c0_i32_0 : i32, i32
  }
  func.func @transform_4(%arg0: i32) -> (i32, i32) {
    %c0_i32 = arith.constant 0 : i32
    %c0_i32_0 = arith.constant 0 : i32
    %c0_i32_1 = arith.constant 0 : i32
    return %c0_i32, %c0_i32_0 : i32, i32
  }
  func.func @transform_5(%arg0: i32) -> (i32, i32) {
    %c0_i32 = arith.constant 0 : i32
    %c0_i32_0 = arith.constant 0 : i32
    %c0_i32_1 = arith.constant 0 : i32
    return %c0_i32, %c0_i32_0 : i32, i32
  }
  func.func @transform_6(%arg0: i32) -> (i32, i32, i32, i32) {
    %c0_i32 = arith.constant 0 : i32
    %c0_i32_0 = arith.constant 0 : i32
    %c0_i32_1 = arith.constant 0 : i32
    %c0_i32_2 = arith.constant 0 : i32
    return %arg0, %c0_i32, %c0_i32_0, %c0_i32_1 : i32, i32, i32, i32
  }
  func.func @transform_7(%arg0: i32) -> (i32, i32, i32) {
    %c0_i32 = arith.constant 0 : i32
    %c0_i32_0 = arith.constant 0 : i32
    %c0_i32_1 = arith.constant 0 : i32
    return %arg0, %c0_i32, %c0_i32_0 : i32, i32, i32
  }
}

</mosaic_0001>

<bundles_post_ra>
// kernel: _forward.1
= control target key start
LH: loop header
LB: loop body
LE: loop exit
PB: predicated region body
PF: predicated region fallthrough
CT: control target
= control target key end

     0   :  { %12 = vsyncpa [#allocation4], 0  ;;  %s6316_s0 = inlined_call_operand.vmem [shape: bf16[2,1024,64], index: 0, kind: input, shape index: {}]   ;;  %s6317_s1 = inlined_call_operand.vmem [shape: bf16[64,64], index: 1, kind: input, shape index: {}]   ;;  %s6318_s2 = inlined_call_operand.vmem [shape: f32[1,64], index: 2, kind: input, shape index: {}]   ;;  %s6319_s3 = inlined_call_operand.vmem [shape: bf16[576,128], index: 3, kind: input, shape index: {}]   ;;  %s6320_s4 = inlined_call_operand.vmem [shape: f32[1,128], index: 4, kind: input, shape index: {}]   ;;  %s6321_s5 = inlined_call_operand.vmem [shape: f32[256,128], index: 5, kind: input, shape index: {}]   ;;  %s6322_s6 = inlined_call_operand.vmem [shape: f32[2,8,16,16], index: 6, kind: input, shape index: {}]   ;;  %s6323_s7 = inlined_call_operand.hbm [shape: f32[2,8,128], index: 7, kind: output, shape index: {}]  }
   0x1   :  { %14 = vsyncpa [#allocation4 + $0x1], 0  ;;  %s4875_s24 = smov 0   ;;  %s4877_s25 = smov 0  }
   0x2   :  { %s4879_s26 = smov 0   ;;  %s4881_s27 = smov 0  }
   0x3 LB: > { %s4896_s28 = sadd.s32 4294967295, %s4826_s27   ;;  %s3911_s29 = sadd.s32 4294967294, %s4826_s27   ;;  %s4826_s27 = sphi %s4881_s27, %s6465_s27   ;;  %s4822_s26 = sphi %s4879_s26, %s6464_s26   ;;  %s4818_s25 = sphi %s4877_s25, %s6463_s25   ;;  %s4814_s24 = sphi %s4875_s24, %s6462_s24  }
   0x4   : > { %s4900_s30 = sadd.s32 1, %s4826_s27   ;;  %s184_s8 = sadd.s32 1, %s4822_s26 }
   0x5   : > { %s181_s9 = ssub.s32 %s4826_s27, %s4900_s30  ;;  %p194_p0 = scmp.ne.s32.totalorder %s4822_s26, %s4818_s25 }
   0x6   : > { %p182_p1 = scmp.eq.s32.totalorder %s181_s9, 0  ;;  %p195_p2 = scmp.eq.s32.totalorder %s4896_s28, 1 }
   0x7   : > { %p200_p3 = scmp.ne.s32.totalorder %s4818_s25, %s4814_s24  ;;  %p201_p4 = scmp.eq.s32.totalorder %s3911_s29, 1 }
   0x8   : > { %s4911_s10 = scalar_select %p182_p1, %s4822_s26, %s184_s8  }
   0x9   : > { %p4913_p5 = por %p195_p2, %p194_p0  ;;  %p4917_p6 = por %p201_p4, %p200_p3 }
   0xa   : > { %p3914_p7 = scmp.ge.s32.totalorder %s4826_s27, 1  ;;  %p250_p8 = scmp.lt.s32.totalorder %s4826_s27, 3 }
   0xc   : > { %p251_p9 = pnand %p3914_p7, %p250_p8 }
   0xe   : > { %254 = sbr.rel (%p251_p9) target bundleno = 1240 (0x4d8), region = 48 }
  0x13   : > { %s284_s13 = sand.u32 1, %s4818_s25   ;;  %v4658_v0 = vld [vmem:[%s6317_s1 + $0x18] sm:$0xff]   ;;  %v4659_v1 = vld [vmem:[%s6317_s1 + $0x10] sm:$0xff]   ;;  %p287_p10 = scmp.lt.s32.totalorder %s4896_s28, 1  ;;  %v4660_v2 = vld [vmem:[%s6317_s1 + $0x8] sm:$0xff]   ;;  %vm778_vm0 = vcmask 523264  }
  0x14   : > { %s4929_s16 = sshll.u32 %s284_s13, 3  ;;  %4425 = vmatprep.subr.bf16.mxu0 %v4658_v0  ;;  %4601 = vmatprep.subr.bf16.mxu1 %v4658_v0  ;;  %v4661_v3 = vld [vmem:[%s6317_s1] sm:$0xff]   ;;  %vm1693_vm1 = vcmask 516096   ;;  %s4833_s20 = smov 64  }
  0x15   : > { %4426 = vmatpush3.bf16.msra.mxu0 %v4658_v0  ;;  %4605 = vmatpush3.bf16.msra.mxu1 %v4658_v0  ;;  %s288_s21 = scalar_select %p287_p10, %s4896_s28, 1 }
  0x16   : > { %4427 = vmatprep.subr.bf16.mxu0 %v4659_v1  ;;  %4602 = vmatprep.subr.bf16.mxu1 %v4659_v1  ;;  %s286_s17 = scalar_lea.vmem [#allocation3], %s4929_s16  ;;  %s6230_s18 = smov 0  }
  0x17   : > { %s4111_s29 = sshll.u32 %s288_s21, 9  ;;  %s4112_s8 = sshll.u32 %s288_s21, 7 }
  0x18   : > { %s4945_s15 = scalar_lea.vmem %s6316_s0, %s4111_s29  ;;  %s4950_s19 = scalar_lea.vmem %s6322_s6, %s4112_s8 }
  0x19   : > { %4428 = vmatpush3.bf16.msra.mxu0 %v4659_v1  ;;  %4606 = vmatpush3.bf16.msra.mxu1 %v4659_v1  ;;  %v4662_v4 = vld [vmem:[%s4945_s15] sm:$0xff]   ;;  %v4663_v5 = vld [vmem:[%s4945_s15 + $0x8] sm:$0xff]   ;;  %v4664_v6 = vld [vmem:[%s4945_s15 + $0x10] sm:$0xff]  }
  0x1a   : > { %4429 = vmatprep.subr.bf16.mxu0 %v4660_v2  ;;  %4603 = vmatprep.subr.bf16.mxu1 %v4660_v2  ;;  %v4665_v7 = vld [vmem:[%s4945_s15 + $0x18] sm:$0xff]   ;;  %v4666_v8 = vld [vmem:[%s4945_s15 + $0x20] sm:$0xff]   ;;  %v4667_v9 = vld [vmem:[%s4945_s15 + $0x28] sm:$0xff]  }
  0x1b   : > { %4433 = vmatprep.mubr.msk.bf16.mxu0 %vm778_vm0, %v4662_v4  ;;  %v4668_v10 = vld [vmem:[%s4945_s15 + $0x30] sm:$0xff]   ;;  %v4669_v11 = vld [vmem:[%s4945_s15 + $0x38] sm:$0xff]   ;;  %v4670_v12 = vld [vmem:[%s4945_s15 + $0x40] sm:$0xff]  }
  0x1c   : > { %v4671_v13 = vld [vmem:[%s4945_s15 + $0x48] sm:$0xff]   ;;  %v4672_v14 = vld [vmem:[%s4945_s15 + $0x50] sm:$0xff]   ;;  %v4703_v15 = vld [vmem:[%s4945_s15 + $0x1c0] sm:$0xff]  }
  0x1d   : > { %4430 = vmatpush3.bf16.msra.mxu0 %v4660_v2  ;;  %4607 = vmatpush3.bf16.msra.mxu1 %v4660_v2  ;;  %v4705_v16 = vld [vmem:[%s4945_s15 + $0x1c8] sm:$0xff]   ;;  %v4673_v17 = vld [vmem:[%s4945_s15 + $0x58] sm:$0xff]   ;;  %v4707_v18 = vld [vmem:[%s4945_s15 + $0x1d0] sm:$0xff]  }
  0x1e   : > { %4431 = vmatprep.subr.bf16.mxu0 %v4661_v3  ;;  %4604 = vmatprep.subr.bf16.mxu1 %v4661_v3  ;;  %v4674_v19 = vld [vmem:[%s4945_s15 + $0x60] sm:$0xff]   ;;  %v4709_v20 = vld [vmem:[%s4945_s15 + $0x1d8] sm:$0xff]   ;;  %v4675_v22 = vld [vmem:[%s4945_s15 + $0x68] sm:$0xff]  }
  0x1f   : > { %4545 = vmatprep.mubr.msk.bf16.mxu1 %vm778_vm0, %v4703_v15  ;;  %v4711_v21 = vld [vmem:[%s4945_s15 + $0x1e0] sm:$0xff]   ;;  %v4676_v23 = vld [vmem:[%s4945_s15 + $0x70] sm:$0xff]   ;;  %v4713_v24 = vld [vmem:[%s4945_s15 + $0x1e8] sm:$0xff]  }
  0x20   : > { %v4715_v25 = vld [vmem:[%s4945_s15 + $0x1f0] sm:$0xff]   ;;  %v4677_v26 = vld [vmem:[%s4945_s15 + $0x78] sm:$0xff]   ;;  %v4678_v27 = vld [vmem:[%s4945_s15 + $0x80] sm:$0xff]  }
  0x21   : > { %4432 = vmatpush3.bf16.msra.mxu0 %v4661_v3  ;;  %4608 = vmatpush3.bf16.msra.mxu1 %v4661_v3  ;;  %v4717_v28 = vld [vmem:[%s4945_s15 + $0x1f8] sm:$0xff]   ;;  %v4679_v29 = vld [vmem:[%s4945_s15 + $0x88] sm:$0xff]   ;;  %v4680_v30 = vld [vmem:[%s4945_s15 + $0x90] sm:$0xff]  }
  0x22   : > { %v4681_v31 = vld [vmem:[%s4945_s15 + $0x98] sm:$0xff]   ;;  %v4682_v32 = vld [vmem:[%s4945_s15 + $0xa0] sm:$0xff]   ;;  %v4683_v33 = vld [vmem:[%s4945_s15 + $0xa8] sm:$0xff]  }
  0x23   : > { %v4684_v34 = vld [vmem:[%s4945_s15 + $0xb0] sm:$0xff]   ;;  %v4685_v35 = vld [vmem:[%s4945_s15 + $0xb8] sm:$0xff]   ;;  %v4686_v36 = vld [vmem:[%s4945_s15 + $0xc0] sm:$0xff]  }
  0x24   : > { %4434 = vmatmul.mubr.msk.bf16.vlgmr.msra.gmra.mxu0 %vm778_vm0, %v4663_v5  ;;  %4546 = vmatmul.mubr.msk.bf16.vlgmr.msra.gmra.mxu1 %vm778_vm0, %v4705_v16  ;;  %v4687_v37 = vld [vmem:[%s4945_s15 + $0xc8] sm:$0xff]   ;;  %v4688_v38 = vld [vmem:[%s4945_s15 + $0xd0] sm:$0xff]   ;;  %v4689_v39 = vld [vmem:[%s4945_s15 + $0xd8] sm:$0xff]  }
  0x25   : > { %4437 = vmatprep.mubr.msk.bf16.mxu0 %vm778_vm0, %v4664_v6  ;;  %4549 = vmatprep.mubr.msk.bf16.mxu1 %vm778_vm0, %v4707_v18  ;;  %v4690_v40 = vld [vmem:[%s4945_s15 + $0xe0] sm:$0xff]   ;;  %v4691_v41 = vld [vmem:[%s4945_s15 + $0xe8] sm:$0xff]   ;;  %v4692_v42 = vld [vmem:[%s4945_s15 + $0xf0] sm:$0xff]  }
  0x26   : > { %v4693_v43 = vld [vmem:[%s4945_s15 + $0xf8] sm:$0xff]   ;;  %v4694_v44 = vld [vmem:[%s4945_s15 + $0x100] sm:$0xff]   ;;  %v4695_v45 = vld [vmem:[%s4945_s15 + $0x108] sm:$0xff]  }
  0x27   : > { %v4696_v46 = vld [vmem:[%s4945_s15 + $0x110] sm:$0xff]   ;;  %v4697_v47 = vld [vmem:[%s4945_s15 + $0x118] sm:$0xff]   ;;  %v4698_v48 = vld [vmem:[%s4945_s15 + $0x120] sm:$0xff]  }
  0x28   : > { %v4699_v49 = vld [vmem:[%s4945_s15 + $0x128] sm:$0xff]   ;;  %v4700_v50 = vld [vmem:[%s4945_s15 + $0x130] sm:$0xff]   ;;  %v4701_v51 = vld [vmem:[%s4945_s15 + $0x138] sm:$0xff]  }
  0x29   : > { %v4702_v52 = vld [vmem:[%s4945_s15 + $0x140] sm:$0xff]   ;;  %v4704_v53 = vld [vmem:[%s4945_s15 + $0x148] sm:$0xff]   ;;  %v4706_v54 = vld [vmem:[%s4945_s15 + $0x150] sm:$0xff]  }
  0x2a   : > { %v4708_v55 = vld [vmem:[%s4945_s15 + $0x158] sm:$0xff]   ;;  %v4710_v56 = vld [vmem:[%s4945_s15 + $0x160] sm:$0xff]   ;;  %v4712_v57 = vld [vmem:[%s4945_s15 + $0x168] sm:$0xff]  }
  0x2b   : > { %v4714_v58 = vld [vmem:[%s4945_s15 + $0x170] sm:$0xff]   ;;  %v4716_v59 = vld [vmem:[%s4945_s15 + $0x178] sm:$0xff]   ;;  %v4718_v60 = vld [vmem:[%s4945_s15 + $0x180] sm:$0xff]  }
  0x2c   : > { %4438 = vmatmul.mubr.msk.bf16.gmra.mxu0 %vm778_vm0, %v4665_v7  ;;  %4550 = vmatmul.mubr.msk.bf16.gmra.mxu1 %vm778_vm0, %v4709_v20  ;;  %v4719_v61 = vld [vmem:[%s4945_s15 + $0x188] sm:$0xff]   ;;  %v4720_v62 = vld [vmem:[%s4945_s15 + $0x190] sm:$0xff]   ;;  %v4721_v2 = vld [vmem:[%s4945_s15 + $0x198] sm:$0xff]  }
  0x2d   : > { %4441 = vmatprep.mubr.msk.bf16.mxu0 %vm778_vm0, %v4666_v8  ;;  %4553 = vmatprep.mubr.msk.bf16.mxu1 %vm778_vm0, %v4711_v21  ;;  %v4722_v3 = vld [vmem:[%s4945_s15 + $0x1a0] sm:$0xff]   ;;  %v4723_v8 = vld [vmem:[%s4945_s15 + $0x1a8] sm:$0xff]  }
  0x34   : > { %4442 = vmatmul.mubr.msk.bf16.gmra.mxu0 %vm778_vm0, %v4667_v9  ;;  %4554 = vmatmul.mubr.msk.bf16.gmra.mxu1 %vm778_vm0, %v4713_v24  ;;  %v4724_v9 = vld [vmem:[%s4945_s15 + $0x1b0] sm:$0xff]  }
  0x35   : > { %4445 = vmatprep.mubr.msk.bf16.mxu0 %vm778_vm0, %v4668_v10  ;;  %4557 = vmatprep.mubr.msk.bf16.mxu1 %vm778_vm0, %v4715_v25  ;;  %v4832_v25 = vmov 0.0  }
  0x36   : > { %1711 = vst.msk [vmem:[#allocation2 + $0x58] sm:$0x1] %vm1693_vm1, %v4832_v25  ;;  %1694 = vst.msk [vmem:[#allocation2 + $0x27] sm:$0x1] %vm1693_vm1, %v4832_v25 }
  0x37   : > { %1683 = vst.msk [vmem:[#allocation2] sm:$0xff] %vm778_vm0, %v4832_v25  ;;  %1684 = vst.msk [vmem:[#allocation2 + $0x8] sm:$0xff] %vm778_vm0, %v4832_v25 }
  0x38   : > { %1685 = vst.msk [vmem:[#allocation2 + $0x10] sm:$0xff] %vm778_vm0, %v4832_v25  ;;  %1686 = vst.msk [vmem:[#allocation2 + $0x18] sm:$0xff] %vm778_vm0, %v4832_v25 }
  0x39   : > { %1688 = vst.msk [vmem:[#allocation2 + $0x220] sm:$0xff] %vm778_vm0, %v4832_v25  ;;  %1689 = vst.msk [vmem:[#allocation2 + $0x228] sm:$0xff] %vm778_vm0, %v4832_v25 }
  0x3a   : > { %1690 = vst.msk [vmem:[#allocation2 + $0x230] sm:$0xff] %vm778_vm0, %v4832_v25  ;;  %1691 = vst.msk [vmem:[#allocation2 + $0x238] sm:$0xff] %vm778_vm0, %v4832_v25 }
  0x3b   : > { %1695 = vst.msk [vmem:[#allocation2 + $0x47] sm:$0x1] %vm1693_vm1, %v4832_v25  ;;  %1696 = vst.msk [vmem:[#allocation2 + $0x67] sm:$0x1] %vm1693_vm1, %v4832_v25 }
  0x3c   : > { %4446 = vmatmul.mubr.msk.bf16.gmra.mxu0 %vm778_vm0, %v4669_v11  ;;  %4558 = vmatmul.mubr.msk.bf16.gmra.mxu1 %vm778_vm0, %v4717_v28  ;;  %1697 = vst.msk [vmem:[#allocation2 + $0x87] sm:$0x1] %vm1693_vm1, %v4832_v25  ;;  %1698 = vst.msk [vmem:[#allocation2 + $0xa7] sm:$0x1] %vm1693_vm1, %v4832_v25 }
  0x3d   : > { %4449 = vmatprep.mubr.msk.bf16.mxu0 %vm778_vm0, %v4670_v12  ;;  %1699 = vst.msk [vmem:[#allocation2 + $0xc7] sm:$0x1] %vm1693_vm1, %v4832_v25  ;;  %1700 = vst.msk [vmem:[#allocation2 + $0xe7] sm:$0x1] %vm1693_vm1, %v4832_v25 }
  0x3e   : > { %1701 = vst.msk [vmem:[#allocation2 + $0x107] sm:$0x1] %vm1693_vm1, %v4832_v25  ;;  %1702 = vst.msk [vmem:[#allocation2 + $0x127] sm:$0x1] %vm1693_vm1, %v4832_v25 }
  0x3f   : > { %1703 = vst.msk [vmem:[#allocation2 + $0x147] sm:$0x1] %vm1693_vm1, %v4832_v25  ;;  %1704 = vst.msk [vmem:[#allocation2 + $0x167] sm:$0x1] %vm1693_vm1, %v4832_v25 }
  0x40   : > { %1705 = vst.msk [vmem:[#allocation2 + $0x187] sm:$0x1] %vm1693_vm1, %v4832_v25  ;;  %1706 = vst.msk [vmem:[#allocation2 + $0x1a7] sm:$0x1] %vm1693_vm1, %v4832_v25 }
  0x41   : > { %1707 = vst.msk [vmem:[#allocation2 + $0x1c7] sm:$0x1] %vm1693_vm1, %v4832_v25  ;;  %1708 = vst.msk [vmem:[#allocation2 + $0x1e7] sm:$0x1] %vm1693_vm1, %v4832_v25 }
  0x42   : > { %1709 = vst.msk [vmem:[#allocation2 + $0x207] sm:$0x1] %vm1693_vm1, %v4832_v25  ;;  %1710 = vst.msk [vmem:[#allocation2 + $0x38] sm:$0x1] %vm1693_vm1, %v4832_v25 }
  0x43   : > { %1712 = vst.msk [vmem:[#allocation2 + $0x78] sm:$0x1] %vm1693_vm1, %v4832_v25  ;;  %1713 = vst.msk [vmem:[#allocation2 + $0x98] sm:$0x1] %vm1693_vm1, %v4832_v25 }
  0x44   : > { %4450 = vmatmul.mubr.msk.bf16.gmra.mxu0 %vm778_vm0, %v4671_v13  ;;  %1714 = vst.msk [vmem:[#allocation2 + $0xb8] sm:$0x1] %vm1693_vm1, %v4832_v25  ;;  %1715 = vst.msk [vmem:[#allocation2 + $0xd8] sm:$0x1] %vm1693_vm1, %v4832_v25 }
  0x45   : > { %4453 = vmatprep.mubr.msk.bf16.mxu0 %vm778_vm0, %v4672_v14  ;;  %v4725_v14 = vld [vmem:[%s4945_s15 + $0x1b8] sm:$0xff]   ;;  %1716 = vst.msk [vmem:[#allocation2 + $0xf8] sm:$0x1] %vm1693_vm1, %v4832_v25  ;;  %1717 = vst.msk [vmem:[#allocation2 + $0x118] sm:$0x1] %vm1693_vm1, %v4832_v25 }
  0x46   : > { %1718 = vst.msk [vmem:[#allocation2 + $0x138] sm:$0x1] %vm1693_vm1, %v4832_v25  ;;  %1719 = vst.msk [vmem:[#allocation2 + $0x158] sm:$0x1] %vm1693_vm1, %v4832_v25 }
  0x47   : > { %1720 = vst.msk [vmem:[#allocation2 + $0x178] sm:$0x1] %vm1693_vm1, %v4832_v25  ;;  %1721 = vst.msk [vmem:[#allocation2 + $0x198] sm:$0x1] %vm1693_vm1, %v4832_v25 }
  0x48   : > { %1722 = vst.msk [vmem:[#allocation2 + $0x1b8] sm:$0x1] %vm1693_vm1, %v4832_v25  ;;  %1723 = vst.msk [vmem:[#allocation2 + $0x1d8] sm:$0x1] %vm1693_vm1, %v4832_v25 }
  0x49   : > { %1724 = vst.msk [vmem:[#allocation2 + $0x1f8] sm:$0x1] %vm1693_vm1, %v4832_v25  ;;  %1725 = vst.msk [vmem:[#allocation2 + $0x218] sm:$0x1] %vm1693_vm1, %v4832_v25 }
  0x4c   : > { %4454 = vmatmul.mubr.msk.bf16.gmra.mxu0 %vm778_vm0, %v4673_v17 }
  0x4d   : > { %4457 = vmatprep.mubr.msk.bf16.mxu0 %vm778_vm0, %v4674_v19 }
  0x54   : > { %4458 = vmatmul.mubr.msk.bf16.gmra.mxu0 %vm778_vm0, %v4675_v22 }
  0x55   : > { %4461 = vmatprep.mubr.msk.bf16.mxu0 %vm778_vm0, %v4676_v23 }
  0x5c   : > { %4462 = vmatmul.mubr.msk.bf16.gmra.mxu0 %vm778_vm0, %v4677_v26 }
  0x5d   : > { %4465 = vmatprep.mubr.msk.bf16.mxu0 %vm778_vm0, %v4678_v27 }
  0x64   : > { %4466 = vmatmul.mubr.msk.bf16.gmra.mxu0 %vm778_vm0, %v4679_v29 }
  0x65   : > { %4469 = vmatprep.mubr.msk.bf16.mxu0 %vm778_vm0, %v4680_v30 }
  0x6c   : > { %4470 = vmatmul.mubr.msk.bf16.gmra.mxu0 %vm778_vm0, %v4681_v31 }
  0x6d   : > { %4473 = vmatprep.mubr.msk.bf16.mxu0 %vm778_vm0, %v4682_v32 }
  0x74   : > { %4474 = vmatmul.mubr.msk.bf16.gmra.mxu0 %vm778_vm0, %v4683_v33 }
  0x75   : > { %4477 = vmatprep.mubr.msk.bf16.mxu0 %vm778_vm0, %v4684_v34 }
  0x7c   : > { %4478 = vmatmul.mubr.msk.bf16.gmra.mxu0 %vm778_vm0, %v4685_v35 }
  0x7d   : > { %4481 = vmatprep.mubr.msk.bf16.mxu0 %vm778_vm0, %v4686_v36 }
  0x84   : > { %4482 = vmatmul.mubr.msk.bf16.gmra.mxu0 %vm778_vm0, %v4687_v37 }
  0x85   : > { %4485 = vmatprep.mubr.msk.bf16.mxu0 %vm778_vm0, %v4688_v38 }
  0x8c   : > { %4486 = vmatmul.mubr.msk.bf16.gmra.mxu0 %vm778_vm0, %v4689_v39 }
  0x8d   : > { %4489 = vmatprep.mubr.msk.bf16.mxu0 %vm778_vm0, %v4690_v40 }
  0x94   : > { %4490 = vmatmul.mubr.msk.bf16.gmra.mxu0 %vm778_vm0, %v4691_v41 }
  0x95   : > { %4493 = vmatprep.mubr.msk.bf16.mxu0 %vm778_vm0, %v4692_v42 }
  0x9c   : > { %4494 = vmatmul.mubr.msk.bf16.gmra.mxu0 %vm778_vm0, %v4693_v43 }
  0x9d   : > { %4497 = vmatprep.mubr.msk.bf16.mxu0 %vm778_vm0, %v4694_v44 }
  0xa4   : > { %4498 = vmatmul.mubr.msk.bf16.gmra.mxu0 %vm778_vm0, %v4695_v45 }
  0xa5   : > { %4501 = vmatprep.mubr.msk.bf16.mxu0 %vm778_vm0, %v4696_v46 }
  0xac   : > { %4502 = vmatmul.mubr.msk.bf16.gmra.mxu0 %vm778_vm0, %v4697_v47 }
  0xad   : > { %4505 = vmatprep.mubr.msk.bf16.mxu0 %vm778_vm0, %v4698_v48 }
  0xb4   : > { %4506 = vmatmul.mubr.msk.bf16.gmra.mxu0 %vm778_vm0, %v4699_v49 }
  0xb5   : > { %4509 = vmatprep.mubr.msk.bf16.mxu0 %vm778_vm0, %v4700_v50 }
  0xbc   : > { %4510 = vmatmul.mubr.msk.bf16.gmra.mxu0 %vm778_vm0, %v4701_v51  ;;  %v4726_v51 = vld [vmem:[%s6319_s3 + $0x118] sm:$0xff]  }
  0xbd   : > { %4513 = vmatprep.mubr.msk.bf16.mxu0 %vm778_vm0, %v4702_v52  ;;  %4561 = vmatprep.subr.bf16.mxu0 %v4726_v51 }
  0xbe   : > { %4562 = vmatpush3.bf16.msra.mxu0 %v4726_v51 }
  0xc4   : > { %4514 = vmatmul.mubr.msk.bf16.gmra.mxu0 %vm778_vm0, %v4704_v53 }
  0xc5   : > { %4517 = vmatprep.mubr.msk.bf16.mxu0 %vm778_vm0, %v4706_v54 }
  0xcc   : > { %4518 = vmatmul.mubr.msk.bf16.gmra.mxu0 %vm778_vm0, %v4708_v55 }
  0xcd   : > { %4521 = vmatprep.mubr.msk.bf16.mxu0 %vm778_vm0, %v4710_v56  ;;  %v4727_v56 = vld [vmem:[%s6319_s3 + $0x110] sm:$0xff]  }
  0xce   : > { %4563 = vmatprep.subr.bf16.mxu0 %v4727_v56 }
  0xcf   : > { %4564 = vmatpush3.bf16.msra.mxu0 %v4727_v56 }
  0xd4   : > { %4522 = vmatmul.mubr.msk.bf16.gmra.mxu0 %vm778_vm0, %v4712_v57 }
  0xd5   : > { %4525 = vmatprep.mubr.msk.bf16.mxu0 %vm778_vm0, %v4714_v58 }
  0xdc   : > { %4526 = vmatmul.mubr.msk.bf16.gmra.mxu0 %vm778_vm0, %v4716_v59 }
  0xdd   : > { %4529 = vmatprep.mubr.msk.bf16.mxu0 %vm778_vm0, %v4718_v60 }
  0xe4   : > { %v5068_v63 = vpop.f32.mrf.mxu0  ;;  %4530 = vmatmul.mubr.msk.bf16.gmra.mxu0 %vm778_vm0, %v4719_v61  ;;  %v4728_v61 = vld [vmem:[%s6319_s3 + $0x108] sm:$0xff]  }
  0xe5   : > { %4533 = vmatprep.mubr.msk.bf16.mxu0 %vm778_vm0, %v4720_v62  ;;  %4565 = vmatprep.subr.bf16.mxu0 %v4728_v61 }
  0xe6   : > { %v5072_v0 = vpop.f32.mrf.mxu0  ;;  %4566 = vmatpush3.bf16.msra.mxu0 %v4728_v61 }
  0xe8   : > { %v5074_v1 = vpop.f32.mrf.mxu0 }
  0xe9   : > { %6346 = vst [vmem:[#allocation6_spill] sm:$0xff] %v5074_v1 }
  0xea   : > { %v5078_v4 = vpop.f32.mrf.mxu0 }
  0xec   : > { %v5080_v5 = vpop.f32.mrf.mxu0  ;;  %4534 = vmatmul.mubr.msk.bf16.gmra.mxu0 %vm778_vm0, %v4721_v2 }
  0xed   : > { %6347 = vst [vmem:[#allocation7_spill] sm:$0xff] %v5080_v5  ;;  %4537 = vmatprep.mubr.msk.bf16.mxu0 %vm778_vm0, %v4722_v3 }
  0xee   : > { %v5084_v6 = vpop.f32.mrf.mxu0 }
  0xef   : > { %6348 = vst [vmem:[#allocation8_spill] sm:$0xff] %v5084_v6 }
  0xf0   : > { %v5086_v7 = vpop.f32.mrf.mxu0 }
  0xf1   : > { %6349 = vst [vmem:[#allocation9_spill] sm:$0xff] %v5086_v7 }
  0xf2   : > { %v5090_v10 = vpop.f32.mrf.mxu0 }
  0xf3   : > { %6350 = vst [vmem:[#allocation10_spill] sm:$0xff] %v5090_v10 }
  0xf4   : > { %v5092_v11 = vpop.f32.mrf.mxu0  ;;  %4538 = vmatmul.mubr.msk.bf16.gmra.mxu0 %vm778_vm0, %v4723_v8 }
  0xf5   : > { %6351 = vst [vmem:[#allocation11_spill] sm:$0xff] %v5092_v11  ;;  %4541 = vmatprep.mubr.msk.bf16.mxu0 %vm778_vm0, %v4724_v9  ;;  %v4729_v9 = vld [vmem:[%s6319_s3 + $0x100] sm:$0xff]  }
  0xf6   : > { %v5096_v12 = vpop.f32.mrf.mxu0  ;;  %4567 = vmatprep.subr.bf16.mxu0 %v4729_v9 }
  0xf7   : > { %6352 = vst [vmem:[#allocation12_spill] sm:$0xff] %v5096_v12  ;;  %4568 = vmatpush3.bf16.msra.mxu0 %v4729_v9 }
  0xf8   : > { %v5098_v13 = vpop.f32.mrf.mxu0 }
  0xf9   : > { %6353 = vst [vmem:[#allocation13_spill] sm:$0xff] %v5098_v13 }
  0xfa   : > { %v5101_v15 = vpop.f32.mrf.mxu0 }
  0xfb   : > { %6354 = vst [vmem:[#allocation14_spill] sm:$0xff] %v5101_v15 }
  0xfc   : > { %v5103_v16 = vpop.f32.mrf.mxu0  ;;  %4542 = vmatmul.mubr.msk.bf16.gmra.mxu0 %vm778_vm0, %v4725_v14 }
  0xfd   : > { %6355 = vst [vmem:[#allocation15_spill] sm:$0xff] %v5103_v16 }
  0xfe   : > { %v5106_v17 = vpop.f32.mrf.mxu0 }
  0xff   : > { %6356 = vst [vmem:[#allocation16_spill] sm:$0xff] %v5106_v17 }
 0x100   : > { %v5108_v18 = vpop.f32.mrf.mxu0 }
 0x101   : > { %6357 = vst [vmem:[#allocation17_spill] sm:$0xff] %v5108_v18 }
 0x102   : > { %v5110_v19 = vpop.f32.mrf.mxu0 }
 0x103   : > { %6358 = vst [vmem:[#allocation18_spill] sm:$0xff] %v5110_v19  ;;  %v4547_v19 = vpop.f32.mrf.mxu1 }
 0x104   : > { %v5112_v20 = vpop.f32.mrf.mxu0 }
 0x105   : > { %v1453_v14 = vpop.f32.mrf.mxu1 }
 0x106   : > { %v5114_v21 = vpop.f32.mrf.mxu0 }
 0x107   : > { %v4548_v47 = vpop.f32.mrf.mxu1 }
 0x108   : > { %v5116_v22 = vpop.f32.mrf.mxu0 }
 0x109   : > { %v1456_v42 = vpop.f32.mrf.mxu1 }
 0x10a   : > { %v5118_v23 = vpop.f32.mrf.mxu0 }
 0x10c   : > { %v5120_v24 = vpop.f32.mrf.mxu0 }
 0x10e   : > { %v5162_v26 = vpop.f32.mrf.mxu0 }
 0x110   : > { %v5164_v27 = vpop.f32.mrf.mxu0 }
 0x112   : > { %v5166_v28 = vpop.f32.mrf.mxu0 }
 0x114   : > { %v5168_v29 = vpop.f32.mrf.mxu0 }
 0x116   : > { %v5170_v30 = vpop.f32.mrf.mxu0 }
 0x118   : > { %v5172_v31 = vpop.f32.mrf.mxu0 }
 0x11a   : > { %v5174_v32 = vpop.f32.mrf.mxu0 }
 0x11c   : > { %v5176_v33 = vpop.f32.mrf.mxu0 }
 0x11e   : > { %v5178_v34 = vpop.f32.mrf.mxu0 }
 0x120   : > { %v5180_v35 = vpop.f32.mrf.mxu0 }
 0x122   : > { %v5182_v36 = vpop.f32.mrf.mxu0 }
 0x124   : > { %v5184_v37 = vpop.f32.mrf.mxu0 }
 0x126   : > { %v5188_v39 = vpop.f32.mrf.mxu0 }
 0x128   : > { %v5192_v41 = vpop.f32.mrf.mxu0 }
 0x129   : > { %6359 = vst [vmem:[#allocation19_spill] sm:$0xff] %v5192_v41 }
 0x12a   : > { %v5196_v43 = vpop.f32.mrf.mxu0 }
 0x12c   : > { %v5198_v44 = vpop.f32.mrf.mxu0 }
 0x12d   : > { %6360 = vst [vmem:[#allocation20_spill] sm:$0xff] %v5198_v44 }
 0x12e   : > { %v5202_v46 = vpop.f32.mrf.mxu0 }
 0x12f   : > { %6361 = vst [vmem:[#allocation21_spill] sm:$0xff] %v5202_v46 }
 0x130   : > { %v5206_v48 = vpop.f32.mrf.mxu0 }
 0x131   : > { %6362 = vst [vmem:[#allocation22_spill] sm:$0xff] %v5206_v48 }
 0x132   : > { %v5210_v50 = vpop.f32.mrf.mxu0 }
 0x133   : > { %6363 = vst [vmem:[#allocation23_spill] sm:$0xff] %v5210_v50 }
 0x134   : > { %v5215_v52 = vpop.f32.mrf.mxu0 }
 0x135   : > { %6364 = vst [vmem:[#allocation24_spill] sm:$0xff] %v5215_v52 }
 0x136   : > { %v5219_v54 = vpop.f32.mrf.mxu0 }
 0x137   : > { %6365 = vst [vmem:[#allocation25_spill] sm:$0xff] %v5219_v54 }
 0x138   : > { %v5226_v57 = vpop.f32.mrf.mxu0 }
 0x139   : > { %6366 = vst [vmem:[#allocation26_spill] sm:$0xff] %v5226_v57 }
 0x13a   : > { %v5230_v59 = vpop.f32.mrf.mxu0 }
 0x13b   : > { %6367 = vst [vmem:[#allocation27_spill] sm:$0xff] %v5230_v59  ;;  %v4551_v59 = vpop.f32.mrf.mxu1 }
 0x13c   : > { %v5232_v60 = vpop.f32.mrf.mxu0 }
 0x13d   : > { %6368 = vst [vmem:[#allocation28_spill] sm:$0xff] %v5232_v60  ;;  %v1469_v52 = vpop.f32.mrf.mxu1 }
 0x13e   : > { %v5239_v2 = vpop.f32.mrf.mxu0 }
 0x13f   : > { %6369 = vst [vmem:[#allocation29_spill] sm:$0xff] %v5239_v2  ;;  %v4552_v7 = vpop.f32.mrf.mxu1 }
 0x140   : > { %v5243_v8 = vpop.f32.mrf.mxu0 }
 0x141   : > { %6370 = vst [vmem:[#allocation30_spill] sm:$0xff] %v5243_v8 }
 0x142   : > { %v5250_v25 = vpop.f32.mrf.mxu0 }
 0x143   : > { %6371 = vst [vmem:[#allocation31_spill] sm:$0xff] %v5250_v25 }
 0x144   : > { %v4483_v51 = vpop.f32.mrf.mxu0 }
 0x145   : > { %v1534_v56 = vmax.f32 %v5112_v20, %v4483_v51 }
 0x146   : > { %v1197_v62 = vpop.f32.mrf.mxu0 }
 0x147   : > { %v1532_v3 = vmax.f32 %v5114_v21, %v1197_v62 }
 0x148   : > { %v5254_v61 = vpop.f32.mrf.mxu0 }
 0x14a   : > { %v5258_v55 = vpop.f32.mrf.mxu0 }
 0x14c   : > { %v5260_v53 = vpop.f32.mrf.mxu0 }
 0x14e   : > { %v5264_v49 = vpop.f32.mrf.mxu0 }
 0x150   : > { %v5268_v9 = vpop.f32.mrf.mxu0 }
 0x152   : > { %v5272_v62 = vpop.f32.mrf.mxu0 }
 0x154   : > { %v5274_v51 = vpop.f32.mrf.mxu0 }
 0x156   : > { %v5278_v45 = vpop.f32.mrf.mxu0 }
 0x158   : > { %v5282_v40 = vpop.f32.mrf.mxu0 }
 0x15a   : > { %v5286_v20 = vpop.f32.mrf.mxu0 }
 0x15c   : > { %v5288_v21 = vpop.f32.mrf.mxu0 }
 0x15e   : > { %v5292_v58 = vpop.f32.mrf.mxu0 }
 0x160   : > { %v5296_v8 = vpop.f32.mrf.mxu0 }
 0x162   : > { %v5300_v18 = vpop.f32.mrf.mxu0 }
 0x164   : > { %v5302_v38 = vpop.f32.mrf.mxu0 }
 0x166   : > { %v5304_v25 = vpop.f32.mrf.mxu0 }
 0x168   : > { %v5306_v2 = vpop.f32.mrf.mxu0 }
 0x16a   : > { %v5308_v17 = vpop.f32.mrf.mxu0 }
 0x16b   : > { %6372 = vst [vmem:[#allocation32_spill] sm:$0xff] %v5308_v17 }
 0x16c   : > { %v5310_v60 = vpop.f32.mrf.mxu0 }
 0x16d   : > { %6373 = vst [vmem:[#allocation33_spill] sm:$0xff] %v5310_v60 }
 0x16e   : > { %v5312_v16 = vpop.f32.mrf.mxu0 }
 0x16f   : > { %6374 = vst [vmem:[#allocation34_spill] sm:$0xff] %v5312_v16 }
 0x170   : > { %v5314_v57 = vpop.f32.mrf.mxu0 }
 0x171   : > { %6375 = vst [vmem:[#allocation35_spill] sm:$0xff] %v5314_v57  ;;  %v1472_v57 = vpop.f32.mrf.mxu1 }
 0x172   : > { %v5316_v13 = vpop.f32.mrf.mxu0 }
 0x173   : > { %6376 = vst [vmem:[#allocation36_spill] sm:$0xff] %v5316_v13 }
 0x174   : > { %v5318_v15 = vpop.f32.mrf.mxu0 }
 0x175   : > { %6377 = vst [vmem:[#allocation37_spill] sm:$0xff] %v5318_v15  ;;  %v4555_v15 = vpop.f32.mrf.mxu1 }
 0x176   : > { %v5320_v54 = vpop.f32.mrf.mxu0 }
 0x177   : > { %6378 = vst [vmem:[#allocation38_spill] sm:$0xff] %v5320_v54  ;;  %v1485_v44 = vpop.f32.mrf.mxu1 }
 0x178   : > { %v5322_v12 = vpop.f32.mrf.mxu0 }
 0x179   : > { %6379 = vst [vmem:[#allocation39_spill] sm:$0xff] %v5322_v12  ;;  %v5337_v12 = vld [vmem:[%s6318_s2] ss:$0 sm:$0xff] }
 0x17a   : > { %v5324_v11 = vpop.f32.mrf.mxu0 }
 0x17b   : > { %6380 = vst [vmem:[#allocation40_spill] sm:$0xff] %v5324_v11 }
 0x17c   : > { %v5326_v48 = vpop.f32.mrf.mxu0 }
 0x17d   : > { %6381 = vst [vmem:[#allocation41_spill] sm:$0xff] %v5326_v48 }
 0x17e   : > { %v5328_v10 = vpop.f32.mrf.mxu0 }
 0x17f   : > { %6382 = vst [vmem:[#allocation42_spill] sm:$0xff] %v5328_v10 }
 0x180   : > { %v5330_v50 = vpop.f32.mrf.mxu0 }
 0x181   : > { %6383 = vst [vmem:[#allocation43_spill] sm:$0xff] %v5330_v50 }
 0x182   : > { %v5332_v46 = vpop.f32.mrf.mxu0 }
 0x183   : > { %6384 = vst [vmem:[#allocation44_spill] sm:$0xff] %v5332_v46  ;;  %v1533_v46 = vmax.f32 %v5118_v23, %v5258_v55 }
 0x184   : > { %v4515_v13 = vpop.f32.mrf.mxu0 }
 0x185   : > { %v1566_v6 = vmax.f32 %v4515_v13, %v4547_v19  ;;  %v6385_v19 = vmax.f32 %v5116_v22, %v5254_v61  ;;  %v6386_v22 = vmax.f32 %v5120_v24, %v5260_v53  ;;  %v6388_v53 = vmax.f32 %v5164_v27, %v5268_v9 }
 0x186   : > { %v1325_v54 = vpop.f32.mrf.mxu0 }
 0x187   : > { %v1598_v11 = vmax.f32 %v1534_v56, %v1566_v6  ;;  %v1564_v16 = vmax.f32 %v1325_v54, %v1453_v14  ;;  %v4556_v54 = vpop.f32.mrf.mxu1 }
 0x188   : > { %v4516_v48 = vpop.f32.mrf.mxu0 }
 0x189   : > { %v1637_v10 = vadd.f32 %v5337_v12, %v1598_v11  ;;  %v1596_v5 = vmax.f32 %v1532_v3, %v1564_v16  ;;  %v1567_v50 = vmax.f32 %v4516_v48, %v4548_v47  ;;  %v1488_v55 = vpop.f32.mrf.mxu1 }
 0x18a   : > { %v1328_v60 = vpop.f32.mrf.mxu0 }
 0x18b   : > { %v1669_v17 = vmax.f32 %v1637_v10, 0.0  ;;  %v1635_v13 = vadd.f32 %v5337_v12, %v1596_v5  ;;  %v1599_v41 = vmax.f32 %v6385_v19, %v1567_v50  ;;  %v1565_v1 = vmax.f32 %v1328_v60, %v1456_v42  ;;  %v4559_v19 = vpop.f32.mrf.mxu1 }
 0x18c   : > { %v4519_v6 = vpop.f32.mrf.mxu0  ;;  %v1537_v60 = vmax.f32 %v5166_v28, %v5272_v62 }
 0x18d   : > { %1744 = vst.msk [vmem:[#allocation2 + $0x148] sm:$0xff] %vm778_vm0, %v1669_v17  ;;  %v1667_v14 = vmax.f32 %v1635_v13, 0.0  ;;  %v1638_v11 = vadd.f32 %v5337_v12, %v1599_v41  ;;  %v1597_v16 = vmax.f32 %v1533_v46, %v1565_v1  ;;  %v1570_v47 = vmax.f32 %v4519_v6, %v4551_v59  ;;  %v4731_v6 = vld [vmem:[%s6319_s3 + $0x38] sm:$0xff]  }
 0x18e   : > { %v1341_v48 = vpop.f32.mrf.mxu0  ;;  %v6387_v1 = vmax.f32 %v5162_v26, %v5264_v49 }
 0x18f   : > { %1742 = vst.msk [vmem:[#allocation2 + $0x128] sm:$0xff] %vm778_vm0, %v1667_v14  ;;  %v1670_v10 = vmax.f32 %v1638_v11, 0.0  ;;  %v1636_v5 = vadd.f32 %v5337_v12, %v1597_v16  ;;  %v1602_v23 = vmax.f32 %v6386_v22, %v1570_v47  ;;  %v1568_v42 = vmax.f32 %v1341_v48, %v1469_v52  ;;  %v1501_v48 = vpop.f32.mrf.mxu1 }
 0x190   : > { %v4520_v50 = vpop.f32.mrf.mxu0  ;;  %v6389_v14 = vmax.f32 %v5168_v29, %v5274_v51  ;;  %v4733_v29 = vld [vmem:[%s6319_s3 + $0x30] sm:$0xff]  }
 0x191   : > { %1745 = vst.msk [vmem:[#allocation2 + $0x150] sm:$0xff] %vm778_vm0, %v1670_v10  ;;  %v1668_v17 = vmax.f32 %v1636_v5, 0.0  ;;  %v1641_v41 = vadd.f32 %v5337_v12, %v1602_v23  ;;  %v1600_v46 = vmax.f32 %v6387_v1, %v1568_v42  ;;  %v1571_v59 = vmax.f32 %v4520_v50, %v4552_v7  ;;  %v4730_v7 = vld [vmem:[%s6319_s3 + $0x78] sm:$0xff]   ;;  %v4732_v42 = vld [vmem:[%s6319_s3 + $0x70] sm:$0xff]   ;;  %v4560_v1 = vpop.f32.mrf.mxu1 }
 0x192   : > { %v1344_v3 = vpop.f32.mrf.mxu0  ;;  %4181 = vmatprep.subr.bf16.mxu1 %v4730_v7  ;;  %v6390_v5 = vmax.f32 %v5170_v30, %v5278_v45  ;;  %v6391_v30 = vmax.f32 %v5172_v31, %v5282_v40  ;;  %v4735_v31 = vld [vmem:[%s6319_s3 + $0x28] sm:$0xff]   ;;  %v6393_v7 = vmax.f32 %v5178_v34, %v5292_v58  ;;  %v6394_v34 = vmax.f32 %v5180_v35, %v5296_v8  ;;  %v4739_v35 = vld [vmem:[%s6319_s3 + $0x18] sm:$0xff]  }
 0x193   : > { %1743 = vst.msk [vmem:[#allocation2 + $0x130] sm:$0xff] %vm778_vm0, %v1668_v17  ;;  %v1673_v24 = vmax.f32 %v1641_v41, 0.0  ;;  %v1639_v52 = vadd.f32 %v5337_v12, %v1600_v46  ;;  %v1603_v56 = vmax.f32 %v6388_v53, %v1571_v59  ;;  %v1569_v61 = vmax.f32 %v1344_v3, %v1472_v57  ;;  %4182 = vmatpush3.bf16.msra.mxu1 %v4731_v6  ;;  %v4734_v46 = vld [vmem:[%s6319_s3 + $0x68] sm:$0xff]  }
 0x194   : > { %v4523_v13 = vpop.f32.mrf.mxu0  ;;  %4183 = vmatprep.subr.bf16.mxu1 %v4732_v42  ;;  %v6396_v42 = vmax.f32 %v5072_v0, %v5188_v39  ;;  %v6397_v39 = vld [vmem:[#allocation6_spill] sm:$0xff] }
 0x195   : > { %1748 = vst.msk [vmem:[#allocation2 + $0x188] sm:$0xff] %vm778_vm0, %v1673_v24  ;;  %v1671_v26 = vmax.f32 %v1639_v52, 0.0  ;;  %v1642_v28 = vadd.f32 %v5337_v12, %v1603_v56  ;;  %v1601_v49 = vmax.f32 %v1537_v60, %v1569_v61  ;;  %v1574_v62 = vmax.f32 %v4523_v13, %v4555_v15  ;;  %v1504_v61 = vpop.f32.mrf.mxu1 }
 0x196   : > { %v1357_v27 = vpop.f32.mrf.mxu0  ;;  %v6392_v24 = vmax.f32 %v5176_v33, %v5288_v21  ;;  %v4737_v33 = vld [vmem:[%s6319_s3 + $0x20] sm:$0xff]   ;;  %v1545_v21 = vmax.f32 %v5182_v36, %v5300_v18 }
 0x197   : > { %1746 = vst.msk [vmem:[#allocation2 + $0x168] sm:$0xff] %vm778_vm0, %v1671_v26  ;;  %v1674_v57 = vmax.f32 %v1642_v28, 0.0  ;;  %v1640_v9 = vadd.f32 %v5337_v12, %v1601_v49  ;;  %v1606_v11 = vmax.f32 %v6389_v14, %v1574_v62  ;;  %v1572_v16 = vmax.f32 %v1357_v27, %v1485_v44  ;;  %4184 = vmatpush3.bf16.msra.mxu1 %v4733_v29  ;;  %v4736_v49 = vld [vmem:[%s6319_s3 + $0x60] sm:$0xff]   ;;  %v4738_v14 = vld [vmem:[%s6319_s3 + $0x58] sm:$0xff]  }
 0x198   : > { %v4524_v47 = vpop.f32.mrf.mxu0  ;;  %v1541_v44 = vmax.f32 %v5174_v32, %v5286_v20  ;;  %4185 = vmatprep.subr.bf16.mxu1 %v4734_v46 }
 0x199   : > { %1749 = vst.msk [vmem:[#allocation2 + $0x190] sm:$0xff] %vm778_vm0, %v1674_v57  ;;  %v1672_v15 = vmax.f32 %v1640_v9, 0.0  ;;  %v1645_v10 = vadd.f32 %v5337_v12, %v1606_v11  ;;  %v1604_v22 = vmax.f32 %v6390_v5, %v1572_v16  ;;  %v1575_v23 = vmax.f32 %v4524_v47, %v4556_v54 }
 0x19a   : > { %v1360_v51 = vpop.f32.mrf.mxu0 }
 0x19b   : > { %1747 = vst.msk [vmem:[#allocation2 + $0x170] sm:$0xff] %vm778_vm0, %v1672_v15  ;;  %v1677_v50 = vmax.f32 %v1645_v10, 0.0  ;;  %v1643_v17 = vadd.f32 %v5337_v12, %v1604_v22  ;;  %v1607_v45 = vmax.f32 %v6391_v30, %v1575_v23  ;;  %v1573_v54 = vmax.f32 %v1360_v51, %v1488_v55  ;;  %4186 = vmatpush3.bf16.msra.mxu1 %v4735_v31 }
 0x19c   : > { %v4527_v41 = vpop.f32.mrf.mxu0  ;;  %4187 = vmatprep.subr.bf16.mxu1 %v4736_v49  ;;  %v6395_v15 = vmax.f32 %v5068_v63, %v5184_v37  ;;  %v4740_v63 = vld [vmem:[%s6319_s3 + $0x50] sm:$0xff]  }
 0x19d   : > { %1752 = vst.msk [vmem:[#allocation2 + $0x1c8] sm:$0xff] %vm778_vm0, %v1677_v50  ;;  %v1675_v32 = vmax.f32 %v1643_v17, 0.0  ;;  %v1646_v20 = vadd.f32 %v5337_v12, %v1607_v45  ;;  %v1605_v59 = vmax.f32 %v1541_v44, %v1573_v54  ;;  %v1578_v60 = vmax.f32 %v4527_v41, %v4559_v19  ;;  %v4741_v37 = vld [vmem:[%s6319_s3 + $0x10] sm:$0xff]   ;;  %v6398_v17 = vld [vmem:[#allocation19_spill] sm:$0xff]  ;;  %v6400_v45 = vld [vmem:[#allocation32_spill] sm:$0xff] }
 0x19e   : > { %v1373_v40 = vpop.f32.mrf.mxu0 }
 0x19f   : > { %1750 = vst.msk [vmem:[#allocation2 + $0x1a8] sm:$0xff] %vm778_vm0, %v1675_v32  ;;  %v1678_v55 = vmax.f32 %v1646_v20, 0.0  ;;  %v1644_v3 = vadd.f32 %v5337_v12, %v1605_v59  ;;  %v1610_v52 = vmax.f32 %v6392_v24, %v1578_v60  ;;  %v1576_v53 = vmax.f32 %v1373_v40, %v1501_v48  ;;  %4188 = vmatpush3.bf16.msra.mxu1 %v4737_v33  ;;  %v6401_v20 = vld [vmem:[#allocation33_spill] sm:$0xff]  ;;  %v6409_v33 = vld [vmem:[#allocation35_spill] sm:$0xff] }
 0x1a0   : > { %v4528_v56 = vpop.f32.mrf.mxu0  ;;  %4189 = vmatprep.subr.bf16.mxu1 %v4738_v14 }
 0x1a1   : > { %1753 = vst.msk [vmem:[#allocation2 + $0x1d0] sm:$0xff] %vm778_vm0, %v1678_v55  ;;  %v1676_v13 = vmax.f32 %v1644_v3, 0.0  ;;  %v1649_v19 = vadd.f32 %v5337_v12, %v1610_v52  ;;  %v1608_v26 = vmax.f32 %v6393_v7, %v1576_v53  ;;  %v1579_v28 = vmax.f32 %v4528_v56, %v4560_v1  ;;  %v4742_v1 = vld [vmem:[%s6319_s3 + $0x48] sm:$0xff]   ;;  %v6402_v55 = vld [vmem:[#allocation7_spill] sm:$0xff]  ;;  %v6403_v3 = vld [vmem:[#allocation20_spill] sm:$0xff] }
 0x1a2   : > { %v1376_v62 = vpop.f32.mrf.mxu0  ;;  %v6404_v24 = vmax.f32 %v6402_v55, %v6403_v3  ;;  %v6405_v53 = vld [vmem:[#allocation34_spill] sm:$0xff]  ;;  %v6406_v7 = vld [vmem:[#allocation8_spill] sm:$0xff] }
 0x1a3   : > { %1751 = vst.msk [vmem:[#allocation2 + $0x1b0] sm:$0xff] %vm778_vm0, %v1676_v13  ;;  %v1681_v6 = vmax.f32 %v1649_v19, 0.0  ;;  %v1647_v27 = vadd.f32 %v5337_v12, %v1608_v26  ;;  %v1611_v58 = vmax.f32 %v6394_v34, %v1579_v28  ;;  %v1577_v57 = vmax.f32 %v1376_v62, %v1504_v61  ;;  %4190 = vmatpush3.bf16.msra.mxu1 %v4739_v35  ;;  %v6407_v26 = vld [vmem:[#allocation21_spill] sm:$0xff]  ;;  %v4744_v62 = vld [vmem:[%s6319_s3 + $0x40] sm:$0xff]   ;;  %v6411_v34 = vld [vmem:[#allocation10_spill] sm:$0xff] }
 0x1a4   : > { %v4531_v9 = vpop.f32.mrf.mxu0  ;;  %4191 = vmatprep.subr.bf16.mxu1 %v4740_v63  ;;  %v6408_v28 = vmax.f32 %v6406_v7, %v6407_v26  ;;  %v6415_v35 = vld [vmem:[#allocation36_spill] sm:$0xff] }
 0x1a5   : > { %1756 = vst.msk [vmem:[#allocation2 + $0x208] sm:$0xff] %vm778_vm0, %v1681_v6  ;;  %v1679_v18 = vmax.f32 %v1647_v27, 0.0  ;;  %v1650_v36 = vadd.f32 %v5337_v12, %v1611_v58  ;;  %v1609_v11 = vmax.f32 %v1545_v21, %v1577_v57  ;;  %v1550_v16 = vmax.f32 %v5302_v38, %v4531_v9  ;;  %v4745_v6 = vld [vmem:[%s6319_s3] sm:$0xff]   ;;  %v6410_v27 = vld [vmem:[#allocation23_spill] sm:$0xff] }
 0x1a6   : > { %v1389_v8 = vpop.f32.mrf.mxu0  ;;  %v1521_v58 = vmax.f32 %v6411_v34, %v6410_v27  ;;  %v6418_v63 = vld [vmem:[#allocation24_spill] sm:$0xff] }
 0x1a7   : > { %1754 = vst.msk [vmem:[#allocation2 + $0x1e8] sm:$0xff] %vm778_vm0, %v1679_v18  ;;  %v1682_v47 = vmax.f32 %v1650_v36, 0.0  ;;  %v1648_v48 = vadd.f32 %v5337_v12, %v1609_v11  ;;  %v1582_v10 = vmax.f32 %v6395_v15, %v1550_v16  ;;  %v1548_v5 = vmax.f32 %v5304_v25, %v1389_v8  ;;  %4192 = vmatpush3.bf16.msra.mxu1 %v4741_v37  ;;  %v6412_v18 = vld [vmem:[#allocation9_spill] sm:$0xff]  ;;  %v6413_v36 = vld [vmem:[#allocation22_spill] sm:$0xff]  ;;  %v6430_v7 = vld [vmem:[#allocation40_spill] sm:$0xff] }
 0x1a8   : > { %v4532_v22 = vpop.f32.mrf.mxu0  ;;  %v1517_v25 = vmax.f32 %v5078_v4, %v5196_v43  ;;  %v4743_v4 = vld [vmem:[%s6319_s3 + $0x8] sm:$0xff]   ;;  %4193 = vmatprep.subr.bf16.mxu1 %v4742_v1  ;;  %v6414_v11 = vmax.f32 %v6412_v18, %v6413_v36 }
 0x1a9   : > { %1757 = vst.msk [vmem:[#allocation2 + $0x210] sm:$0xff] %vm778_vm0, %v1682_v47  ;;  %v1680_v38 = vmax.f32 %v1648_v48, 0.0  ;;  %v1621_v23 = vadd.f32 %v5337_v12, %v1582_v10  ;;  %v1580_v29 = vmax.f32 %v6396_v42, %v1548_v5  ;;  %v1551_v44 = vmax.f32 %v5306_v2, %v4532_v22  ;;  %v6416_v5 = vld [vmem:[#allocation37_spill] sm:$0xff] }
 0x1aa   : > { %v1392_v51 = vpop.f32.mrf.mxu0  ;;  %v6399_v2 = vmax.f32 %v6397_v39, %v6398_v17 }
 0x1ab   : > { %1755 = vst.msk [vmem:[#allocation2 + $0x1f0] sm:$0xff] %vm778_vm0, %v1680_v38  ;;  %v1653_v50 = vmax.f32 %v1621_v23, 0.0  ;;  %v1619_v0 = vadd.f32 %v5337_v12, %v1580_v29  ;;  %v1549_v54 = vmax.f32 %v6400_v45, %v1392_v51  ;;  %4194 = vmatpush3.bf16.msra.mxu1 %v4743_v4  ;;  %v4746_v38 = vld [vmem:[%s6319_s3 + $0xf8] sm:$0xff]   ;;  %v6420_v51 = vld [vmem:[#allocation38_spill] sm:$0xff] }
 0x1ac   : > { %v1583_v30 = vmax.f32 %v6399_v2, %v1551_v44  ;;  %v4535_v41 = vpop.f32.mrf.mxu0  ;;  %4195 = vmatprep.subr.bf16.mxu1 %v4744_v62  ;;  %v6417_v44 = vld [vmem:[#allocation11_spill] sm:$0xff] }
 0x1ad   : > { %1728 = vst.msk [vmem:[#allocation2 + $0x48] sm:$0xff] %vm778_vm0, %v1653_v50  ;;  %v1651_v43 = vmax.f32 %v1619_v0, 0.0  ;;  %v1581_v32 = vmax.f32 %v1517_v25, %v1549_v54  ;;  %v1554_v59 = vmax.f32 %v6401_v20, %v4535_v41  ;;  %v6419_v37 = vmax.f32 %v6417_v44, %v6418_v63  ;;  %v6421_v54 = vld [vmem:[#allocation12_spill] sm:$0xff]  ;;  %v6422_v41 = vld [vmem:[#allocation25_spill] sm:$0xff]  ;;  %v6425_v20 = vld [vmem:[#allocation27_spill] sm:$0xff] }
 0x1ae   : > { %v1622_v46 = vadd.f32 %v5337_v12, %v1583_v30  ;;  %v1405_v60 = vpop.f32.mrf.mxu0  ;;  %v6423_v1 = vmax.f32 %v6421_v54, %v6422_v41 }
 0x1af   : > { %1726 = vst.msk [vmem:[#allocation2 + $0x28] sm:$0xff] %vm778_vm0, %v1651_v43  ;;  %v1620_v40 = vadd.f32 %v5337_v12, %v1581_v32  ;;  %v1586_v52 = vmax.f32 %v6404_v24, %v1554_v59  ;;  %v1552_v56 = vmax.f32 %v6405_v53, %v1405_v60  ;;  %4196 = vmatpush3.bf16.msra.mxu1 %v4745_v6  ;;  %v6424_v43 = vld [vmem:[#allocation39_spill] sm:$0xff]  ;;  %v6426_v59 = vld [vmem:[#allocation14_spill] sm:$0xff]  ;;  %v1806_v24 = vld [vmem:[#allocation2 + $0x8] sm:$0xff] }
 0x1b0   : > { %v1654_v31 = vmax.f32 %v1622_v46, 0.0  ;;  %v4536_v61 = vpop.f32.mrf.mxu0  ;;  %4293 = vmatprep.subr.bf16.mxu1 %v4746_v38  ;;  %v1525_v60 = vmax.f32 %v6426_v59, %v6425_v20 }
 0x1b1   : > { %v1652_v13 = vmax.f32 %v1620_v40, 0.0  ;;  %v1625_v19 = vadd.f32 %v5337_v12, %v1586_v52  ;;  %v1584_v49 = vmax.f32 %v6408_v28, %v1552_v56  ;;  %v1555_v21 = vmax.f32 %v6409_v33, %v4536_v61  ;;  %v6427_v56 = vld [vmem:[#allocation13_spill] sm:$0xff]  ;;  %v6428_v61 = vld [vmem:[#allocation26_spill] sm:$0xff] }
 0x1b2   : > { %1729 = vst.msk [vmem:[#allocation2 + $0x50] sm:$0xff] %vm778_vm0, %v1654_v31  ;;  %v1408_v57 = vpop.f32.mrf.mxu0  ;;  %v1807_v33 = vld [vmem:[#allocation2 + $0x10] sm:$0xff] }
 0x1b3   : > { %1727 = vst.msk [vmem:[#allocation2 + $0x30] sm:$0xff] %vm778_vm0, %v1652_v13  ;;  %v1657_v9 = vmax.f32 %v1625_v19, 0.0  ;;  %v1623_v14 = vadd.f32 %v5337_v12, %v1584_v49  ;;  %v1587_v16 = vmax.f32 %v6414_v11, %v1555_v21  ;;  %v1553_v8 = vmax.f32 %v6415_v35, %v1408_v57  ;;  %v6432_v35 = vld [vmem:[#allocation15_spill] sm:$0xff] }
 0x1b4   : > { %v4539_v47 = vpop.f32.mrf.mxu0  ;;  %v1904_v32 = vld [vmem:[#allocation2 + $0x47] sm:$0xff]  ;;  %v6429_v13 = vmax.f32 %v6427_v56, %v6428_v61  ;;  %v1838_v36 = vpack.c.bf16 %v1807_v33, %v1806_v24 }
 0x1b5   : > { %1732 = vst.msk [vmem:[#allocation2 + $0x88] sm:$0xff] %vm778_vm0, %v1657_v9  ;;  %v1655_v48 = vmax.f32 %v1623_v14, 0.0  ;;  %v1626_v15 = vadd.f32 %v5337_v12, %v1587_v16  ;;  %v1585_v10 = vmax.f32 %v1521_v58, %v1553_v8  ;;  %v1558_v22 = vmax.f32 %v6416_v5, %v4539_v47  ;;  %v6431_v58 = vld [vmem:[#allocation41_spill] sm:$0xff]  ;;  %v6433_v8 = vld [vmem:[#allocation28_spill] sm:$0xff] }
 0x1b6   : > { %v1421_v23 = vpop.f32.mrf.mxu0  ;;  %v1902_v28 = vld [vmem:[#allocation2 + $0x27] sm:$0xff]  ;;  %v6434_v47 = vmax.f32 %v6432_v35, %v6433_v8 }
 0x1b7   : > { %1730 = vst.msk [vmem:[#allocation2 + $0x68] sm:$0xff] %vm778_vm0, %v1655_v48  ;;  %v1658_v42 = vmax.f32 %v1626_v15, 0.0  ;;  %v1624_v29 = vadd.f32 %v5337_v12, %v1585_v10  ;;  %v1590_v25 = vmax.f32 %v6419_v37, %v1558_v22  ;;  %v1556_v50 = vmax.f32 %v6420_v51, %v1421_v23  ;;  %v1808_v9 = vld [vmem:[#allocation2 + $0x28] sm:$0xff]  ;;  %v6435_v15 = vld [vmem:[#allocation42_spill] sm:$0xff]  ;;  %v6439_v37 = vld [vmem:[#allocation43_spill] sm:$0xff] }
 0x1b8   : > { %v4540_v0 = vpop.f32.mrf.mxu0  ;;  %v1810_v51 = vld [vmem:[#allocation2 + $0x48] sm:$0xff] }
 0x1b9   : > { %v2143_v39 = vld [vmem:[#allocation2 + $0x49] sm:$0xff]  ;;  %v2144_v17 = vld [vmem:[#allocation2 + $0x51] sm:$0xff]  ;;  %1733 = vst.msk [vmem:[#allocation2 + $0x90] sm:$0xff] %vm778_vm0, %v1658_v42  ;;  %v1656_v30 = vmax.f32 %v1624_v29, 0.0  ;;  %v1629_v45 = vadd.f32 %v5337_v12, %v1590_v25  ;;  %v1588_v4 = vmax.f32 %v6423_v1, %v1556_v50  ;;  %v1559_v46 = vmax.f32 %v6424_v43, %v4540_v0  ;;  %v6436_v42 = vld [vmem:[#allocation16_spill] sm:$0xff] }
 0x1ba   : > { %v1905_v2 = vld [vmem:[#allocation2 + $0x4f] sm:$0xff]  ;;  %v1424_v31 = vpop.f32.mrf.mxu0  ;;  %v5517_v40 = vpack.c.bf16 %v2144_v17, %v2143_v39  ;;  %v6440_v39 = vld [vmem:[#allocation31_spill] sm:$0xff] }
 0x1bb   : > { %v5519_v55 = vpack.c.bf16 %v1905_v2, %v1904_v32  ;;  %v1903_v3 = vld [vmem:[#allocation2 + $0x2f] sm:$0xff]  ;;  %1731 = vst.msk [vmem:[#allocation2 + $0x70] sm:$0xff] %vm778_vm0, %v1656_v30  ;;  %v1661_v52 = vmax.f32 %v1629_v45, 0.0  ;;  %v1627_v53 = vadd.f32 %v5337_v12, %v1588_v4  ;;  %v1591_v19 = vmax.f32 %v6429_v13, %v1559_v46 }
 0x1bc   : > { %v1557_v26 = vmax.f32 %v6430_v7, %v1424_v31  ;;  %v1809_v49 = vld [vmem:[#allocation2 + $0x30] sm:$0xff]  ;;  %4569 = vmatprep.mubr.msk.bf16.mxu0 %vm778_vm0, %v5517_v40  ;;  %v4543_v21 = vpop.f32.mrf.mxu0  ;;  %v5531_v62 = vpack.c.bf16 %v1903_v3, %v1902_v28  ;;  %v6437_v29 = vld [vmem:[#allocation29_spill] sm:$0xff] }
 0x1bd   : > { %2257 = vrot.lane.b32.xlu1 %v5519_v55, %s4833_s20  ;;  %1736 = vst.msk [vmem:[#allocation2 + $0xc8] sm:$0xff] %vm778_vm0, %v1661_v52  ;;  %v1659_v6 = vmax.f32 %v1627_v53, 0.0  ;;  %v1630_v27 = vadd.f32 %v5337_v12, %v1591_v19  ;;  %v1562_v57 = vmax.f32 %v6431_v58, %v4543_v21  ;;  %v1839_v18 = vpack.c.bf16 %v1809_v49, %v1808_v9  ;;  %v1811_v5 = vld [vmem:[#allocation2 + $0x50] sm:$0xff]  ;;  %v6442_v46 = vld [vmem:[#allocation17_spill] sm:$0xff] }
 0x1be   : > { %v1589_v34 = vmax.f32 %v1525_v60, %v1557_v26  ;;  %2255 = vrot.lane.b32.xlu0 %v5531_v62, %s4833_s20  ;;  %v1437_v14 = vpop.f32.mrf.mxu0  ;;  %v6438_v44 = vmax.f32 %v6436_v42, %v6437_v29  ;;  %v6441_v17 = vld [vmem:[#allocation18_spill] sm:$0xff]  ;;  %v5554_v45 = vpack.c.bf16 %v1811_v5, %v1810_v51  ;;  %v6445_v60 = vld [vmem:[#allocation44_spill] sm:$0xff]  ;;  %v1812_v7 = vld [vmem:[#allocation2 + $0x68] sm:$0xff] }
 0x1bf   : > { %1734 = vst.msk [vmem:[#allocation2 + $0xa8] sm:$0xff] %vm778_vm0, %v1659_v6  ;;  %v1662_v11 = vmax.f32 %v1630_v27, 0.0  ;;  %v1594_v48 = vmax.f32 %v6434_v47, %v1562_v57  ;;  %v1560_v10 = vmax.f32 %v6435_v15, %v1437_v14  ;;  %v1529_v2 = vmax.f32 %v6441_v17, %v6440_v39  ;;  %v6443_v32 = vld [vmem:[#allocation30_spill] sm:$0xff]  ;;  %v1906_v3 = vld [vmem:[#allocation2 + $0x67] sm:$0xff] }
 0x1c0   : > { %v1628_v16 = vadd.f32 %v5337_v12, %v1589_v34  ;;  %v4544_v22 = vpop.f32.mrf.mxu0  ;;  %v2147_v50 = vld [vmem:[#allocation2 + $0x89] sm:$0xff]  ;;  %v2148_v0 = vld [vmem:[#allocation2 + $0x91] sm:$0xff]  ;;  %v6444_v20 = vmax.f32 %v6442_v46, %v6443_v32 }
 0x1c1   : > { %2209 = vrot.lane.b32.xlu1 %v1839_v18, %s4833_s20  ;;  %1737 = vst.msk [vmem:[#allocation2 + $0xd0] sm:$0xff] %vm778_vm0, %v1662_v11  ;;  %v1633_v23 = vadd.f32 %v5337_v12, %v1594_v48  ;;  %v1592_v63 = vmax.f32 %v6438_v44, %v1560_v10  ;;  %v1563_v25 = vmax.f32 %v6439_v37, %v4544_v22  ;;  %v1909_v26 = vld [vmem:[#allocation2 + $0x8f] sm:$0xff]  ;;  %v1908_v21 = vld [vmem:[#allocation2 + $0x87] sm:$0xff] }
 0x1c2   : > { %v1660_v38 = vmax.f32 %v1628_v16, 0.0  ;;  %2207 = vrot.lane.b32.xlu0 %v1838_v36, %s4833_s20  ;;  %v1440_v30 = vpop.f32.mrf.mxu0  ;;  %v2145_v54 = vld [vmem:[#allocation2 + $0x69] sm:$0xff]  ;;  %v2146_v41 = vld [vmem:[#allocation2 + $0x71] sm:$0xff]  ;;  %v5570_v19 = vpack.c.bf16 %v2148_v0, %v2147_v50  ;;  %v5584_v27 = vpack.c.bf16 %v1909_v26, %v1908_v21 }
 0x1c3   : > { %v1907_v1 = vld [vmem:[#allocation2 + $0x6f] sm:$0xff]  ;;  %v1665_v4 = vmax.f32 %v1633_v23, 0.0  ;;  %v1631_v43 = vadd.f32 %v5337_v12, %v1592_v63  ;;  %v1595_v59 = vmax.f32 %v6444_v20, %v1563_v25  ;;  %v1561_v31 = vmax.f32 %v6445_v60, %v1440_v30 }
 0x1c4   : > { %1735 = vst.msk [vmem:[#allocation2 + $0xb0] sm:$0xff] %vm778_vm0, %v1660_v38  ;;  %v1813_v24 = vld [vmem:[#allocation2 + $0x70] sm:$0xff]  ;;  %v5564_v52 = vpack.c.bf16 %v2146_v41, %v2145_v54  ;;  %v5566_v53 = vpack.c.bf16 %v1907_v1, %v1906_v3  ;;  %v1814_v34 = vld [vmem:[#allocation2 + $0x88] sm:$0xff] }
 0x1c5   : > { %2211 = vrot.lane.b32.xlu1 %v5554_v45, %s4833_s20  ;;  %1740 = vst.msk [vmem:[#allocation2 + $0x108] sm:$0xff] %vm778_vm0, %v1665_v4  ;;  %v1663_v56 = vmax.f32 %v1631_v43, 0.0  ;;  %v1634_v61 = vadd.f32 %v5337_v12, %v1595_v59  ;;  %v1593_v13 = vmax.f32 %v1529_v2, %v1561_v31  ;;  %v5576_v28 = vpack.c.bf16 %v1813_v24, %v1812_v7  ;;  %v1815_v6 = vld [vmem:[#allocation2 + $0x90] sm:$0xff]  ;;  %v1912_v5 = vld [vmem:[#allocation2 + $0xc7] sm:$0xff] }
 0x1c6   : > { %4570 = vmatmul.mubr.msk.bf16.vlgmr.msra.gmra.mxu0 %vm778_vm0, %v5564_v52  ;;  %2259 = vrot.lane.b32.xlu0 %v5566_v53, %s4833_s20  ;;  %v1910_v57 = vld [vmem:[#allocation2 + $0xa7] sm:$0xff]  ;;  %v2158_v32 = vld [vmem:[#allocation2 + $0x131] sm:$0xff] }
 0x1c7   : > { %1738 = vst.msk [vmem:[#allocation2 + $0xe8] sm:$0xff] %vm778_vm0, %v1663_v56  ;;  %v1666_v49 = vmax.f32 %v1634_v61, 0.0  ;;  %v1632_v33 = vadd.f32 %v5337_v12, %v1593_v13  ;;  %4573 = vmatprep.mubr.msk.bf16.mxu0 %vm778_vm0, %v5570_v19  ;;  %v5589_v12 = vpack.c.bf16 %v1815_v6, %v1814_v34  ;;  %v1816_v48 = vld [vmem:[#allocation2 + $0xa8] sm:$0xff]  ;;  %v2160_v31 = vld [vmem:[#allocation2 + $0x151] sm:$0xff] }
 0x1c8   : > { %v2151_v9 = vld [vmem:[#allocation2 + $0xc9] sm:$0xff]  ;;  %v2152_v14 = vld [vmem:[#allocation2 + $0xd1] sm:$0xff] }
 0x1c9   : > { %2213 = vrot.lane.b32.xlu1 %v5576_v28, %s4833_s20  ;;  %1741 = vst.msk [vmem:[#allocation2 + $0x110] sm:$0xff] %vm778_vm0, %v1666_v49  ;;  %v1664_v58 = vmax.f32 %v1632_v33, 0.0  ;;  %v5598_v47 = vpack.c.bf16 %v2152_v14, %v2151_v9  ;;  %v1913_v15 = vld [vmem:[#allocation2 + $0xcf] sm:$0xff]  ;;  %v1918_v3 = vld [vmem:[#allocation2 + $0x127] sm:$0xff] }
 0x1ca   : > { %2261 = vrot.lane.b32.xlu0 %v5584_v27, %s4833_s20  ;;  %v1819_v22 = vld [vmem:[#allocation2 + $0xd0] sm:$0xff]  ;;  %v5610_v38 = vpack.c.bf16 %v1913_v15, %v1912_v5  ;;  %v1818_v23 = vld [vmem:[#allocation2 + $0xc8] sm:$0xff] }
 0x1cb   : > { %v2149_v18 = vld [vmem:[#allocation2 + $0xa9] sm:$0xff]  ;;  %v2150_v36 = vld [vmem:[#allocation2 + $0xb1] sm:$0xff]  ;;  %1739 = vst.msk [vmem:[#allocation2 + $0xf0] sm:$0xff] %vm778_vm0, %v1664_v58  ;;  %v5614_v63 = vpack.c.bf16 %v1819_v22, %v1818_v23 }
 0x1cc   : > { %v1911_v11 = vld [vmem:[#allocation2 + $0xaf] sm:$0xff]  ;;  %v5592_v16 = vpack.c.bf16 %v2150_v36, %v2149_v18  ;;  %v1916_v41 = vld [vmem:[#allocation2 + $0x107] sm:$0xff] }
 0x1cd   : > { %v5594_v35 = vpack.c.bf16 %v1911_v11, %v1910_v57  ;;  %v1817_v8 = vld [vmem:[#allocation2 + $0xb0] sm:$0xff]  ;;  %2215 = vrot.lane.b32.xlu1 %v5589_v12, %s4833_s20  ;;  %v1822_v46 = vld [vmem:[#allocation2 + $0x108] sm:$0xff] }
 0x1ce   : > { %4574 = vmatmul.mubr.msk.bf16.gmra.mxu0 %vm778_vm0, %v5592_v16  ;;  %v5604_v10 = vpack.c.bf16 %v1817_v8, %v1816_v48  ;;  %v1914_v42 = vld [vmem:[#allocation2 + $0xe7] sm:$0xff]  ;;  %v1919_v20 = vld [vmem:[#allocation2 + $0x12f] sm:$0xff] }
 0x1cf   : > { %2263 = vrot.lane.b32.xlu0 %v5594_v35, %s4833_s20  ;;  %4577 = vmatprep.mubr.msk.bf16.mxu0 %vm778_vm0, %v5598_v47  ;;  %v1820_v2 = vld [vmem:[#allocation2 + $0xe8] sm:$0xff]  ;;  %v1825_v24 = vld [vmem:[#allocation2 + $0x130] sm:$0xff]  ;;  %v5644_v61 = vpack.c.bf16 %v1919_v20, %v1918_v3 }
 0x1d0   : > { %v2155_v29 = vld [vmem:[#allocation2 + $0x109] sm:$0xff]  ;;  %v2156_v44 = vld [vmem:[#allocation2 + $0x111] sm:$0xff] }
 0x1d1   : > { %2217 = vrot.lane.b32.xlu1 %v5604_v10, %s4833_s20  ;;  %v5622_v17 = vpack.c.bf16 %v2156_v44, %v2155_v29  ;;  %v1917_v30 = vld [vmem:[#allocation2 + $0x10f] sm:$0xff]  ;;  %v1920_v33 = vld [vmem:[#allocation2 + $0x147] sm:$0xff] }
 0x1d2   : > { %v2153_v37 = vld [vmem:[#allocation2 + $0xe9] sm:$0xff]  ;;  %v2154_v25 = vld [vmem:[#allocation2 + $0xf1] sm:$0xff]  ;;  %v5634_v4 = vpack.c.bf16 %v1917_v30, %v1916_v41 }
 0x1d3   : > { %2265 = vrot.lane.b32.xlu0 %v5610_v38, %s4833_s20  ;;  %v1915_v51 = vld [vmem:[#allocation2 + $0xef] sm:$0xff]  ;;  %v5616_v50 = vpack.c.bf16 %v2154_v25, %v2153_v37  ;;  %v1922_v11 = vld [vmem:[#allocation2 + $0x167] sm:$0xff] }
 0x1d4   : > { %v5618_v0 = vpack.c.bf16 %v1915_v51, %v1914_v42  ;;  %v1821_v39 = vld [vmem:[#allocation2 + $0xf0] sm:$0xff]  ;;  %v1824_v7 = vld [vmem:[#allocation2 + $0x128] sm:$0xff] }
 0x1d5   : > { %2219 = vrot.lane.b32.xlu1 %v5614_v63, %s4833_s20  ;;  %v5628_v54 = vpack.c.bf16 %v1821_v39, %v1820_v2  ;;  %v1823_v1 = vld [vmem:[#allocation2 + $0x110] sm:$0xff]  ;;  %v5652_v49 = vpack.c.bf16 %v1825_v24, %v1824_v7  ;;  %v1826_v34 = vld [vmem:[#allocation2 + $0x148] sm:$0xff] }
 0x1d6   : > { %4578 = vmatmul.mubr.msk.bf16.gmra.mxu0 %vm778_vm0, %v5616_v50  ;;  %v2157_v43 = vld [vmem:[#allocation2 + $0x129] sm:$0xff]  ;;  %v5638_v59 = vpack.c.bf16 %v1823_v1, %v1822_v46  ;;  %v2162_v57 = vld [vmem:[#allocation2 + $0x171] sm:$0xff] }
 0x1d7   : > { %2267 = vrot.lane.b32.xlu0 %v5618_v0, %s4833_s20  ;;  %4581 = vmatprep.mubr.msk.bf16.mxu0 %vm778_vm0, %v5622_v17  ;;  %v2159_v60 = vld [vmem:[#allocation2 + $0x149] sm:$0xff]  ;;  %v5642_v56 = vpack.c.bf16 %v2158_v32, %v2157_v43  ;;  %v2164_v36 = vld [vmem:[#allocation2 + $0x191] sm:$0xff] }
 0x1d8   : > { %v5646_v13 = vpack.c.bf16 %v2160_v31, %v2159_v60  ;;  %v1921_v26 = vld [vmem:[#allocation2 + $0x14f] sm:$0xff]  ;;  %v1924_v29 = vld [vmem:[#allocation2 + $0x187] sm:$0xff] }
 0x1d9   : > { %2221 = vrot.lane.b32.xlu1 %v5628_v54, %s4833_s20  ;;  %v1827_v21 = vld [vmem:[#allocation2 + $0x150] sm:$0xff]  ;;  %v5658_v6 = vpack.c.bf16 %v1921_v26, %v1920_v33  ;;  %v1828_v22 = vld [vmem:[#allocation2 + $0x168] sm:$0xff] }
 0x1da   : > { %v2161_v58 = vld [vmem:[#allocation2 + $0x169] sm:$0xff]  ;;  %v5662_v14 = vpack.c.bf16 %v1827_v21, %v1826_v34  ;;  %v2166_v39 = vld [vmem:[#allocation2 + $0x1b1] sm:$0xff] }
 0x1db   : > { %2269 = vrot.lane.b32.xlu0 %v5634_v4, %s4833_s20  ;;  %v1923_v9 = vld [vmem:[#allocation2 + $0x16f] sm:$0xff]  ;;  %v5666_v48 = vpack.c.bf16 %v2162_v57, %v2161_v58  ;;  %v1926_v43 = vld [vmem:[#allocation2 + $0x1a7] sm:$0xff] }
 0x1dc   : > { %v2163_v18 = vld [vmem:[#allocation2 + $0x189] sm:$0xff]  ;;  %v5668_v15 = vpack.c.bf16 %v1923_v9, %v1922_v11  ;;  %v2168_v1 = vld [vmem:[#allocation2 + $0x1d1] sm:$0xff] }
 0x1dd   : > { %2223 = vrot.lane.b32.xlu1 %v5638_v59, %s4833_s20  ;;  %v1829_v8 = vld [vmem:[#allocation2 + $0x170] sm:$0xff]  ;;  %v5670_v5 = vpack.c.bf16 %v2164_v36, %v2163_v18  ;;  %v1830_v25 = vld [vmem:[#allocation2 + $0x188] sm:$0xff] }
 0x1de   : > { %4582 = vmatmul.mubr.msk.bf16.gmra.mxu0 %vm778_vm0, %v5642_v56  ;;  %v1925_v23 = vld [vmem:[#allocation2 + $0x18f] sm:$0xff]  ;;  %v5676_v42 = vpack.c.bf16 %v1829_v8, %v1828_v22  ;;  %v1928_v7 = vld [vmem:[#allocation2 + $0x1c7] sm:$0xff] }
 0x1df   : > { %2271 = vrot.lane.b32.xlu0 %v5644_v61, %s4833_s20  ;;  %4585 = vmatprep.mubr.msk.bf16.mxu0 %vm778_vm0, %v5646_v13  ;;  %v1831_v44 = vld [vmem:[#allocation2 + $0x190] sm:$0xff]  ;;  %v5682_v37 = vpack.c.bf16 %v1925_v23, %v1924_v29  ;;  %v1832_v31 = vld [vmem:[#allocation2 + $0x1a8] sm:$0xff] }
 0x1e0   : > { %v2165_v51 = vld [vmem:[#allocation2 + $0x1a9] sm:$0xff]  ;;  %v5686_v30 = vpack.c.bf16 %v1831_v44, %v1830_v25  ;;  %v2170_v58 = vld [vmem:[#allocation2 + $0x1f1] sm:$0xff] }
 0x1e1   : > { %2225 = vrot.lane.b32.xlu1 %v5652_v49, %s4833_s20  ;;  %v1927_v2 = vld [vmem:[#allocation2 + $0x1af] sm:$0xff]  ;;  %v5690_v32 = vpack.c.bf16 %v2166_v39, %v2165_v51  ;;  %v1930_v11 = vld [vmem:[#allocation2 + $0x1e7] sm:$0xff] }
 0x1e2   : > { %v2167_v41 = vld [vmem:[#allocation2 + $0x1c9] sm:$0xff]  ;;  %v1946_v20 = vpack.c.bf16 %v1927_v2, %v1926_v43  ;;  %v2172_v36 = vld [vmem:[#allocation2 + $0x211] sm:$0xff] }
 0x1e3   : > { %2273 = vrot.lane.b32.xlu0 %v5658_v6, %s4833_s20  ;;  %v1833_v46 = vld [vmem:[#allocation2 + $0x1b0] sm:$0xff]  ;;  %v5692_v60 = vpack.c.bf16 %v2168_v1, %v2167_v41  ;;  %v1834_v21 = vld [vmem:[#allocation2 + $0x1c8] sm:$0xff] }
 0x1e4   : > { %v1929_v3 = vld [vmem:[#allocation2 + $0x1cf] sm:$0xff]  ;;  %v5697_v24 = vpack.c.bf16 %v1833_v46, %v1832_v31  ;;  %v1932_v39 = vld [vmem:[#allocation2 + $0x207] sm:$0xff] }
 0x1e5   : > { %2227 = vrot.lane.b32.xlu1 %v5662_v14, %s4833_s20  ;;  %v1835_v26 = vld [vmem:[#allocation2 + $0x1d0] sm:$0xff]  ;;  %v1947_v33 = vpack.c.bf16 %v1929_v3, %v1928_v7  ;;  %v1836_v44 = vld [vmem:[#allocation2 + $0x1e8] sm:$0xff]  ;;  %v4747_v3 = vld [vmem:[%s6319_s3 + $0xb8] sm:$0xff]  }
 0x1e6   : > { %4586 = vmatmul.mubr.msk.bf16.gmra.mxu0 %vm778_vm0, %v5666_v48  ;;  %v2169_v34 = vld [vmem:[#allocation2 + $0x1e9] sm:$0xff]  ;;  %v5704_v9 = vpack.c.bf16 %v1835_v26, %v1834_v21  ;;  %v1999_v41 = vld [vmem:[#allocation2 + $0x31] sm:$0xff] }
 0x1e7   : > { %2275 = vrot.lane.b32.xlu0 %v5668_v15, %s4833_s20  ;;  %4589 = vmatprep.mubr.msk.bf16.mxu0 %vm778_vm0, %v5670_v5  ;;  %v1931_v57 = vld [vmem:[#allocation2 + $0x1ef] sm:$0xff]  ;;  %v2188_v22 = vpack.c.bf16 %v2170_v58, %v2169_v34 }
 0x1e8   : > { %v2171_v18 = vld [vmem:[#allocation2 + $0x209] sm:$0xff]  ;;  %v1948_v23 = vpack.c.bf16 %v1931_v57, %v1930_v11 }
 0x1e9   : > { %2229 = vrot.lane.b32.xlu1 %v5676_v42, %s4833_s20  ;;  %v1837_v8 = vld [vmem:[#allocation2 + $0x1f0] sm:$0xff]  ;;  %v5708_v29 = vpack.c.bf16 %v2172_v36, %v2171_v18  ;;  %v2123_v7 = vld [vmem:[#allocation2 + $0x208] sm:$0xff] }
 0x1ea   : > { %v1933_v25 = vld [vmem:[#allocation2 + $0x20f] sm:$0xff]  ;;  %v5712_v51 = vpack.c.bf16 %v1837_v8, %v1836_v44 }
 0x1eb   : > { %2277 = vrot.lane.b32.xlu0 %v5682_v37, %s4833_s20  ;;  %v1998_v2 = vld [vmem:[#allocation2 + $0x29] sm:$0xff]  ;;  %v1949_v1 = vpack.c.bf16 %v1933_v25, %v1932_v39  ;;  %v4753_v39 = vld [vmem:[%s6319_s3 + $0xa0] sm:$0xff]  }
 0x1ec   : > { %v2030_v43 = vpack.c.bf16 %v1999_v41, %v1998_v2  ;;  %v4749_v58 = vld [vmem:[%s6319_s3 + $0xb0] sm:$0xff]   ;;  %v4750_v57 = vld [vmem:[%s6319_s3 + $0xe8] sm:$0xff]   ;;  %v4754_v2 = vld [vmem:[%s6319_s3 + $0xd8] sm:$0xff]  }
 0x1ed   : > { %2231 = vrot.lane.b32.xlu1 %v5686_v30, %s4833_s20  ;;  %v2125_v18 = vld [vmem:[#allocation2 + $0x228] sm:$0xff]  ;;  %v2126_v36 = vld [vmem:[#allocation2 + $0x230] sm:$0xff] }
 0x1ee   : > { %4590 = vmatmul.mubr.msk.bf16.gmra.mxu0 %vm778_vm0, %v5690_v32  ;;  %v2142_v11 = vpack.c.bf16 %v2126_v36, %v2125_v18 }
 0x1ef   : > { %2279 = vrot.lane.b32.xlu0 %v1946_v20, %s4833_s20  ;;  %4593 = vmatprep.mubr.msk.bf16.mxu0 %vm778_vm0, %v5692_v60  ;;  %v2124_v20 = vld [vmem:[#allocation2 + $0x210] sm:$0xff] }
 0x1f1   : > { %2233 = vrot.lane.b32.xlu1 %v5697_v24, %s4833_s20 }
 0x1f3   : > { %2281 = vrot.lane.b32.xlu0 %v1947_v33, %s4833_s20  ;;  %v5779_v33 = vpack.c.bf16 %v2124_v20, %v2123_v7 }
 0x1f5   : > { %2235 = vrot.lane.b32.xlu1 %v5704_v9, %s4833_s20 }
 0x1f6   : > { %4594 = vmatmul.mubr.msk.bf16.gmra.mxu0 %vm778_vm0, %v2188_v22 }
 0x1f7   : > { %2283 = vrot.lane.b32.xlu0 %v1948_v23, %s4833_s20  ;;  %4597 = vmatprep.mubr.msk.bf16.mxu0 %vm778_vm0, %v5708_v29  ;;  %v4751_v23 = vld [vmem:[%s6319_s3 + $0xa8] sm:$0xff]  }
 0x1f9   : > { %2237 = vrot.lane.b32.xlu1 %v5712_v51, %s4833_s20 }
 0x1fb   : > { %2285 = vrot.lane.b32.xlu0 %v1949_v1, %s4833_s20 }
 0x1fd   : > { %2303 = vrot.lane.b32.xlu1 %v2030_v43, %s4833_s20 }
 0x1ff   : > { %2351 = vrot.lane.b32.xlu0 %v5554_v45, %s4833_s20  ;;  %v1854_v45 = vld [vmem:[#allocation2 + $0x9] sm:$0xff] }
 0x201   : > { %2305 = vrot.lane.b32.xlu1 %v5517_v40, %s4833_s20 }
 0x203   : > { %2353 = vrot.lane.b32.xlu0 %v5576_v28, %s4833_s20  ;;  %v1855_v28 = vld [vmem:[#allocation2 + $0x11] sm:$0xff] }
 0x205   : > { %2307 = vrot.lane.b32.xlu1 %v5564_v52, %s4833_s20 }
 0x207   : > { %2355 = vrot.lane.b32.xlu0 %v5589_v12, %s4833_s20  ;;  %v1886_v12 = vpack.c.bf16 %v1855_v28, %v1854_v45  ;;  %v4757_v28 = vld [vmem:[%s6319_s3 + $0x90] sm:$0xff]  }
 0x209   : > { %2309 = vrot.lane.b32.xlu1 %v5570_v19, %s4833_s20 }
 0x20b   : > { %2357 = vrot.lane.b32.xlu0 %v5604_v10, %s4833_s20  ;;  %v1758_v10 = vld [vmem:[#allocation2 + $0x7] sm:$0xff] }
 0x20d   : > { %2311 = vrot.lane.b32.xlu1 %v5592_v16, %s4833_s20 }
 0x20f   : > { %2359 = vrot.lane.b32.xlu0 %v5614_v63, %s4833_s20  ;;  %v1759_v63 = vld [vmem:[#allocation2 + $0xf] sm:$0xff] }
 0x210   : > { %v1790_v46 = vpack.c.bf16 %v1759_v63, %v1758_v10 }
 0x211   : > { %2313 = vrot.lane.b32.xlu1 %v5598_v47, %s4833_s20 }
 0x213   : > { %2361 = vrot.lane.b32.xlu0 %v5628_v54, %s4833_s20 }
 0x215   : > { %2315 = vrot.lane.b32.xlu1 %v5616_v50, %s4833_s20 }
 0x217   : > { %2363 = vrot.lane.b32.xlu0 %v5638_v59, %s4833_s20 }
 0x219   : > { %2317 = vrot.lane.b32.xlu1 %v5622_v17, %s4833_s20 }
 0x21b   : > { %2365 = vrot.lane.b32.xlu0 %v5652_v49, %s4833_s20 }
 0x21d   : > { %2319 = vrot.lane.b32.xlu1 %v5642_v56, %s4833_s20 }
 0x21f   : > { %2367 = vrot.lane.b32.xlu0 %v5662_v14, %s4833_s20 }
 0x221   : > { %2321 = vrot.lane.b32.xlu1 %v5646_v13, %s4833_s20 }
 0x223   : > { %2369 = vrot.lane.b32.xlu0 %v5676_v42, %s4833_s20 }
 0x225   : > { %2323 = vrot.lane.b32.xlu1 %v5666_v48, %s4833_s20 }
 0x227   : > { %2371 = vrot.lane.b32.xlu0 %v5686_v30, %s4833_s20 }
 0x229   : > { %2325 = vrot.lane.b32.xlu1 %v5670_v5, %s4833_s20 }
 0x22b   : > { %2373 = vrot.lane.b32.xlu0 %v5697_v24, %s4833_s20 }
 0x22d   : > { %2327 = vrot.lane.b32.xlu1 %v5690_v32, %s4833_s20 }
 0x22f   : > { %2375 = vrot.lane.b32.xlu0 %v5704_v9, %s4833_s20  ;;  %v2258_v31 = vpop.permute.xlu1 %2257 }
 0x230   : > { %v2256_v54 = vpop.permute.xlu0 %2255  ;;  %v2453_v34 = vsel %vm778_vm0, %v2030_v43, %v2258_v31 }
 0x231   : > { %2329 = vrot.lane.b32.xlu1 %v5692_v60, %s4833_s20  ;;  %v2449_v59 = vsel %vm778_vm0, %v1886_v12, %v2256_v54  ;;  %v4748_v60 = vld [vmem:[%s6319_s3 + $0xf0] sm:$0xff]   ;;  %v4758_v12 = vld [vmem:[%s6319_s3 + $0xc8] sm:$0xff]  }
 0x232   : > { %3014 = vmatprep.mubr.bf16.mxu1 %v2449_v59 }
 0x233   : > { %2377 = vrot.lane.b32.xlu0 %v5712_v51, %s4833_s20  ;;  %v2210_v8 = vpop.permute.xlu1 %2209 }
 0x234   : > { %v2208_v26 = vpop.permute.xlu0 %2207  ;;  %v2389_v44 = vsel %vm778_vm0, %v5531_v62, %v2210_v8  ;;  %v4755_v62 = vld [vmem:[%s6319_s3 + $0x98] sm:$0xff]  }
 0x235   : > { %2331 = vrot.lane.b32.xlu1 %v2188_v22, %s4833_s20  ;;  %v2385_v21 = vsel %vm778_vm0, %v1790_v46, %v2208_v26  ;;  %v4761_v46 = vld [vmem:[%s6319_s3 + $0x80] sm:$0xff]  }
 0x236   : > { %3015 = vmatmul.mubr.bf16.vlgmr.msra.gmra.mxu1 %v2385_v21 }
 0x237   : > { %2379 = vrot.lane.b32.xlu0 %v5779_v33, %s4833_s20  ;;  %4294 = vmatpush3.bf16.msra.mxu1 %v4747_v3  ;;  %v2212_v41 = vpop.permute.xlu1 %2211 }
 0x238   : > { %3022 = vmatprep.mubr.bf16.mxu1 %v2453_v34  ;;  %4295 = vmatprep.subr.bf16.mxu1 %v4748_v60  ;;  %v2260_v22 = vpop.permute.xlu0 %2259  ;;  %v2393_v43 = vsel %vm778_vm0, %v5519_v55, %v2212_v41  ;;  %v4759_v55 = vld [vmem:[%s6319_s3 + $0x88] sm:$0xff]  }
 0x239   : > { %2333 = vrot.lane.b32.xlu1 %v5708_v29, %s4833_s20  ;;  %v4752_v29 = vld [vmem:[%s6319_s3 + $0xe0] sm:$0xff]   ;;  %v2457_v25 = vsel %vm778_vm0, %v5517_v40, %v2260_v22  ;;  %v4756_v40 = vld [vmem:[%s6319_s3 + $0xd0] sm:$0xff]  }
 0x23a   : > { %v1882_v41 = vld [vmem:[#allocation2 + $0x1c9] sm:$0xff] }
 0x23b   : > { %4296 = vmatpush3.bf16.msra.mxu1 %v4749_v58  ;;  %2381 = vrot.lane.b32.xlu0 %v2142_v11, %s4833_s20  ;;  %v2214_v10 = vpop.permute.xlu1 %2213 }
 0x23c   : > { %4297 = vmatprep.subr.bf16.mxu1 %v4750_v57  ;;  %v2262_v1 = vpop.permute.xlu0 %2261  ;;  %v2397_v54 = vsel %vm778_vm0, %v5566_v53, %v2214_v10 }
 0x23d   : > { %v2461_v45 = vsel %vm778_vm0, %v5564_v52, %v2262_v1  ;;  %v4760_v52 = vld [vmem:[%s6319_s3 + $0xc0] sm:$0xff]   ;;  %v1883_v1 = vld [vmem:[#allocation2 + $0x1d1] sm:$0xff] }
 0x23e   : > { %3023 = vmatmul.mubr.bf16.gmra.mxu1 %v2389_v44 }
 0x23f   : > { %3030 = vmatprep.mubr.bf16.mxu1 %v2457_v25  ;;  %4298 = vmatpush3.bf16.msra.mxu1 %v4751_v23  ;;  %v2216_v20 = vpop.permute.xlu1 %2215 }
 0x240   : > { %4299 = vmatprep.subr.bf16.mxu1 %v4752_v29  ;;  %v2401_v3 = vsel %vm778_vm0, %v5584_v27, %v2216_v20  ;;  %v1789_v20 = vld [vmem:[#allocation2 + $0x1ef] sm:$0xff] }
 0x241   : > { %v2264_v63 = vpop.permute.xlu0 %2263 }
 0x242   : > { %v2465_v59 = vsel %vm778_vm0, %v5570_v19, %v2264_v63  ;;  %v1786_v63 = vld [vmem:[#allocation2 + $0x1c7] sm:$0xff] }
 0x243   : > { %4300 = vmatpush3.bf16.msra.mxu1 %v4753_v39  ;;  %v2218_v7 = vpop.permute.xlu1 %2217 }
 0x244   : > { %4301 = vmatprep.subr.bf16.mxu1 %v4754_v2  ;;  %v2405_v26 = vsel %vm778_vm0, %v5594_v35, %v2218_v7  ;;  %v1785_v2 = vld [vmem:[#allocation2 + $0x1af] sm:$0xff] }
 0x245   : > { %v2266_v31 = vpop.permute.xlu0 %2265 }
 0x246   : > { %3031 = vmatmul.mubr.bf16.gmra.mxu1 %v2393_v43  ;;  %v2469_v53 = vsel %vm778_vm0, %v5592_v16, %v2266_v31  ;;  %v2048_v31 = vld [vmem:[#allocation2 + $0x4f] sm:$0xff] }
 0x247   : > { %3038 = vmatprep.mubr.bf16.mxu1 %v2461_v45  ;;  %4302 = vmatpush3.bf16.msra.mxu1 %v4755_v62  ;;  %v2220_v21 = vpop.permute.xlu1 %2219 }
 0x248   : > { %4303 = vmatprep.subr.bf16.mxu1 %v4756_v40  ;;  %v2409_v27 = vsel %vm778_vm0, %v5610_v38, %v2220_v21  ;;  %v2174_v21 = vld [vmem:[#allocation2 + $0x231] sm:$0xff] }
 0x249   : > { %v2268_v19 = vpop.permute.xlu0 %2267 }
 0x24a   : > { %v2473_v60 = vsel %vm778_vm0, %v5598_v47, %v2268_v19 }
 0x24b   : > { %4304 = vmatpush3.bf16.msra.mxu1 %v4757_v28  ;;  %v2222_v58 = vpop.permute.xlu1 %2221  ;;  %v1787_v28 = vld [vmem:[#allocation2 + $0x1cf] sm:$0xff] }
 0x24c   : > { %4305 = vmatprep.subr.bf16.mxu1 %v4758_v12  ;;  %v2413_v35 = vsel %vm778_vm0, %v5618_v0, %v2222_v58  ;;  %v1884_v12 = vld [vmem:[#allocation2 + $0x1e9] sm:$0xff] }
 0x24d   : > { %v2270_v34 = vpop.permute.xlu0 %2269 }
 0x24e   : > { %3039 = vmatmul.mubr.bf16.gmra.mxu1 %v2397_v54  ;;  %v2477_v16 = vsel %vm778_vm0, %v5616_v50, %v2270_v34 }
 0x24f   : > { %3046 = vmatprep.mubr.bf16.mxu1 %v2465_v59  ;;  %4306 = vmatpush3.bf16.msra.mxu1 %v4759_v55  ;;  %v2224_v18 = vpop.permute.xlu1 %2223 }
 0x250   : > { %4307 = vmatprep.subr.bf16.mxu1 %v4760_v52  ;;  %v2417_v38 = vsel %vm778_vm0, %v5634_v4, %v2224_v18  ;;  %v5883_v52 = vpack.c.bf16 %v1787_v28, %v1786_v63  ;;  %v2055_v63 = vld [vmem:[#allocation2 + $0xc7] sm:$0xff] }
 0x251   : > { %v2272_v57 = vpop.permute.xlu0 %2271 }
 0x252   : > { %v2481_v47 = vsel %vm778_vm0, %v5622_v17, %v2272_v57  ;;  %v1951_v57 = vld [vmem:[#allocation2 + $0x30] sm:$0xff] }
 0x253   : > { %4308 = vmatpush3.bf16.msra.mxu1 %v4761_v46  ;;  %v2226_v11 = vpop.permute.xlu1 %2225 }
 0x254   : > { %v2421_v0 = vsel %vm778_vm0, %v5644_v61, %v2226_v11 }
 0x255   : > { %v2274_v36 = vpop.permute.xlu0 %2273 }
 0x256   : > { %3047 = vmatmul.mubr.bf16.gmra.mxu1 %v2401_v3  ;;  %v2485_v50 = vsel %vm778_vm0, %v5642_v56, %v2274_v36 }
 0x257   : > { %3054 = vmatprep.mubr.bf16.mxu1 %v2469_v53  ;;  %v2228_v22 = vpop.permute.xlu1 %2227  ;;  %v1788_v53 = vld [vmem:[#allocation2 + $0x1e7] sm:$0xff] }
 0x258   : > { %v2425_v4 = vsel %vm778_vm0, %v5658_v6, %v2228_v22  ;;  %v5888_v19 = vpack.c.bf16 %v1789_v20, %v1788_v53  ;;  %v2052_v22 = vld [vmem:[#allocation2 + $0x8f] sm:$0xff] }
 0x259   : > { %v2276_v8 = vpop.permute.xlu0 %2275  ;;  %v2058_v20 = vld [vmem:[#allocation2 + $0xef] sm:$0xff] }
 0x25a   : > { %v2489_v17 = vsel %vm778_vm0, %v5646_v13, %v2276_v8 }
 0x25b   : > { %v2230_v29 = vpop.permute.xlu1 %2229 }
 0x25c   : > { %v2429_v61 = vsel %vm778_vm0, %v5668_v15, %v2230_v29  ;;  %v1784_v15 = vld [vmem:[#allocation2 + $0x1a7] sm:$0xff] }
 0x25d   : > { %v2278_v23 = vpop.permute.xlu0 %2277  ;;  %v5878_v43 = vpack.c.bf16 %v1785_v2, %v1784_v15  ;;  %v1954_v2 = vld [vmem:[#allocation2 + $0x68] sm:$0xff] }
 0x25e   : > { %3055 = vmatmul.mubr.bf16.gmra.mxu1 %v2405_v26  ;;  %v2493_v56 = vsel %vm778_vm0, %v5666_v48, %v2278_v23  ;;  %v2047_v26 = vld [vmem:[#allocation2 + $0x47] sm:$0xff] }
 0x25f   : > { %3062 = vmatprep.mubr.bf16.mxu1 %v2473_v60  ;;  %v2232_v25 = vpop.permute.xlu1 %2231  ;;  %v2173_v60 = vld [vmem:[#allocation2 + $0x229] sm:$0xff]  ;;  %v2079_v34 = vpack.c.bf16 %v2048_v31, %v2047_v26 }
 0x260   : > { %v2433_v6 = vsel %vm778_vm0, %v5682_v37, %v2232_v25  ;;  %v2057_v26 = vld [vmem:[#allocation2 + $0xe7] sm:$0xff] }
 0x261   : > { %v2280_v44 = vpop.permute.xlu0 %2279 }
 0x262   : > { %v2497_v13 = vsel %vm778_vm0, %v5670_v5, %v2280_v44  ;;  %v1900_v5 = vpack.c.bf16 %v1883_v1, %v1882_v41  ;;  %v2051_v44 = vld [vmem:[#allocation2 + $0x87] sm:$0xff] }
 0x263   : > { %v2234_v62 = vpop.permute.xlu1 %2233 }
 0x264   : > { %v2437_v45 = vsel %vm778_vm0, %v5878_v43, %v2234_v62  ;;  %v2053_v62 = vld [vmem:[#allocation2 + $0xa7] sm:$0xff] }
 0x265   : > { %v2282_v39 = vpop.permute.xlu0 %2281 }
 0x266   : > { %3063 = vmatmul.mubr.bf16.gmra.mxu1 %v2409_v27  ;;  %v2501_v48 = vsel %vm778_vm0, %v5690_v32, %v2282_v39  ;;  %v1885_v32 = vld [vmem:[#allocation2 + $0x1f1] sm:$0xff]  ;;  %v2190_v27 = vpack.c.bf16 %v2174_v21, %v2173_v60  ;;  %v2084_v60 = vpack.c.bf16 %v2058_v20, %v2057_v26  ;;  %v2067_v20 = vld [vmem:[#allocation2 + $0x187] sm:$0xff] }
 0x267   : > { %3070 = vmatprep.mubr.bf16.mxu1 %v2477_v16  ;;  %v2236_v10 = vpop.permute.xlu1 %2235  ;;  %v1901_v54 = vpack.c.bf16 %v1885_v32, %v1884_v12  ;;  %v1955_v39 = vld [vmem:[#allocation2 + $0x70] sm:$0xff]  ;;  %v1956_v12 = vld [vmem:[#allocation2 + $0x88] sm:$0xff] }
 0x268   : > { %v2441_v59 = vsel %vm778_vm0, %v5883_v52, %v2236_v10  ;;  %4598 = vmatmul.mubr.msk.bf16.gmra.mxu0 %vm778_vm0, %v2190_v27  ;;  %v1984_v1 = vpack.c.bf16 %v1955_v39, %v1954_v2  ;;  %v1961_v27 = vld [vmem:[#allocation2 + $0xd0] sm:$0xff]  ;;  %v1964_v39 = vld [vmem:[#allocation2 + $0x108] sm:$0xff] }
 0x269   : > { %v2284_v40 = vpop.permute.xlu0 %2283  ;;  %v2063_v2 = vld [vmem:[#allocation2 + $0x147] sm:$0xff] }
 0x26a   : > { %v2505_v37 = vsel %vm778_vm0, %v1900_v5, %v2284_v40 }
 0x26b   : > { %v2238_v3 = vpop.permute.xlu1 %2237 }
 0x26c   : > { %v2445_v16 = vsel %vm778_vm0, %v5888_v19, %v2238_v3  ;;  %v1958_v3 = vld [vmem:[#allocation2 + $0xa8] sm:$0xff] }
 0x26d   : > { %v2286_v55 = vpop.permute.xlu0 %2285 }
 0x26e   : > { %3071 = vmatmul.mubr.bf16.gmra.mxu1 %v2413_v35  ;;  %v2509_v46 = vsel %vm778_vm0, %v1901_v54, %v2286_v55  ;;  %v2050_v35 = vld [vmem:[#allocation2 + $0x6f] sm:$0xff] }
 0x26f   : > { %3078 = vmatprep.mubr.bf16.mxu1 %v2481_v47  ;;  %v1950_v47 = vld [vmem:[#allocation2 + $0x28] sm:$0xff]  ;;  %v2304_v18 = vpop.permute.xlu1 %2303 }
 0x270   : > { %v1982_v36 = vpack.c.bf16 %v1951_v57, %v1950_v47  ;;  %v1960_v57 = vld [vmem:[#allocation2 + $0xc8] sm:$0xff] }
 0x271   : > { %v2352_v7 = vpop.permute.xlu0 %2351  ;;  %v1987_v47 = vpack.c.bf16 %v1961_v27, %v1960_v57 }
 0x272   : > { %v2577_v58 = vsel %vm778_vm0, %v2079_v34, %v2352_v7  ;;  %v2513_v8 = vsel %vm778_vm0, %v1982_v36, %v2304_v18  ;;  %v2059_v18 = vld [vmem:[#allocation2 + $0x107] sm:$0xff] }
 0x273   : > { %v2306_v23 = vpop.permute.xlu1 %2305 }
 0x276   : > { %3079 = vmatmul.mubr.bf16.gmra.mxu1 %v2417_v38  ;;  %v2354_v38 = vpop.permute.xlu0 %2353 }
 0x277   : > { %3086 = vmatprep.mubr.bf16.mxu1 %v2485_v50  ;;  %v2049_v50 = vld [vmem:[#allocation2 + $0x67] sm:$0xff] }
 0x278   : > { %v2080_v11 = vpack.c.bf16 %v2050_v35, %v2049_v50 }
 0x27e   : > { %3087 = vmatmul.mubr.bf16.gmra.mxu1 %v2421_v0  ;;  %v2581_v0 = vsel %vm778_vm0, %v2080_v11, %v2354_v38  ;;  %v1963_v11 = vld [vmem:[#allocation2 + $0xf0] sm:$0xff] }
 0x27f   : > { %3094 = vmatprep.mubr.bf16.mxu1 %v2489_v17  ;;  %v1953_v17 = vld [vmem:[#allocation2 + $0x50] sm:$0xff] }
 0x286   : > { %3095 = vmatmul.mubr.bf16.gmra.mxu1 %v2425_v4  ;;  %v1952_v4 = vld [vmem:[#allocation2 + $0x48] sm:$0xff] }
 0x287   : > { %3102 = vmatprep.mubr.bf16.mxu1 %v2493_v56  ;;  %v2356_v56 = vpop.permute.xlu0 %2355  ;;  %v1983_v29 = vpack.c.bf16 %v1953_v17, %v1952_v4  ;;  %v1962_v17 = vld [vmem:[#allocation2 + $0xe8] sm:$0xff] }
 0x288   : > { %v2061_v4 = vld [vmem:[#allocation2 + $0x127] sm:$0xff] }
 0x28b   : > { %v2358_v41 = vpop.permute.xlu0 %2357 }
 0x28e   : > { %3103 = vmatmul.mubr.bf16.gmra.mxu1 %v2429_v61  ;;  %v2081_v61 = vpack.c.bf16 %v2052_v22, %v2051_v44 }
 0x28f   : > { %3110 = vmatprep.mubr.bf16.mxu1 %v2497_v13  ;;  %v2517_v13 = vsel %vm778_vm0, %v1983_v29, %v2306_v23  ;;  %v2360_v32 = vpop.permute.xlu0 %2359  ;;  %v1988_v23 = vpack.c.bf16 %v1963_v11, %v1962_v17 }
 0x290   : > { %v2585_v25 = vsel %vm778_vm0, %v2081_v61, %v2356_v56  ;;  %v1965_v61 = vld [vmem:[#allocation2 + $0x110] sm:$0xff] }
 0x293   : > { %v2362_v53 = vpop.permute.xlu0 %2361 }
 0x294   : > { %v2597_v34 = vsel %vm778_vm0, %v2084_v60, %v2362_v53 }
 0x296   : > { %3111 = vmatmul.mubr.bf16.gmra.mxu1 %v2433_v6  ;;  %v2054_v6 = vld [vmem:[#allocation2 + $0xaf] sm:$0xff] }
 0x297   : > { %3118 = vmatprep.mubr.bf16.mxu1 %v2501_v48  ;;  %v2308_v48 = vpop.permute.xlu1 %2307  ;;  %v2082_v15 = vpack.c.bf16 %v2054_v6, %v2053_v62  ;;  %v2364_v35 = vpop.permute.xlu0 %2363 }
 0x298   : > { %v2521_v40 = vsel %vm778_vm0, %v1984_v1, %v2308_v48  ;;  %v1989_v48 = vpack.c.bf16 %v1965_v61, %v1964_v39 }
 0x299   : > { %v2589_v5 = vsel %vm778_vm0, %v2082_v15, %v2358_v41  ;;  %v2066_v15 = vld [vmem:[#allocation2 + $0x16f] sm:$0xff] }
 0x29b   : > { %v2310_v28 = vpop.permute.xlu1 %2309  ;;  %v2366_v22 = vpop.permute.xlu0 %2365 }
 0x29e   : > { %3119 = vmatmul.mubr.bf16.gmra.mxu1 %v2437_v45  ;;  %v1957_v45 = vld [vmem:[#allocation2 + $0x90] sm:$0xff] }
 0x29f   : > { %3126 = vmatprep.mubr.bf16.mxu1 %v2505_v37  ;;  %v2056_v37 = vld [vmem:[#allocation2 + $0xcf] sm:$0xff]  ;;  %v1985_v10 = vpack.c.bf16 %v1957_v45, %v1956_v12  ;;  %v2312_v31 = vpop.permute.xlu1 %2311  ;;  %v2368_v6 = vpop.permute.xlu0 %2367  ;;  %v2065_v45 = vld [vmem:[#allocation2 + $0x167] sm:$0xff] }
 0x2a0   : > { %v2083_v55 = vpack.c.bf16 %v2056_v37, %v2055_v63  ;;  %v2088_v37 = vpack.c.bf16 %v2066_v15, %v2065_v45  ;;  %v2078_v45 = vld [vmem:[#allocation2 + $0x22f] sm:$0xff] }
 0x2a1   : > { %v2525_v54 = vsel %vm778_vm0, %v1985_v10, %v2310_v28 }
 0x2a6   : > { %3127 = vmatmul.mubr.bf16.gmra.mxu1 %v2441_v59  ;;  %v2593_v59 = vsel %vm778_vm0, %v2083_v55, %v2360_v32  ;;  %v2068_v55 = vld [vmem:[#allocation2 + $0x18f] sm:$0xff] }
 0x2a7   : > { %3134 = vmatprep.mubr.bf16.mxu1 %v2509_v46  ;;  %v1959_v46 = vld [vmem:[#allocation2 + $0xb0] sm:$0xff] }
 0x2a8   : > { %v1986_v7 = vpack.c.bf16 %v1959_v46, %v1958_v3  ;;  %v2089_v3 = vpack.c.bf16 %v2068_v55, %v2067_v20 }
 0x2aa   : > { %v2529_v21 = vsel %vm778_vm0, %v1986_v7, %v2312_v31 }
 0x2ae   : > { %3135 = vmatmul.mubr.bf16.gmra.mxu1 %v2445_v16  ;;  %v2060_v16 = vld [vmem:[#allocation2 + $0x10f] sm:$0xff] }
 0x2af   : > { %3175 = vmatprep.mubr.bf16.mxu1 %v2577_v58  ;;  %v2314_v58 = vpop.permute.xlu1 %2313  ;;  %v2085_v36 = vpack.c.bf16 %v2060_v16, %v2059_v18 }
 0x2b0   : > { %v2533_v38 = vsel %vm778_vm0, %v1987_v47, %v2314_v58 }
 0x2b1   : > { %v2601_v50 = vsel %vm778_vm0, %v2085_v36, %v2364_v35 }
 0x2b6   : > { %3176 = vmatmul.mubr.bf16.vlgmr.msra.gmra.mxu1 %v2513_v8  ;;  %v2062_v8 = vld [vmem:[#allocation2 + $0x12f] sm:$0xff] }
 0x2b7   : > { %3183 = vmatprep.mubr.bf16.mxu1 %v2581_v0  ;;  %v2316_v0 = vpop.permute.xlu1 %2315  ;;  %v2086_v56 = vpack.c.bf16 %v2062_v8, %v2061_v4 }
 0x2b8   : > { %v2537_v29 = vsel %vm778_vm0, %v1988_v23, %v2316_v0 }
 0x2b9   : > { %v2605_v44 = vsel %vm778_vm0, %v2086_v56, %v2366_v22 }
 0x2be   : > { %3184 = vmatmul.mubr.bf16.gmra.mxu1 %v2517_v13  ;;  %v2064_v13 = vld [vmem:[#allocation2 + $0x14f] sm:$0xff] }
 0x2bf   : > { %3191 = vmatprep.mubr.bf16.mxu1 %v2585_v25  ;;  %v2318_v25 = vpop.permute.xlu1 %2317  ;;  %v2087_v41 = vpack.c.bf16 %v2064_v13, %v2063_v2 }
 0x2c0   : > { %v2541_v1 = vsel %vm778_vm0, %v1989_v48, %v2318_v25 }
 0x2c1   : > { %v2609_v62 = vsel %vm778_vm0, %v2087_v41, %v2368_v6  ;;  %v2076_v6 = vld [vmem:[#allocation2 + $0x20f] sm:$0xff] }
 0x2c6   : > { %3192 = vmatmul.mubr.bf16.gmra.mxu1 %v2521_v40  ;;  %v2320_v40 = vpop.permute.xlu1 %2319 }
 0x2c7   : > { %3199 = vmatprep.mubr.bf16.mxu1 %v2589_v5  ;;  %v2370_v5 = vpop.permute.xlu0 %2369  ;;  %v2545_v28 = vsel %vm778_vm0, %v5652_v49, %v2320_v40 }
 0x2c8   : > { %v2613_v32 = vsel %vm778_vm0, %v2088_v37, %v2370_v5  ;;  %v2077_v5 = vld [vmem:[#allocation2 + $0x227] sm:$0xff] }
 0x2cb   : > { %v2372_v46 = vpop.permute.xlu0 %2371 }
 0x2cc   : > { %v2617_v26 = vsel %vm778_vm0, %v2089_v3, %v2372_v46 }
 0x2ce   : > { %3200 = vmatmul.mubr.bf16.gmra.mxu1 %v2525_v54  ;;  %v2322_v54 = vpop.permute.xlu1 %2321 }
 0x2cf   : > { %3207 = vmatprep.mubr.bf16.mxu1 %v2593_v59  ;;  %v2549_v53 = vsel %vm778_vm0, %v5662_v14, %v2322_v54  ;;  %v2374_v16 = vpop.permute.xlu0 %2373 }
 0x2d0   : > { %v2621_v47 = vsel %vm778_vm0, %v5878_v43, %v2374_v16 }
 0x2d3   : > { %v2376_v11 = vpop.permute.xlu0 %2375 }
 0x2d4   : > { %v2625_v22 = vsel %vm778_vm0, %v5883_v52, %v2376_v11 }
 0x2d6   : > { %3208 = vmatmul.mubr.bf16.gmra.mxu1 %v2529_v21 }
 0x2d7   : > { %3215 = vmatprep.mubr.bf16.mxu1 %v2597_v34  ;;  %v2324_v34 = vpop.permute.xlu1 %2323 }
 0x2d8   : > { %v2553_v57 = vsel %vm778_vm0, %v5676_v42, %v2324_v34 }
 0x2de   : > { %3216 = vmatmul.mubr.bf16.gmra.mxu1 %v2533_v38  ;;  %v2326_v38 = vpop.permute.xlu1 %2325 }
 0x2df   : > { %3223 = vmatprep.mubr.bf16.mxu1 %v2601_v50  ;;  %v2557_v0 = vsel %vm778_vm0, %v5686_v30, %v2326_v38 }
 0x2e2   : > { %v2328_v4 = vpop.permute.xlu1 %2327 }
 0x2e3   : > { %v2561_v61 = vsel %vm778_vm0, %v5697_v24, %v2328_v4 }
 0x2e6   : > { %3224 = vmatmul.mubr.bf16.gmra.mxu1 %v2537_v29  ;;  %v2378_v29 = vpop.permute.xlu0 %2377  ;;  %v2330_v48 = vpop.permute.xlu1 %2329 }
 0x2e7   : > { %3231 = vmatprep.mubr.bf16.mxu1 %v2605_v44  ;;  %v2629_v25 = vsel %vm778_vm0, %v5888_v19, %v2378_v29  ;;  %v2565_v24 = vsel %vm778_vm0, %v5704_v9, %v2330_v48 }
 0x2ea   : > { %v2380_v41 = vpop.permute.xlu0 %2379  ;;  %v2332_v55 = vpop.permute.xlu1 %2331 }
 0x2eb   : > { %v2569_v9 = vsel %vm778_vm0, %v5712_v51, %v2332_v55 }
 0x2ee   : > { %3232 = vmatmul.mubr.bf16.gmra.mxu1 %v2541_v1  ;;  %v2075_v1 = vld [vmem:[#allocation2 + $0x207] sm:$0xff] }
 0x2ef   : > { %3239 = vmatprep.mubr.bf16.mxu1 %v2609_v62  ;;  %v2093_v15 = vpack.c.bf16 %v2076_v6, %v2075_v1 }
 0x2f1   : > { %v2633_v19 = vsel %vm778_vm0, %v2093_v15, %v2380_v41 }
 0x2f6   : > { %v4197_v12 = vpop.f32.mrf.mxu1  ;;  %3240 = vmatmul.mubr.bf16.gmra.mxu1 %v2545_v28 }
 0x2f7   : > { %3247 = vmatprep.mubr.bf16.mxu1 %v2613_v32 }
 0x2f8   : > { %v4198_v10 = vpop.f32.mrf.mxu1 }
 0x2f9   : > { %v5913_v63 = vadd.f32 %v4198_v10, %v4197_v12  ;;  %v2094_v12 = vpack.c.bf16 %v2078_v45, %v2077_v5  ;;  %v2382_v10 = vpop.permute.xlu0 %2381 }
 0x2fa   : > { %v4200_v59 = vpop.f32.mrf.mxu1 }
 0x2fb   : > { %v2637_v46 = vsel %vm778_vm0, %v2094_v12, %v2382_v10 }
 0x2fc   : > { %v4201_v31 = vpop.f32.mrf.mxu1 }
 0x2fd   : > { %v5917_v7 = vadd.f32 %v4201_v31, %v4200_v59 }
 0x2fe   : > { %v4203_v49 = vpop.f32.mrf.mxu1  ;;  %3248 = vmatmul.mubr.bf16.gmra.mxu1 %v2549_v53 }
 0x2ff   : > { %3255 = vmatprep.mubr.bf16.mxu1 %v2617_v26 }
 0x300   : > { %v4204_v60 = vpop.f32.mrf.mxu1 }
 0x301   : > { %v5920_v21 = vadd.f32 %v4204_v60, %v4203_v49  ;;  %v2334_v49 = vpop.permute.xlu1 %2333 }
 0x302   : > { %v4206_v27 = vpop.f32.mrf.mxu1  ;;  %v2573_v34 = vsel %vm778_vm0, %v5779_v33, %v2334_v49 }
 0x304   : > { %v4207_v58 = vpop.f32.mrf.mxu1 }
 0x305   : > { %v5924_v35 = vadd.f32 %v4207_v58, %v4206_v27 }
 0x306   : > { %v4209_v14 = vpop.f32.mrf.mxu1  ;;  %3256 = vmatmul.mubr.bf16.gmra.mxu1 %v2553_v57 }
 0x307   : > { %3263 = vmatprep.mubr.bf16.mxu1 %v2621_v47 }
 0x308   : > { %v4210_v18 = vpop.f32.mrf.mxu1 }
 0x309   : > { %v5928_v36 = vadd.f32 %v4210_v18, %v4209_v14 }
 0x30a   : > { %v4212_v50 = vpop.f32.mrf.mxu1 }
 0x30c   : > { %v4213_v8 = vpop.f32.mrf.mxu1 }
 0x30d   : > { %v5932_v17 = vadd.f32 %v4213_v8, %v4212_v50 }
 0x30e   : > { %v4215_v42 = vpop.f32.mrf.mxu1  ;;  %3264 = vmatmul.mubr.bf16.gmra.mxu1 %v2557_v0 }
 0x30f   : > { %3271 = vmatprep.mubr.bf16.mxu1 %v2625_v22 }
 0x310   : > { %v4216_v43 = vpop.f32.mrf.mxu1 }
 0x311   : > { %v5936_v23 = vadd.f32 %v4216_v43, %v4215_v42 }
 0x312   : > { %v4218_v56 = vpop.f32.mrf.mxu1 }
 0x314   : > { %v4219_v44 = vpop.f32.mrf.mxu1 }
 0x315   : > { %v5940_v13 = vadd.f32 %v4219_v44, %v4218_v56 }
 0x316   : > { %v4221_v30 = vpop.f32.mrf.mxu1  ;;  %3272 = vmatmul.mubr.bf16.gmra.mxu1 %v2561_v61 }
 0x317   : > { %3279 = vmatprep.mubr.bf16.mxu1 %v2629_v25 }
 0x318   : > { %v4222_v52 = vpop.f32.mrf.mxu1 }
 0x319   : > { %v5944_v39 = vadd.f32 %v4222_v52, %v4221_v30 }
 0x31a   : > { %v4224_v2 = vpop.f32.mrf.mxu1 }
 0x31c   : > { %v4225_v62 = vpop.f32.mrf.mxu1 }
 0x31d   : > { %v5948_v40 = vadd.f32 %v4225_v62, %v4224_v2 }
 0x31e   : > { %v4227_v37 = vpop.f32.mrf.mxu1  ;;  %3280 = vmatmul.mubr.bf16.gmra.mxu1 %v2565_v24 }
 0x31f   : > { %3287 = vmatprep.mubr.bf16.mxu1 %v2633_v19 }
 0x320   : > { %v4228_v28 = vpop.f32.mrf.mxu1 }
 0x321   : > { %v5951_v32 = vadd.f32 %v4228_v28, %v4227_v37 }
 0x322   : > { %v4230_v54 = vpop.f32.mrf.mxu1 }
 0x324   : > { %v4231_v59 = vpop.f32.mrf.mxu1 }
 0x325   : > { %v5956_v20 = vadd.f32 %v4231_v59, %v4230_v54 }
 0x326   : > { %v4233_v31 = vpop.f32.mrf.mxu1  ;;  %3288 = vmatmul.mubr.bf16.gmra.mxu1 %v2569_v9 }
 0x327   : > { %3295 = vmatprep.mubr.bf16.mxu1 %v2637_v46 }
 0x328   : > { %v4234_v3 = vpop.f32.mrf.mxu1 }
 0x329   : > { %v5958_v53 = vadd.f32 %v4234_v3, %v4233_v31 }
 0x32a   : > { %v4236_v26 = vpop.f32.mrf.mxu1 }
 0x32c   : > { %v4237_v60 = vpop.f32.mrf.mxu1 }
 0x32d   : > { %v5962_v27 = vadd.f32 %v4237_v60, %v4236_v26 }
 0x32e   : > { %v4239_v16 = vpop.f32.mrf.mxu1  ;;  %3296 = vmatmul.mubr.bf16.gmra.mxu1 %v2573_v34 }
 0x330   : > { %v4240_v58 = vpop.f32.mrf.mxu1 }
 0x331   : > { %v5964_v51 = vadd.f32 %v4240_v58, %v4239_v16 }
 0x332   : > { %v4242_v57 = vpop.f32.mrf.mxu1 }
 0x334   : > { %v4243_v14 = vpop.f32.mrf.mxu1 }
 0x335   : > { %v5966_v47 = vadd.f32 %v4243_v14, %v4242_v57  ;;  %v4571_v57 = vpop.f32.mrf.mxu0 }
 0x336   : > { %v4245_v18 = vpop.f32.mrf.mxu1 }
 0x338   : > { %v4246_v38 = vpop.f32.mrf.mxu1 }
 0x339   : > { %v5968_v50 = vadd.f32 %v4246_v38, %v4245_v18  ;;  %v6003_v38 = vld [vmem:[%s6320_s4] ss:$0 sm:$0xff] }
 0x33a   : > { %v4248_v11 = vpop.f32.mrf.mxu1 }
 0x33c   : > { %v4249_v8 = vpop.f32.mrf.mxu1 }
 0x33d   : > { %v5970_v0 = vadd.f32 %v4249_v8, %v4248_v11  ;;  %v3338_v8 = vpop.f32.mrf.mxu0 }
 0x33e   : > { %v4251_v33 = vpop.f32.mrf.mxu1 }
 0x340   : > { %v4252_v42 = vpop.f32.mrf.mxu1 }
 0x341   : > { %v5972_v22 = vadd.f32 %v4252_v42, %v4251_v33  ;;  %v3017_v42 = vadd.f32 %v5913_v63, %v6003_v38  ;;  %v3025_v63 = vadd.f32 %v5920_v21, %v6003_v38 }
 0x342   : > { %v4254_v43 = vpop.f32.mrf.mxu1 }
 0x344   : > { %v4255_v4 = vpop.f32.mrf.mxu1 }
 0x345   : > { %v5974_v56 = vadd.f32 %v4255_v4, %v4254_v43 }
 0x346   : > { %v4257_v29 = vpop.f32.mrf.mxu1 }
 0x348   : > { %v4258_v44 = vpop.f32.mrf.mxu1 }
 0x349   : > { %v5976_v61 = vadd.f32 %v4258_v44, %v4257_v29  ;;  %v4572_v44 = vpop.f32.mrf.mxu0 }
 0x34a   : > { %v4260_v30 = vpop.f32.mrf.mxu1 }
 0x34c   : > { %v4261_v25 = vpop.f32.mrf.mxu1 }
 0x34d   : > { %v5978_v52 = vadd.f32 %v4261_v25, %v4260_v30  ;;  %v3020_v25 = vadd.f32 %v5917_v7, %v6003_v38  ;;  %v3498_v7 = vld [vmem:[%s6321_s5 + $0x8] sm:$0xff] }
 0x34e   : > { %v4263_v6 = vpop.f32.mrf.mxu1 }
 0x350   : > { %v4264_v48 = vpop.f32.mrf.mxu1 }
 0x351   : > { %v5980_v2 = vadd.f32 %v4264_v48, %v4263_v6 }
 0x352   : > { %v4266_v41 = vpop.f32.mrf.mxu1 }
 0x354   : > { %v4267_v1 = vpop.f32.mrf.mxu1 }
 0x355   : > { %v5982_v62 = vadd.f32 %v4267_v1, %v4266_v41  ;;  %v3497_v41 = vld [vmem:[%s6321_s5] sm:$0xff] }
 0x356   : > { %v4269_v15 = vpop.f32.mrf.mxu1 }
 0x358   : > { %v4270_v24 = vpop.f32.mrf.mxu1 }
 0x359   : > { %v5984_v5 = vadd.f32 %v4270_v24, %v4269_v15 }
 0x35a   : > { %v4272_v45 = vpop.f32.mrf.mxu1 }
 0x35c   : > { %v4273_v37 = vpop.f32.mrf.mxu1 }
 0x35d   : > { %v5986_v19 = vadd.f32 %v4273_v37, %v4272_v45  ;;  %v3341_v45 = vpop.f32.mrf.mxu0 }
 0x35e   : > { %v4275_v28 = vpop.f32.mrf.mxu1 }
 0x360   : > { %v4276_v12 = vpop.f32.mrf.mxu1 }
 0x361   : > { %v5988_v10 = vadd.f32 %v4276_v12, %v4275_v28 }
 0x362   : > { %v4278_v55 = vpop.f32.mrf.mxu1 }
 0x364   : > { %v4279_v54 = vpop.f32.mrf.mxu1 }
 0x365   : > { %v5990_v59 = vadd.f32 %v4279_v54, %v4278_v55 }
 0x366   : > { %v4281_v46 = vpop.f32.mrf.mxu1 }
 0x368   : > { %v4282_v9 = vpop.f32.mrf.mxu1 }
 0x369   : > { %v5992_v31 = vadd.f32 %v4282_v9, %v4281_v46 }
 0x36a   : > { %v4284_v3 = vpop.f32.mrf.mxu1 }
 0x36c   : > { %v4285_v49 = vpop.f32.mrf.mxu1 }
 0x36d   : > { %v5994_v26 = vadd.f32 %v4285_v49, %v4284_v3  ;;  %v4575_v3 = vpop.f32.mrf.mxu0 }
 0x36e   : > { %v4287_v60 = vpop.f32.mrf.mxu1 }
 0x370   : > { %v4288_v34 = vpop.f32.mrf.mxu1 }
 0x371   : > { %v5996_v16 = vadd.f32 %v4288_v34, %v4287_v60  ;;  %v3028_v60 = vadd.f32 %v5924_v35, %v6003_v38 }
 0x372   : > { %v4290_v58 = vpop.f32.mrf.mxu1 }
 0x374   : > { %v4291_v14 = vpop.f32.mrf.mxu1 }
 0x375   : > { %v5998_v18 = vadd.f32 %v4291_v14, %v4290_v58  ;;  %v3499_v14 = vld [vmem:[%s6321_s5 + $0x10] sm:$0xff] }
 0x376   : > { %v4309_v11 = vpop.f32.mrf.mxu1 }
 0x378   : > { %v4310_v33 = vpop.f32.mrf.mxu1 }
 0x379   : > { %v4311_v43 = vadd.f32 %v4310_v33, %v4309_v11 }
 0x37a   : > { %v4312_v4 = vpop.f32.mrf.mxu1 }
 0x37b   : > { %v3178_v29 = vadd.f32 %v4311_v43, %v3017_v42  ;;  %v3354_v42 = vpop.f32.mrf.mxu0 }
 0x37c   : > { %v4313_v30 = vpop.f32.mrf.mxu1 }
 0x37d   : > { %v3339_v6 = vadd.f32 %v3338_v8, %v3178_v29  ;;  %v4314_v48 = vadd.f32 %v4313_v30, %v4312_v4  ;;  %v3033_v4 = vadd.f32 %v5928_v36, %v6003_v38 }
 0x37e   : > { %v4315_v1 = vpop.f32.mrf.mxu1 }
 0x37f   : > { %v3465_v15 = vmax.f32 %v3339_v6, 0.0  ;;  %v3181_v24 = vadd.f32 %v4314_v48, %v3020_v25 }
 0x380   : > { %v4316_v37 = vpop.f32.mrf.mxu1 }
 0x381   : > { %v6014_v28 = vadd.f32 %v3497_v41, %v3465_v15  ;;  %v3342_v12 = vadd.f32 %v3341_v45, %v3181_v24  ;;  %v4317_v55 = vadd.f32 %v4316_v37, %v4315_v1  ;;  %v4576_v41 = vpop.f32.mrf.mxu0  ;;  %v3036_v15 = vadd.f32 %v5932_v17, %v6003_v38 }
 0x382   : > { %v4318_v54 = vpop.f32.mrf.mxu1 }
 0x383   : > { %6446 = vst [vmem:[#allocation6_spill] sm:$0xff] %v6014_v28  ;;  %v3466_v46 = vmax.f32 %v3342_v12, 0.0  ;;  %v3186_v9 = vadd.f32 %v4317_v55, %v3025_v63  ;;  %v3357_v55 = vpop.f32.mrf.mxu0 }
 0x384   : > { %v4319_v49 = vpop.f32.mrf.mxu1 }
 0x385   : > { %v6021_v34 = vadd.f32 %v3498_v7, %v3466_v46  ;;  %v3347_v58 = vadd.f32 %v4571_v57, %v3186_v9  ;;  %v4320_v21 = vadd.f32 %v4319_v49, %v4318_v54  ;;  %v3500_v57 = vld [vmem:[%s6321_s5 + $0x18] sm:$0xff]  ;;  %v3041_v54 = vadd.f32 %v5936_v23, %v6003_v38  ;;  %v3502_v49 = vld [vmem:[%s6321_s5 + $0x28] sm:$0xff] }
 0x386   : > { %v4321_v11 = vpop.f32.mrf.mxu1 }
 0x387   : > { %6447 = vst [vmem:[#allocation19_spill] sm:$0xff] %v6021_v34  ;;  %v3467_v8 = vmax.f32 %v3347_v58, 0.0  ;;  %v3189_v33 = vadd.f32 %v4320_v21, %v3028_v60 }
 0x388   : > { %v4322_v43 = vpop.f32.mrf.mxu1 }
 0x389   : > { %v6028_v29 = vadd.f32 %v3499_v14, %v3467_v8  ;;  %v3350_v30 = vadd.f32 %v4572_v44, %v3189_v33  ;;  %v4323_v35 = vadd.f32 %v4322_v43, %v4321_v11  ;;  %v3501_v44 = vld [vmem:[%s6321_s5 + $0x20] sm:$0xff]  ;;  %v4579_v14 = vpop.f32.mrf.mxu0  ;;  %v3044_v8 = vadd.f32 %v5940_v13, %v6003_v38  ;;  %v3503_v43 = vld [vmem:[%s6321_s5 + $0x30] sm:$0xff] }
 0x38a   : > { %v4324_v25 = vpop.f32.mrf.mxu1 }
 0x38b   : > { %v3468_v6 = vmax.f32 %v3350_v30, 0.0  ;;  %v3194_v48 = vadd.f32 %v4323_v35, %v3033_v4 }
 0x38c   : > { %v4325_v1 = vpop.f32.mrf.mxu1 }
 0x38d   : > { %v6035_v24 = vadd.f32 %v3500_v57, %v3468_v6  ;;  %v3355_v45 = vadd.f32 %v3354_v42, %v3194_v48  ;;  %v4326_v36 = vadd.f32 %v4325_v1, %v4324_v25  ;;  %v3370_v57 = vpop.f32.mrf.mxu0  ;;  %v3049_v6 = vadd.f32 %v5944_v39, %v6003_v38 }
 0x38e   : > { %v4327_v37 = vpop.f32.mrf.mxu1 }
 0x38f   : > { %v3469_v63 = vmax.f32 %v3355_v45, 0.0  ;;  %v3197_v12 = vadd.f32 %v4326_v36, %v3036_v15 }
 0x390   : > { %v4328_v7 = vpop.f32.mrf.mxu1 }
 0x391   : > { %v6042_v46 = vadd.f32 %v3501_v44, %v3469_v63  ;;  %v3358_v9 = vadd.f32 %v3357_v55, %v3197_v12  ;;  %v4329_v17 = vadd.f32 %v4328_v7, %v4327_v37  ;;  %v4580_v44 = vpop.f32.mrf.mxu0  ;;  %v3052_v63 = vadd.f32 %v5948_v40, %v6003_v38 }
 0x392   : > { %v4330_v60 = vpop.f32.mrf.mxu1 }
 0x393   : > { %v3470_v58 = vmax.f32 %v3358_v9, 0.0  ;;  %v3202_v21 = vadd.f32 %v4329_v17, %v3041_v54  ;;  %v3373_v17 = vpop.f32.mrf.mxu0 }
 0x394   : > { %v4331_v11 = vpop.f32.mrf.mxu1 }
 0x395   : > { %v6049_v33 = vadd.f32 %v3502_v49, %v3470_v58  ;;  %v3363_v42 = vadd.f32 %v4575_v3, %v3202_v21  ;;  %v4332_v23 = vadd.f32 %v4331_v11, %v4330_v60  ;;  %v3504_v3 = vld [vmem:[%s6321_s5 + $0x38] sm:$0xff]  ;;  %v3057_v60 = vadd.f32 %v5951_v32, %v6003_v38  ;;  %v3506_v11 = vld [vmem:[%s6321_s5 + $0x48] sm:$0xff] }
 0x396   : > { %v4333_v4 = vpop.f32.mrf.mxu1 }
 0x397   : > { %6448 = vst [vmem:[#allocation32_spill] sm:$0xff] %v6049_v33  ;;  %v3471_v30 = vmax.f32 %v3363_v42, 0.0  ;;  %v3205_v35 = vadd.f32 %v4332_v23, %v3044_v8 }
 0x398   : > { %v4334_v25 = vpop.f32.mrf.mxu1 }
 0x399   : > { %v6056_v48 = vadd.f32 %v3503_v43, %v3471_v30  ;;  %v3366_v1 = vadd.f32 %v4576_v41, %v3205_v35  ;;  %v4335_v13 = vadd.f32 %v4334_v25, %v4333_v4  ;;  %v3505_v41 = vld [vmem:[%s6321_s5 + $0x40] sm:$0xff]  ;;  %v4583_v43 = vpop.f32.mrf.mxu0  ;;  %v3060_v30 = vadd.f32 %v5956_v20, %v6003_v38  ;;  %v3507_v25 = vld [vmem:[%s6321_s5 + $0x50] sm:$0xff] }
 0x39a   : > { %v4336_v15 = vpop.f32.mrf.mxu1 }
 0x39b   : > { %v3472_v45 = vmax.f32 %v3366_v1, 0.0  ;;  %v3210_v36 = vadd.f32 %v4335_v13, %v3049_v6 }
 0x39c   : > { %v4337_v37 = vpop.f32.mrf.mxu1 }
 0x39d   : > { %v6063_v12 = vadd.f32 %v3504_v3, %v3472_v45  ;;  %v3371_v55 = vadd.f32 %v3370_v57, %v3210_v36  ;;  %v4338_v39 = vadd.f32 %v4337_v37, %v4336_v15  ;;  %v3386_v3 = vpop.f32.mrf.mxu0  ;;  %v3065_v45 = vadd.f32 %v5958_v53, %v6003_v38 }
 0x39e   : > { %v4339_v7 = vpop.f32.mrf.mxu1 }
 0x39f   : > { %6449 = vst [vmem:[#allocation33_spill] sm:$0xff] %v6063_v12  ;;  %v3473_v54 = vmax.f32 %v3371_v55, 0.0  ;;  %v3213_v9 = vadd.f32 %v4338_v39, %v3052_v63 }
 0x3a0   : > { %v4340_v49 = vpop.f32.mrf.mxu1 }
 0x3a1   : > { %v6070_v58 = vadd.f32 %v3505_v41, %v3473_v54  ;;  %v3374_v21 = vadd.f32 %v3373_v17, %v3213_v9  ;;  %v4341_v40 = vadd.f32 %v4340_v49, %v4339_v7  ;;  %v4584_v41 = vpop.f32.mrf.mxu0  ;;  %v3068_v54 = vadd.f32 %v5962_v27, %v6003_v38 }
 0x3a2   : > { %v4342_v8 = vpop.f32.mrf.mxu1 }
 0x3a3   : > { %v3474_v42 = vmax.f32 %v3374_v21, 0.0  ;;  %v3218_v23 = vadd.f32 %v4341_v40, %v3057_v60  ;;  %v3389_v40 = vpop.f32.mrf.mxu0 }
 0x3a4   : > { %v4343_v4 = vpop.f32.mrf.mxu1 }
 0x3a5   : > { %v6077_v35 = vadd.f32 %v3506_v11, %v3474_v42  ;;  %v3379_v57 = vadd.f32 %v4579_v14, %v3218_v23  ;;  %v4344_v32 = vadd.f32 %v4343_v4, %v4342_v8  ;;  %v3508_v14 = vld [vmem:[%s6321_s5 + $0x58] sm:$0xff]  ;;  %v3073_v8 = vadd.f32 %v5964_v51, %v6003_v38  ;;  %v3510_v4 = vld [vmem:[%s6321_s5 + $0x68] sm:$0xff] }
 0x3a6   : > { %v4345_v6 = vpop.f32.mrf.mxu1 }
 0x3a7   : > { %v3475_v1 = vmax.f32 %v3379_v57, 0.0  ;;  %v3221_v13 = vadd.f32 %v4344_v32, %v3060_v30 }
 0x3a8   : > { %v4346_v15 = vpop.f32.mrf.mxu1 }
 0x3a9   : > { %v6084_v36 = vadd.f32 %v3507_v25, %v3475_v1  ;;  %v3382_v37 = vadd.f32 %v4580_v44, %v3221_v13  ;;  %v4347_v20 = vadd.f32 %v4346_v15, %v4345_v6  ;;  %v3509_v44 = vld [vmem:[%s6321_s5 + $0x60] sm:$0xff]  ;;  %v4587_v25 = vpop.f32.mrf.mxu0  ;;  %v3076_v1 = vadd.f32 %v5966_v47, %v6003_v38  ;;  %v3511_v15 = vld [vmem:[%s6321_s5 + $0x70] sm:$0xff] }
 0x3aa   : > { %v4348_v63 = vpop.f32.mrf.mxu1 }
 0x3ab   : > { %v3476_v55 = vmax.f32 %v3382_v37, 0.0  ;;  %v3226_v39 = vadd.f32 %v4347_v20, %v3065_v45 }
 0x3ac   : > { %v4349_v7 = vpop.f32.mrf.mxu1 }
 0x3ad   : > { %v6091_v9 = vadd.f32 %v3508_v14, %v3476_v55  ;;  %v3387_v17 = vadd.f32 %v3386_v3, %v3226_v39  ;;  %v4350_v53 = vadd.f32 %v4349_v7, %v4348_v63  ;;  %v3402_v14 = vpop.f32.mrf.mxu0  ;;  %v3081_v55 = vadd.f32 %v5968_v50, %v6003_v38 }
 0x3ae   : > { %v4351_v49 = vpop.f32.mrf.mxu1 }
 0x3af   : > { %6450 = vst [vmem:[#allocation7_spill] sm:$0xff] %v6091_v9  ;;  %v3477_v60 = vmax.f32 %v3387_v17, 0.0  ;;  %v3229_v21 = vadd.f32 %v4350_v53, %v3068_v54 }
 0x3b0   : > { %v4352_v11 = vpop.f32.mrf.mxu1 }
 0x3b1   : > { %v6098_v42 = vadd.f32 %v3509_v44, %v3477_v60  ;;  %v3390_v23 = vadd.f32 %v3389_v40, %v3229_v21  ;;  %v4353_v27 = vadd.f32 %v4352_v11, %v4351_v49  ;;  %v4588_v44 = vpop.f32.mrf.mxu0  ;;  %v3084_v60 = vadd.f32 %v5970_v0, %v6003_v38 }
 0x3b2   : > { %v4354_v30 = vpop.f32.mrf.mxu1 }
 0x3b3   : > { %v3478_v57 = vmax.f32 %v3390_v23, 0.0  ;;  %v3234_v32 = vadd.f32 %v4353_v27, %v3073_v8  ;;  %v3405_v27 = vpop.f32.mrf.mxu0 }
 0x3b4   : > { %v4355_v6 = vpop.f32.mrf.mxu1 }
 0x3b5   : > { %v6105_v13 = vadd.f32 %v3510_v4, %v3478_v57  ;;  %v3395_v3 = vadd.f32 %v4583_v43, %v3234_v32  ;;  %v4356_v51 = vadd.f32 %v4355_v6, %v4354_v30  ;;  %v3512_v43 = vld [vmem:[%s6321_s5 + $0x78] sm:$0xff]  ;;  %v3089_v30 = vadd.f32 %v5972_v22, %v6003_v38  ;;  %v3514_v6 = vld [vmem:[%s6321_s5 + $0x88] sm:$0xff] }
 0x3b6   : > { %v4357_v45 = vpop.f32.mrf.mxu1 }
 0x3b7   : > { %v3479_v37 = vmax.f32 %v3395_v3, 0.0  ;;  %v3237_v20 = vadd.f32 %v4356_v51, %v3076_v1 }
 0x3b8   : > { %v4358_v63 = vpop.f32.mrf.mxu1 }
 0x3b9   : > { %v6112_v39 = vadd.f32 %v3511_v15, %v3479_v37  ;;  %v3398_v7 = vadd.f32 %v4584_v41, %v3237_v20  ;;  %v4359_v47 = vadd.f32 %v4358_v63, %v4357_v45  ;;  %v3513_v41 = vld [vmem:[%s6321_s5 + $0x80] sm:$0xff]  ;;  %v4591_v15 = vpop.f32.mrf.mxu0  ;;  %v3092_v37 = vadd.f32 %v5974_v56, %v6003_v38  ;;  %v3515_v63 = vld [vmem:[%s6321_s5 + $0x90] sm:$0xff] }
 0x3ba   : > { %v4360_v54 = vpop.f32.mrf.mxu1 }
 0x3bb   : > { %v3480_v17 = vmax.f32 %v3398_v7, 0.0  ;;  %v3242_v53 = vadd.f32 %v4359_v47, %v3081_v55 }
 0x3bc   : > { %v4361_v49 = vpop.f32.mrf.mxu1 }
 0x3bd   : > { %v6119_v21 = vadd.f32 %v3512_v43, %v3480_v17  ;;  %v3403_v40 = vadd.f32 %v3402_v14, %v3242_v53  ;;  %v4362_v50 = vadd.f32 %v4361_v49, %v4360_v54  ;;  %v3418_v43 = vpop.f32.mrf.mxu0  ;;  %v3097_v17 = vadd.f32 %v5976_v61, %v6003_v38 }
 0x3be   : > { %v4363_v11 = vpop.f32.mrf.mxu1 }
 0x3bf   : > { %v3481_v8 = vmax.f32 %v3403_v40, 0.0  ;;  %v3245_v23 = vadd.f32 %v4362_v50, %v3084_v60 }
 0x3c0   : > { %v4364_v4 = vpop.f32.mrf.mxu1 }
 0x3c1   : > { %v6126_v57 = vadd.f32 %v3513_v41, %v3481_v8  ;;  %v3406_v32 = vadd.f32 %v3405_v27, %v3245_v23  ;;  %v4365_v0 = vadd.f32 %v4364_v4, %v4363_v11  ;;  %v4592_v41 = vpop.f32.mrf.mxu0  ;;  %v3100_v8 = vadd.f32 %v5978_v52, %v6003_v38 }
 0x3c2   : > { %v4366_v1 = vpop.f32.mrf.mxu1 }
 0x3c3   : > { %v3482_v3 = vmax.f32 %v3406_v32, 0.0  ;;  %v3250_v51 = vadd.f32 %v4365_v0, %v3089_v30  ;;  %v3421_v0 = vpop.f32.mrf.mxu0 }
 0x3c4   : > { %v4367_v45 = vpop.f32.mrf.mxu1 }
 0x3c5   : > { %v6133_v20 = vadd.f32 %v3514_v6, %v3482_v3  ;;  %v3411_v14 = vadd.f32 %v4587_v25, %v3250_v51  ;;  %v4368_v22 = vadd.f32 %v4367_v45, %v4366_v1  ;;  %v3516_v25 = vld [vmem:[%s6321_s5 + $0x98] sm:$0xff]  ;;  %v3105_v1 = vadd.f32 %v5980_v2, %v6003_v38  ;;  %v3518_v45 = vld [vmem:[%s6321_s5 + $0xa8] sm:$0xff] }
 0x3c6   : > { %v4369_v55 = vpop.f32.mrf.mxu1 }
 0x3c7   : > { %v3483_v7 = vmax.f32 %v3411_v14, 0.0  ;;  %v3253_v47 = vadd.f32 %v4368_v22, %v3092_v37 }
 0x3c8   : > { %v4370_v54 = vpop.f32.mrf.mxu1 }
 0x3c9   : > { %v6140_v53 = vadd.f32 %v3515_v63, %v3483_v7  ;;  %v3414_v49 = vadd.f32 %v4588_v44, %v3253_v47  ;;  %v4371_v56 = vadd.f32 %v4370_v54, %v4369_v55  ;;  %v3517_v44 = vld [vmem:[%s6321_s5 + $0xa0] sm:$0xff]  ;;  %v4595_v63 = vpop.f32.mrf.mxu0  ;;  %v3108_v7 = vadd.f32 %v5982_v62, %v6003_v38  ;;  %v3519_v54 = vld [vmem:[%s6321_s5 + $0xb0] sm:$0xff] }
 0x3ca   : > { %v4372_v60 = vpop.f32.mrf.mxu1 }
 0x3cb   : > { %v3484_v40 = vmax.f32 %v3414_v49, 0.0  ;;  %v3258_v50 = vadd.f32 %v4371_v56, %v3097_v17 }
 0x3cc   : > { %v4373_v11 = vpop.f32.mrf.mxu1 }
 0x3cd   : > { %v6147_v23 = vadd.f32 %v3516_v25, %v3484_v40  ;;  %v3419_v27 = vadd.f32 %v3418_v43, %v3258_v50  ;;  %v4374_v61 = vadd.f32 %v4373_v11, %v4372_v60  ;;  %v3434_v25 = vpop.f32.mrf.mxu0  ;;  %v3113_v40 = vadd.f32 %v5984_v5, %v6003_v38 }
 0x3ce   : > { %v4375_v4 = vpop.f32.mrf.mxu1 }
 0x3cf   : > { %v3485_v30 = vmax.f32 %v3419_v27, 0.0  ;;  %v3261_v32 = vadd.f32 %v4374_v61, %v3100_v8 }
 0x3d0   : > { %v4376_v6 = vpop.f32.mrf.mxu1 }
 0x3d1   : > { %v6154_v3 = vadd.f32 %v3517_v44, %v3485_v30  ;;  %v3422_v51 = vadd.f32 %v3421_v0, %v3261_v32  ;;  %v4377_v52 = vadd.f32 %v4376_v6, %v4375_v4  ;;  %v4596_v44 = vpop.f32.mrf.mxu0  ;;  %v3116_v30 = vadd.f32 %v5986_v19, %v6003_v38 }
 0x3d2   : > { %v4378_v37 = vpop.f32.mrf.mxu1 }
 0x3d3   : > { %v3486_v14 = vmax.f32 %v3422_v51, 0.0  ;;  %v3266_v22 = vadd.f32 %v4377_v52, %v3105_v1  ;;  %v3437_v52 = vpop.f32.mrf.mxu0 }
 0x3d4   : > { %v4379_v55 = vpop.f32.mrf.mxu1 }
 0x3d5   : > { %v6161_v47 = vadd.f32 %v3518_v45, %v3486_v14  ;;  %v3427_v43 = vadd.f32 %v4591_v15, %v3266_v22  ;;  %v4380_v2 = vadd.f32 %v4379_v55, %v4378_v37  ;;  %v3520_v15 = vld [vmem:[%s6321_s5 + $0xb8] sm:$0xff]  ;;  %v3121_v37 = vadd.f32 %v5988_v10, %v6003_v38  ;;  %v3522_v55 = vld [vmem:[%s6321_s5 + $0xc8] sm:$0xff] }
 0x3d6   : > { %v4381_v17 = vpop.f32.mrf.mxu1 }
 0x3d7   : > { %v3487_v49 = vmax.f32 %v3427_v43, 0.0  ;;  %v3269_v56 = vadd.f32 %v4380_v2, %v3108_v7  ;;  %v4599_v43 = vpop.f32.mrf.mxu0 }
 0x3d8   : > { %v4382_v60 = vpop.f32.mrf.mxu1 }
 0x3d9   : > { %v6168_v50 = vadd.f32 %v3519_v54, %v3487_v49  ;;  %v3430_v11 = vadd.f32 %v4592_v41, %v3269_v56  ;;  %v4383_v62 = vadd.f32 %v4382_v60, %v4381_v17  ;;  %v3521_v41 = vld [vmem:[%s6321_s5 + $0xc0] sm:$0xff]  ;;  %v3124_v49 = vadd.f32 %v5990_v59, %v6003_v38  ;;  %v3523_v60 = vld [vmem:[%s6321_s5 + $0xd0] sm:$0xff] }
 0x3da   : > { %v4384_v8 = vpop.f32.mrf.mxu1 }
 0x3db   : > { %v3488_v27 = vmax.f32 %v3430_v11, 0.0  ;;  %v3274_v61 = vadd.f32 %v4383_v62, %v3113_v40  ;;  %v3450_v11 = vpop.f32.mrf.mxu0 }
 0x3dc   : > { %v4385_v4 = vpop.f32.mrf.mxu1 }
 0x3dd   : > { %v6175_v32 = vadd.f32 %v3520_v15, %v3488_v27  ;;  %v3435_v0 = vadd.f32 %v3434_v25, %v3274_v61  ;;  %v4386_v5 = vadd.f32 %v4385_v4, %v4384_v8  ;;  %v3129_v27 = vadd.f32 %v5992_v31, %v6003_v38 }
 0x3de   : > { %v4387_v6 = vpop.f32.mrf.mxu1 }
 0x3df   : > { %v3489_v1 = vmax.f32 %v3435_v0, 0.0  ;;  %v3277_v51 = vadd.f32 %v4386_v5, %v3116_v30  ;;  %v4600_v0 = vpop.f32.mrf.mxu0 }
 0x3e0   : > { %v4388_v45 = vpop.f32.mrf.mxu1 }
 0x3e1   : > { %v6182_v14 = vadd.f32 %v3521_v41, %v3489_v1  ;;  %v3438_v22 = vadd.f32 %v3437_v52, %v3277_v51  ;;  %v4389_v19 = vadd.f32 %v4388_v45, %v4387_v6  ;;  %v3132_v1 = vadd.f32 %v5994_v26, %v6003_v38 }
 0x3e2   : > { %v4390_v7 = vpop.f32.mrf.mxu1 }
 0x3e3   : > { %v3490_v2 = vmax.f32 %v3438_v22, 0.0  ;;  %v3282_v54 = vadd.f32 %v4389_v19, %v3121_v37  ;;  %v3453_v37 = vpop.f32.mrf.mxu0 }
 0x3e4   : > { %v4391_v17 = vpop.f32.mrf.mxu1 }
 0x3e5   : > { %v6189_v56 = vadd.f32 %v3522_v55, %v3490_v2  ;;  %v3443_v25 = vadd.f32 %v4595_v63, %v3282_v54  ;;  %v4392_v10 = vadd.f32 %v4391_v17, %v4390_v7  ;;  %v3524_v63 = vld [vmem:[%s6321_s5 + $0xd8] sm:$0xff]  ;;  %v3137_v7 = vadd.f32 %v5996_v16, %v6003_v38  ;;  %v3526_v17 = vld [vmem:[%s6321_s5 + $0xe8] sm:$0xff] }
 0x3e6   : > { %v4393_v40 = vpop.f32.mrf.mxu1 }
 0x3e7   : > { %v3491_v62 = vmax.f32 %v3443_v25, 0.0  ;;  %v3285_v15 = vadd.f32 %v4392_v10, %v3124_v49 }
 0x3e8   : > { %v4394_v8 = vpop.f32.mrf.mxu1 }
 0x3e9   : > { %v6196_v61 = vadd.f32 %v3523_v60, %v3491_v62  ;;  %v3446_v4 = vadd.f32 %v4596_v44, %v3285_v15  ;;  %v4395_v59 = vadd.f32 %v4394_v8, %v4393_v40  ;;  %v3525_v44 = vld [vmem:[%s6321_s5 + $0xe0] sm:$0xff]  ;;  %v3140_v40 = vadd.f32 %v5998_v18, %v6003_v38  ;;  %v3527_v15 = vld [vmem:[%s6321_s5 + $0xf0] sm:$0xff] }
 0x3ea   : > { %v4396_v30 = vpop.f32.mrf.mxu1 }
 0x3eb   : > { %v3492_v5 = vmax.f32 %v3446_v4, 0.0  ;;  %v3290_v41 = vadd.f32 %v4395_v59, %v3129_v27 }
 0x3ec   : > { %v4397_v6 = vpop.f32.mrf.mxu1 }
 0x3ed   : > { %v6203_v51 = vadd.f32 %v3524_v63, %v3492_v5  ;;  %v4398_v52 = vadd.f32 %v4397_v6, %v4396_v30  ;;  %v3451_v31 = vadd.f32 %v3450_v11, %v3290_v41  ;;  %v3528_v63 = vld [vmem:[%s6321_s5 + $0xf8] sm:$0xff] }
 0x3ee   : > { %v4399_v45 = vpop.f32.mrf.mxu1 }
 0x3ef   : > { %v3493_v22 = vmax.f32 %v3451_v31, 0.0  ;;  %v3293_v19 = vadd.f32 %v4398_v52, %v3132_v1 }
 0x3f0   : > { %v4400_v55 = vpop.f32.mrf.mxu1 }
 0x3f1   : > { %v6210_v2 = vadd.f32 %v3525_v44, %v3493_v22  ;;  %v4401_v54 = vadd.f32 %v4400_v55, %v4399_v45  ;;  %v3454_v26 = vadd.f32 %v3453_v37, %v3293_v19 }
 0x3f2   : > { %v4402_v49 = vpop.f32.mrf.mxu1 }
 0x3f3   : > { %6451 = vst [vmem:[#allocation20_spill] sm:$0xff] %v6210_v2  ;;  %v3298_v25 = vadd.f32 %v4401_v54, %v3137_v7  ;;  %v3494_v10 = vmax.f32 %v3454_v26, 0.0 }
 0x3f4   : > { %v4403_v60 = vpop.f32.mrf.mxu1 }
 0x3f5   : > { %v3459_v11 = vadd.f32 %v4599_v43, %v3298_v25  ;;  %v6217_v62 = vadd.f32 %v3526_v17, %v3494_v10  ;;  %v4404_v16 = vadd.f32 %v4403_v60, %v4402_v49 }
 0x3f7   : > { %v3495_v8 = vmax.f32 %v3459_v11, 0.0  ;;  %v3301_v27 = vadd.f32 %v4404_v16, %v3140_v40 }
 0x3f9   : > { %v6222_v4 = vadd.f32 %v3527_v15, %v3495_v8  ;;  %v3462_v59 = vadd.f32 %v4600_v0, %v3301_v27 }
 0x3fb   : > { %6452 = vst [vmem:[#allocation34_spill] sm:$0xff] %v6222_v4  ;;  %v3496_v30 = vmax.f32 %v3462_v59, 0.0 }
 0x3fd   : > { %v6227_v5 = vadd.f32 %v3528_v63, %v3496_v30 }
 0x3ff   : > { %6453 = vst [vmem:[#allocation8_spill] sm:$0xff] %v6227_v5 }
 0x400 LB: >> { %v3571_v18 = vlaneseq  ;;  %s4106_s21 = sshll.u32 %s4830_s18, 4  ;;  %v6454_v33 = vld [vmem:[#allocation32_spill] sm:$0xff]  ;;  %v6455_v12 = vld [vmem:[#allocation33_spill] sm:$0xff]  ;;  %v6456_v28 = vld [vmem:[#allocation6_spill] sm:$0xff]  ;;  %s3816_s23 = scalar_lea.vmem %s286_s17, %s4830_s18 [#allocation3]  ;;  %s4830_s18 = sphi %s6230_s18, %s3566_s18  }
 0x401   : >> { %s6237_s22 = scalar_lea.vmem %s4950_s19, %s4106_s21  ;;  %v6457_v34 = vld [vmem:[#allocation19_spill] sm:$0xff]  ;;  %s3566_s18 = sadd.s32 1, %s4830_s18  }
 0x402   : >> { %v3572_v38 = vshrl.u32 %v3571_v18, 7  ;;  %v3569_v43 = vld [vmem:[%s6237_s22] sm:$0xff]  ;;  %v3570_v49 = vld [vmem:[%s6237_s22 + $0x8] sm:$0xff]  ;;  %v6458_v9 = vld [vmem:[#allocation7_spill] sm:$0xff]  ;;  %p3563_p11 = scmp.ge.s32.totalorder %s3566_s18, 8  }
 0x403   : > { %s4108_s29 = sshll.u32 (%p3563_p11), %s4896_s28, 7  ;;  %s3832_s14 = sshll.u32 (%p3563_p11), %s286_s17, 4  ;;  %s3833_s14 = int_to_ptr.vmem [resolvable:$true] %s3832_s14 }
 0x404   : >> { %v3584_v0 = vsub.s32 1, %v3572_v38  ;;  %v3573_v41 = vsub.s32 0, %v3572_v38  ;;  %v3595_v52 = vsub.s32 2, %v3572_v38  ;;  %v3606_v44 = vsub.s32 3, %v3572_v38  ;;  %s3830_s9 = scalar_lea.hbm (%p3563_p11), %s6323_s7, %s4108_s29  ;;  %s3819_s15 = scalar_lea.sflag (%p3563_p11), [#allocation4], %s284_s13 }
 0x405   : >> { %v3617_v37 = vsub.s32 4, %v3572_v38  ;;  %v3628_v19 = vsub.s32 5, %v3572_v38  ;;  %v3639_v7 = vsub.s32 6, %v3572_v38  ;;  %v3650_v26 = vsub.s32 7, %v3572_v38  ;;  %s4762_s21 = scalar_lea.vmem (%p3563_p11), %s3833_s14, 128  ;;  %s4834_s18 = smov (%p3563_p11), [#allocation3]  }
 0x406   : >> { %v3585_v6 = vrot.slane %v3569_v43, %v3584_v0  ;;  %v3574_v1 = vrot.slane %v3569_v43, %v3573_v41  ;;  %v3596_v31 = vrot.slane %v3569_v43, %v3595_v52  ;;  %v3607_v45 = vrot.slane %v3569_v43, %v3606_v44  ;;  %p4763_p12 = scmp.ne.s32.totalorder (%p3563_p11), %s3833_s14, %s4762_s21  ;;  %s4766_s19 = sshll.u32 (%p3563_p11), %s4834_s18, 4  ;;  %s4767_s19 = int_to_ptr.vmem [resolvable:$false] %s4766_s19 }
 0x407   : >> { %v3618_v22 = vrot.slane %v3569_v43, %v3617_v37  ;;  %v3629_v55 = vrot.slane %v3569_v43, %v3628_v19  ;;  %v3640_v54 = vrot.slane %v3569_v43, %v3639_v7  ;;  %v3651_v17 = vrot.slane %v3569_v43, %v3650_v26  ;;  %s4768_s22 = scalar_lea.vmem (%p3563_p11), %s4767_s19, 256  ;;  %p4769_p1 = scmp.lt.s32.totalorder (%p3563_p11), %s3833_s14, %s4767_s19 }
 0x408   : >> { %3587 = vbcast.lane.b32.xlu1 %v3585_v6, 256  ;;  %3576 = vbcast.lane.b32.xlu0 %v3574_v1, 256  ;;  %v3662_v25 = vrot.slane %v3570_v49, %v3573_v41  ;;  %v3673_v10 = vrot.slane %v3570_v49, %v3584_v0  ;;  %v3684_v60 = vrot.slane %v3570_v49, %v3595_v52  ;;  %p4764_p13 = pnand (%p3563_p11), %p4763_p12, %p4913_p5  ;;  %p4770_p2 = scmp.lt.s32.totalorder (%p3563_p11), %s4768_s22, %s4762_s21 }
 0x409   : >> { %v3695_v40 = vrot.slane %v3570_v49, %v3606_v44  ;;  %v3706_v11 = vrot.slane %v3570_v49, %v3617_v37  ;;  %v3717_v16 = vrot.slane %v3570_v49, %v3628_v19  ;;  %v3728_v15 = vrot.slane %v3570_v49, %v3639_v7 }
 0x40a   : >> { %v3739_v8 = vrot.slane %v3570_v49, %v3650_v26  ;;  %p4765_p0 = pneg (%p3563_p11), %p4764_p13  ;;  %p4771_p3 = por (%p3563_p11), %p4770_p2, %p4769_p1 }
 0x40c   : >> { %3591 = vbcast.lane.b32.xlu1 %v3585_v6, 264  ;;  %3580 = vbcast.lane.b32.xlu0 %v3574_v1, 264  ;;  %p4772_p4 = pnand (%p3563_p11), %p4771_p3, %p4765_p0 }
 0x410   : >> { %3602 = vbcast.lane.b32.xlu1 %v3596_v31, 264  ;;  %3598 = vbcast.lane.b32.xlu0 %v3596_v31, 256 }
 0x414   : >> { %3613 = vbcast.lane.b32.xlu1 %v3607_v45, 264  ;;  %3609 = vbcast.lane.b32.xlu0 %v3607_v45, 256 }
 0x418   : >> { %3624 = vbcast.lane.b32.xlu1 %v3618_v22, 264  ;;  %3620 = vbcast.lane.b32.xlu0 %v3618_v22, 256 }
 0x41c   : >> { %3635 = vbcast.lane.b32.xlu1 %v3629_v55, 264  ;;  %3631 = vbcast.lane.b32.xlu0 %v3629_v55, 256 }
 0x420   : >> { %3646 = vbcast.lane.b32.xlu1 %v3640_v54, 264  ;;  %3642 = vbcast.lane.b32.xlu0 %v3640_v54, 256 }
 0x424   : >> { %3657 = vbcast.lane.b32.xlu1 %v3651_v17, 264  ;;  %3653 = vbcast.lane.b32.xlu0 %v3651_v17, 256 }
 0x428   : >> { %3668 = vbcast.lane.b32.xlu1 %v3662_v25, 264  ;;  %3664 = vbcast.lane.b32.xlu0 %v3662_v25, 256 }
 0x42c   : >> { %3679 = vbcast.lane.b32.xlu1 %v3673_v10, 264  ;;  %3675 = vbcast.lane.b32.xlu0 %v3673_v10, 256 }
 0x430   : >> { %3690 = vbcast.lane.b32.xlu1 %v3684_v60, 264  ;;  %3686 = vbcast.lane.b32.xlu0 %v3684_v60, 256 }
 0x434   : >> { %3701 = vbcast.lane.b32.xlu1 %v3695_v40, 264  ;;  %3697 = vbcast.lane.b32.xlu0 %v3695_v40, 256 }
 0x438   : >> { %3712 = vbcast.lane.b32.xlu1 %v3706_v11, 264  ;;  %3708 = vbcast.lane.b32.xlu0 %v3706_v11, 256 }
 0x43c   : >> { %3723 = vbcast.lane.b32.xlu1 %v3717_v16, 264  ;;  %3719 = vbcast.lane.b32.xlu0 %v3717_v16, 256 }
 0x440   : >> { %3734 = vbcast.lane.b32.xlu1 %v3728_v15, 264  ;;  %3730 = vbcast.lane.b32.xlu0 %v3728_v15, 256 }
 0x444   : >> { %3745 = vbcast.lane.b32.xlu1 %v3739_v8, 264  ;;  %3741 = vbcast.lane.b32.xlu0 %v3739_v8, 256 }
 0x47a   : >> { %v3588_v27 = vpop.permute.xlu1 %3587  ;;  %v3577_v59 = vpop.permute.xlu0 %3576 }
 0x47b   : >> { %v3747_v11 = vmul.f32 %v3577_v59, %v6456_v28  ;;  %v3749_v2 = vmul.f32 %v3588_v27, %v6028_v29 }
 0x47e   : >> { %v3592_v63 = vpop.permute.xlu1 %3591  ;;  %v3581_v30 = vpop.permute.xlu0 %3580 }
 0x47f   : >> { %v3748_v16 = vmul.f32 %v3581_v30, %v6457_v34 }
 0x482   : >> { %v3603_v18 = vpop.permute.xlu1 %3602  ;;  %v3599_v38 = vpop.permute.xlu0 %3598 }
 0x483   : >> { %v3752_v25 = vmul.f32 %v3603_v18, %v6454_v33  ;;  %v3751_v10 = vmul.f32 %v3599_v38, %v6042_v46  ;;  %v3750_v18 = vmul.f32 %v3592_v63, %v6035_v24 }
 0x486   : >> { %v3614_v43 = vpop.permute.xlu1 %3613  ;;  %v3610_v0 = vpop.permute.xlu0 %3609 }
 0x487   : >> { %v3754_v60 = vmul.f32 %v3614_v43, %v6455_v12  ;;  %v3753_v40 = vmul.f32 %v3610_v0, %v6056_v48  ;;  %v3794_v12 = vmax.f32 %v3748_v16, %v3752_v25  ;;  %v3779_v0 = vmax.f32 %v3747_v11, %v3751_v10 }
 0x489   : >> { %v3795_v28 = vmax.f32 %v3750_v18, %v3754_v60 }
 0x48a   : >> { %v3625_v41 = vpop.permute.xlu1 %3624  ;;  %v3621_v6 = vpop.permute.xlu0 %3620 }
 0x48b   : >> { %v3756_v15 = vmul.f32 %v3625_v41, %v6077_v35  ;;  %v3755_v8 = vmul.f32 %v3621_v6, %v6070_v58  ;;  %v3780_v41 = vmax.f32 %v3749_v2, %v3753_v40 }
 0x48d   : >> { %v3796_v34 = vmax.f32 %v3794_v12, %v3756_v15  ;;  %v3781_v27 = vmax.f32 %v3779_v0, %v3755_v8 }
 0x48e   : >> { %v3636_v1 = vpop.permute.xlu1 %3635  ;;  %v3632_v52 = vpop.permute.xlu0 %3631 }
 0x48f   : >> { %v3758_v38 = vmul.f32 %v3636_v1, %v6458_v9  ;;  %v3757_v43 = vmul.f32 %v3632_v52, %v6084_v36 }
 0x491   : >> { %v3797_v25 = vmax.f32 %v3795_v28, %v3758_v38  ;;  %v3782_v10 = vmax.f32 %v3780_v41, %v3757_v43  ;;  %v6459_v43 = vld [vmem:[#allocation20_spill] sm:$0xff] }
 0x492   : >> { %v3647_v31 = vpop.permute.xlu1 %3646  ;;  %v3643_v44 = vpop.permute.xlu0 %3642 }
 0x493   : >> { %v3760_v59 = vmul.f32 %v3647_v31, %v6105_v13  ;;  %v3759_v30 = vmul.f32 %v3643_v44, %v6098_v42 }
 0x495   : >> { %v3798_v60 = vmax.f32 %v3796_v34, %v3760_v59  ;;  %v3783_v2 = vmax.f32 %v3781_v27, %v3759_v30  ;;  %v6460_v27 = vld [vmem:[#allocation8_spill] sm:$0xff] }
 0x496   : >> { %v3658_v45 = vpop.permute.xlu1 %3657  ;;  %v3654_v37 = vpop.permute.xlu0 %3653 }
 0x497   : >> { %v3762_v6 = vmul.f32 %v3658_v45, %v6119_v21  ;;  %v3761_v33 = vmul.f32 %v3654_v37, %v6112_v39 }
 0x499   : >> { %v3799_v12 = vmax.f32 %v3797_v25, %v3762_v6  ;;  %v3784_v40 = vmax.f32 %v3782_v10, %v3761_v33 }
 0x49a   : >> { %v3669_v22 = vpop.permute.xlu1 %3668  ;;  %v3665_v19 = vpop.permute.xlu0 %3664 }
 0x49b   : >> { %v3764_v63 = vmul.f32 %v3669_v22, %v6133_v20  ;;  %v3763_v1 = vmul.f32 %v3665_v19, %v6126_v57 }
 0x49d   : >> { %v3800_v11 = vmax.f32 %v3798_v60, %v3764_v63  ;;  %v3785_v16 = vmax.f32 %v3783_v2, %v3763_v1  ;;  %v6461_v63 = vld [vmem:[#allocation34_spill] sm:$0xff] }
 0x49e   : >> { %v3680_v55 = vpop.permute.xlu1 %3679  ;;  %v3676_v7 = vpop.permute.xlu0 %3675 }
 0x49f   : >> { %v3766_v31 = vmul.f32 %v3680_v55, %v6147_v23  ;;  %v3765_v44 = vmul.f32 %v3676_v7, %v6140_v53 }
 0x4a1   : >> { %v3801_v34 = vmax.f32 %v3799_v12, %v3766_v31  ;;  %v3786_v8 = vmax.f32 %v3784_v40, %v3765_v44 }
 0x4a2   : >> { %v3691_v54 = vpop.permute.xlu1 %3690  ;;  %v3687_v26 = vpop.permute.xlu0 %3686 }
 0x4a3   : >> { %v3768_v45 = vmul.f32 %v3691_v54, %v6161_v47  ;;  %v3767_v37 = vmul.f32 %v3687_v26, %v6154_v3 }
 0x4a5   : >> { %v3802_v18 = vmax.f32 %v3800_v11, %v3768_v45  ;;  %v3787_v33 = vmax.f32 %v3785_v16, %v3767_v37 }
 0x4a6   : >> { %v3702_v17 = vpop.permute.xlu1 %3701  ;;  %v3698_v49 = vpop.permute.xlu0 %3697 }
 0x4a7   : >> { %v3770_v22 = vmul.f32 %v3702_v17, %v6175_v32  ;;  %v3769_v19 = vmul.f32 %v3698_v49, %v6168_v50 }
 0x4a9   : >> { %v3803_v38 = vmax.f32 %v3801_v34, %v3770_v22  ;;  %v3788_v17 = vmax.f32 %v3786_v8, %v3769_v19 }
 0x4aa   : >> { %v3713_v4 = vpop.permute.xlu1 %3712  ;;  %v3709_v5 = vpop.permute.xlu0 %3708 }
 0x4ab   : >> { %v3772_v28 = vmul.f32 %v3713_v4, %v6189_v56  ;;  %v3771_v55 = vmul.f32 %v3709_v5, %v6182_v14 }
 0x4ad   : >> { %v3804_v59 = vmax.f32 %v3802_v18, %v3772_v28  ;;  %v3789_v4 = vmax.f32 %v3787_v33, %v3771_v55 }
 0x4ae   : >> { %v3724_v9 = vpop.permute.xlu1 %3723  ;;  %v3720_v52 = vpop.permute.xlu0 %3719 }
 0x4af   : >> { %v3774_v54 = vmul.f32 %v3724_v9, %v6203_v51  ;;  %v3773_v26 = vmul.f32 %v3720_v52, %v6196_v61 }
 0x4b1   : >> { %v3805_v41 = vmax.f32 %v3803_v38, %v3774_v54  ;;  %v3790_v6 = vmax.f32 %v3788_v17, %v3773_v26 }
 0x4b2   : >> { %v3735_v15 = vpop.permute.xlu1 %3734  ;;  %v3731_v7 = vpop.permute.xlu0 %3730 }
 0x4b3   : >> { %v3776_v49 = vmul.f32 %v3735_v15, %v6217_v62  ;;  %v3775_v0 = vmul.f32 %v3731_v7, %v6459_v43 }
 0x4b5   : >> { %v3806_v52 = vmax.f32 %v3804_v59, %v3776_v49  ;;  %v3791_v25 = vmax.f32 %v3789_v4, %v3775_v0 }
 0x4b6   : >> { %v3746_v30 = vpop.permute.xlu1 %3745  ;;  %v3742_v5 = vpop.permute.xlu0 %3741 }
 0x4b7   : >> { %v3778_v9 = vmul.f32 %v3746_v30, %v6460_v27  ;;  %v3777_v1 = vmul.f32 %v3742_v5, %v6461_v63 }
 0x4b9   : >> { %v3807_v10 = vmax.f32 %v3805_v41, %v3778_v9  ;;  %v3792_v31 = vmax.f32 %v3790_v6, %v3777_v1 }
 0x4bb   : >> { %v3808_v44 = vmax.f32 %v3806_v52, %v3807_v10  ;;  %v3793_v60 = vmax.f32 %v3791_v25, %v3792_v31 }
 0x4bd   : >> { %v3809_v2 = vmax.f32 %v3793_v60, %v3808_v44 }
 0x4bf   : >> { %v3810_v45 = vrot.slane %v3809_v2, 4 }
 0x4c1   : >> { %v3811_v37 = vmax.f32 %v3809_v2, %v3810_v45 }
 0x4c3   : >> { %v3812_v12 = vrot.slane %v3811_v37, 2 }
 0x4c5   : >> { %v3813_v40 = vmax.f32 %v3811_v37, %v3812_v12 }
 0x4c7   : >> { %v3814_v22 = vrot.slane %v3813_v40, 1  ;;  %3565 = sbr.rel (!%p3563_p11) target bundleno = 1024 (0x400), region = 98 }
 0x4c9   : >> { %v3815_v19 = vmax.f32 %v3813_v40, %v3814_v22 }
 0x4cb   : >> { %3817 = vst [vmem:[%s3816_s23] sm:$0x1] %v3815_v19 }
 0x4cc   : > { %4775 = shalt.err (!%p4772_p4)
}
 0x4cd   : > { %s4776_s28 = scalar_lea.hbm %s3830_s9, 128  ;;  %s4780_s17 = scalar_lea.hbm %s6323_s7, 256 }
 0x4ce   : > { %p4777_p7 = scmp.ne.s32.totalorder %s3830_s9, %s4776_s28  ;;  %p4781_p10 = scmp.lt.s32.totalorder %s3830_s9, %s6323_s7 }
 0x4cf   : > { %p4782_p11 = scmp.lt.s32.totalorder %s4780_s17, %s4776_s28 }
 0x4d0   : > { %p4778_p8 = pnand %p4777_p7, %p4913_p5 }
 0x4d1   : > { %p4783_p12 = por %p4782_p11, %p4781_p10 }
 0x4d2   : > { %p4779_p9 = pneg %p4778_p8 }
 0x4d4   : > { %p4784_p13 = pnand %p4783_p12, %p4779_p9 }
 0x4d6   : > { %4787 = shalt.err (!%p4784_p13)
}
 0x4d7   : > { %4609 = dma.vmem_to_hbm [thread:$0]  (%p4913_p5), %s3833_s14, 128, %s3830_s9, %s3819_s15  }
 0x4d8 PF: > { %p4615_p0 = scmp.ge.s32.totalorder %s4826_s27, 2  ;;  %s3844_s20 = sand.u32 1, %s4814_s24  }
 0x4d9   : > { %s3845_s8 = scalar_lea.sflag [#allocation4], %s3844_s20 }
 0x4da   : > { %p4612_p1 = pnand %p4615_p0, %p4917_p6 }
 0x4dc   : > { %p4613_p2 = pneg %p4612_p1 }
 0x4de   : > { %4809 = dma.done.wait (%p4613_p2), %s3845_s8, 128  }
 0x4df   : > { %4811 = vsyncadd (%p4613_p2), %s3845_s8, 4294967168  ;;  %p17_p3 = scmp.ge.s32.totalorder %s4900_s30, 4   ;;  %s6462_s24 = smov %s4818_s25 }
 0x4e0   : > { %s6463_s25 = smov %s4822_s26  ;;  %s6464_s26 = smov %s4911_s10 }
 0x4e1   : > { %s6465_s27 = smov %s4900_s30  ;;  %19 = sbr.rel (!%p17_p3) target bundleno = 3 (0x3), region = 109 }
 0x4e6   :  { %3850 = vsyncpa [#allocation4], 1 }
 0x4e7   :  { %3852 = vsyncpa [#allocation4 + $0x1], 1 }

</bundles_post_ra>
